<compile_context>
chip_gen: v5e
topology: v5e:2x2
jax: 0.10.0
libtpu: 0.0.40
codegen_flags: <defaults>
</compile_context>

<pallas_src>
import functools

import jax
import jax.numpy as jnp
import numpy as np
from jax import lax
from jax.experimental import pallas as pl
from jax.experimental.pallas import tpu as pltpu


def _fold_rows_to_8(x, op):
    """(tR, N) -> (8, N) using only elementwise min/max (no cross-sublane XLU work)."""
    r = x[0:8, :]
    for s in range(8, x.shape[0], 8):
        r = op(r, x[s:s + 8, :])
    return r


def _matrix_nms_kernel(mw_ref, boxes_ref, scores_ref, out_ref, *scratch,
                       inv_sigmas, row_block, use_cache):
    cache_ref = scratch[0] if use_cache else None
    n_masks = mw_ref.shape[1]
    N = mw_ref.shape[2]
    tR = row_block
    nblk = N // tR

    # Column-side (all boxes) data, loaded once.
    boxes_c = boxes_ref[0].astype(jnp.float32)               # (4, N)
    x1c, y1c = boxes_c[0:1, :], boxes_c[1:2, :]
    x2c, y2c = boxes_c[2:3, :], boxes_c[3:4, :]
    area_c = (x2c - x1c) * (y2c - y1c)                       # (1, N)
    scores_c = scores_ref[0].astype(jnp.float32)             # (1, N)
    col_idx = lax.broadcasted_iota(jnp.int32, (1, N), 1)

    def block_masked_iou_sq(i0):
        """(tR, N) masked iou^2 (0 where row does not precede column) for rows [i0, i0+tR)."""
        # Row-side operands: tiny (1, tR) -> (tR, 1) relayouts (XLU; overlaps with VALU work).
        x1r = jnp.transpose(x1c[:, i0:i0 + tR])
        y1r = jnp.transpose(y1c[:, i0:i0 + tR])
        x2r = jnp.transpose(x2c[:, i0:i0 + tR])
        y2r = jnp.transpose(y2c[:, i0:i0 + tR])
        sr = jnp.transpose(scores_c[:, i0:i0 + tR])           # (tR, 1)
        iw = jnp.maximum(jnp.minimum(x2r, x2c) - jnp.maximum(x1r, x1c), 0.0)
        ih = jnp.maximum(jnp.minimum(y2r, y2c) - jnp.maximum(y1r, y1c), 0.0)
        inter = iw * ih
        area_r = (x2r - x1r) * (y2r - y1r)
        union = area_r + area_c - inter
        # Divide -> EUP approx reciprocal + two Newton steps (ulp-level error, keeps 5e-5 rtol).
        r = pl.reciprocal(union, approx=True)
        r = r * (2.0 - union * r)
        r = r * (2.0 - union * r)
        iou = inter * r                                       # (tR, N)
        row_idx = i0 + lax.broadcasted_iota(jnp.int32, (tR, 1), 0)
        precede = (sr > scores_c) | ((sr == scores_c) & (row_idx < col_idx))
        return jnp.where(precede, iou * iou, 0.0)

    # ---- pass 1: iou_max_sq[j] = max over rows i preceding j of iou[i, j]^2 (+ fill cache) ----
    acc8 = jnp.zeros((8, N), jnp.float32)
    for blk in range(nblk):                                   # fully unrolled, static slices
        i0 = blk * tR
        msq_blk = block_masked_iou_sq(i0)
        if use_cache:
            cache_ref[i0:i0 + tR, :] = msq_blk
        acc8 = jnp.maximum(acc8, _fold_rows_to_8(msq_blk, jnp.maximum))
    iou_max_sq = jnp.max(acc8, axis=0, keepdims=True)         # (1, N); single XLU reduce

    # ---- pass 2: g[j] = min_i ( iou_max_sq[i] - masked_iou_sq[i, j] ) ----
    acc8 = jnp.full((8, N), jnp.inf, dtype=jnp.float32)
    for blk in range(nblk):
        i0 = blk * tR
        msq_r = jnp.transpose(iou_max_sq[:, i0:i0 + tR])      # (tR, 1)
        cached = cache_ref[i0:i0 + tR, :] if use_cache else block_masked_iou_sq(i0)
        term = msq_r - cached
        acc8 = jnp.minimum(acc8, _fold_rows_to_8(term, jnp.minimum))
    g = jnp.min(acc8, axis=0, keepdims=True)                  # (1, N); single XLU reduce

    # ---- decay + weighted sum over thresholds (exp outside the min; multiply by 1/sigma) ----
    mw = mw_ref[0].astype(jnp.float32)                        # (n_masks, N)
    out = jnp.zeros((1, N), jnp.float32)
    for m in range(n_masks):                                  # n_masks is tiny (3)
        out = out + jnp.exp(g * inv_sigmas[m]) * mw[m:m + 1, :]
    # TODO(synk): gauss_decay.detach() is a gradient-only stop_gradient; no-op in forward.
    out_ref[0] = out.astype(out_ref.dtype)


def _vmem_capacity_bytes():
    try:
        cap = getattr(pltpu.get_tpu_info(), "vmem_capacity_bytes", None)
        if cap:
            return int(cap)
    except Exception:
        pass
    return 64 * 1024 * 1024          # conservative default (v7x per-TC VMEM)


def learnable_matrix_nms(mask_weight, boxes, scores, thresholds=(0.1, 0.2, 0.4),
                         row_block=128):
    """mask_weight: (B, n_masks, N); boxes: (B, 4, N) [x1,y1,x2,y2]; scores: (B, C, N)."""
    B, n_masks, N = mask_weight.shape
    assert boxes.shape == (B, 4, N)
    assert scores.shape[0] == B and scores.shape[-1] == N
    assert len(thresholds) == n_masks
    row_block = min(row_block, N)
    assert N % row_block == 0, "n_boxes must be a multiple of row_block"
    assert row_block % 8 == 0, "row_block must be a multiple of 8"

    scores_r = scores[:, :1, :]                       # only channel 0 is used

    # (N, N) masked-iou^2 cache removes the duplicate IoU compute from pass 2.
    # Gated on physical VMEM: v7x (64 MiB) -> only up to N ~ 2048; v5e/v6e -> up to ~4096.
    vmem_cap = _vmem_capacity_bytes()
    cache_bytes = N * N * 4
    margin = 24 << 20                                 # side buffers + block temporaries
    use_cache = (cache_bytes + margin) <= vmem_cap
    vmem_limit = (cache_bytes + margin) if use_cache else (32 << 20)
    vmem_limit = int(max(32 << 20, min(vmem_limit, vmem_cap - (4 << 20))))

    kernel = functools.partial(
        _matrix_nms_kernel,
        inv_sigmas=tuple(1.0 / (float(t) + 1e-12) for t in thresholds),
        row_block=row_block,
        use_cache=use_cache)

    scratch_shapes = [pltpu.VMEM((N, N), jnp.float32)] if use_cache else []

    return pl.pallas_call(
        kernel,
        out_shape=jax.ShapeDtypeStruct((B, 1, N), mask_weight.dtype),
        grid_spec=pltpu.PrefetchScalarGridSpec(
            num_scalar_prefetch=0,
            grid=(B,),
            in_specs=[
                pl.BlockSpec((1, n_masks, N), lambda b: (b, 0, 0)),  # mask_weight
                pl.BlockSpec((1, 4, N), lambda b: (b, 0, 0)),        # boxes
                pl.BlockSpec((1, 1, N), lambda b: (b, 0, 0)),        # scores (channel 0)
            ],
            out_specs=pl.BlockSpec((1, 1, N), lambda b: (b, 0, 0)),
            scratch_shapes=scratch_shapes,
        ),
        compiler_params=pltpu.CompilerParams(
            dimension_semantics=("parallel",),
            vmem_limit_bytes=vmem_limit),
    )(mask_weight, boxes, scores_r)


# ----------------------- pure-JAX reference (direct translation) -----------------------
def _jaccard_ref(a, b):
    max_xy = jnp.minimum(a[:, None, 2:], b[None, :, 2:])
    min_xy = jnp.maximum(a[:, None, :2], b[None, :, :2])
    wh = jnp.maximum(max_xy - min_xy, 0.0)
    inter = wh[..., 0] * wh[..., 1]
    area_a = ((a[:, 2] - a[:, 0]) * (a[:, 3] - a[:, 1]))[:, None]
    area_b = ((b[:, 2] - b[:, 0]) * (b[:, 3] - b[:, 1]))[None, :]
    return inter / (area_a + area_b - inter)


def learnable_matrix_nms_ref(mask_weight, boxes, scores, thresholds=(0.1, 0.2, 0.4)):
    B, n_masks, N = mask_weight.shape
    sigmas = jnp.asarray(thresholds, jnp.float32).reshape(1, 1, n_masks)
    sort_idx = jnp.argsort(-scores[:, 0, :], axis=1)          # stable descending sort
    decays = []
    for b in range(B):
        sb = jnp.swapaxes(boxes[b], 0, 1)[sort_idx[b]]        # (N, 4) sorted boxes
        iou = jnp.triu(_jaccard_ref(sb, sb), k=1)
        iou_max = jnp.max(iou, axis=0, keepdims=True)         # (1, N)
        gd = -(iou ** 2 - jnp.transpose(iou_max) ** 2)        # (N, N)
        gd = jnp.exp(gd[:, :, None] / (sigmas + 1e-12))       # (N, N, n_masks)
        decays.append(jnp.min(gd, axis=0))                    # (N, n_masks)
    gauss_decay = jnp.swapaxes(jnp.stack(decays, axis=0), 1, 2)   # (B, n_masks, N) sorted
    unsort_idx = jnp.argsort(sort_idx, axis=1)
    idx = jnp.broadcast_to(unsort_idx[:, None, :], (B, n_masks, N))
    gauss_decay = jnp.take_along_axis(gauss_decay, idx, axis=2)
    return jnp.sum(gauss_decay * mask_weight, axis=1, keepdims=True)


if __name__ == "__main__":
    # Small but representative shapes: B batches, n_masks=3 thresholds, N boxes.
    B, n_masks, N = 2, 3, 256
    thresholds = (0.1, 0.2, 0.4)

    key = jax.random.PRNGKey(0)
    kxy, kwh, ks, kw = jax.random.split(key, 4)

    xy1 = jax.random.uniform(kxy, (B, 2, N), jnp.float32, 0.0, 0.7)
    wh = jax.random.uniform(kwh, (B, 2, N), jnp.float32, 0.05, 0.3)
    boxes = jnp.concatenate([xy1, xy1 + wh], axis=1)          # (B, 4, N) [x1, y1, x2, y2]
    scores = jax.random.uniform(ks, (B, 1, N), jnp.float32)
    mask_weight = jax.random.uniform(kw, (B, n_masks, N), jnp.float32)

    out = jax.block_until_ready(
        learnable_matrix_nms(mask_weight, boxes, scores, thresholds))
    out_ref = jax.block_until_ready(
        learnable_matrix_nms_ref(mask_weight, boxes, scores, thresholds))

    np.testing.assert_allclose(np.asarray(out), np.asarray(out_ref), rtol=5e-5, atol=1e-5)
    print("KERNEL_OK")
</pallas_src>

<mosaic_0001>
module attributes {stable_mosaic.version = 11 : i64} {
  func.func @_matrix_nms_kernel(%arg0: i32, %arg1: memref<1x3x256xf32, #tpu.memory_space<vmem>>, %arg2: memref<1x4x256xf32, #tpu.memory_space<vmem>>, %arg3: memref<1x1x256xf32, #tpu.memory_space<vmem>>, %arg4: memref<1x1x256xf32, #tpu.memory_space<vmem>>, %arg5: memref<256x256xf32, #tpu.memory_space<vmem>>) attributes {dimension_semantics = [#tpu.dimension_semantics<parallel>], iteration_bounds = array<i64: 2>, scalar_prefetch = 0 : i64, scratch_operands = 1 : i64, tpu.core_type = #tpu.core_type<tc>, window_params = [{transform_indices = @transform_0, window_bounds = array<i64: 1, 3, 256>}, {transform_indices = @transform_1, window_bounds = array<i64: 1, 4, 256>}, {transform_indices = @transform_2, window_bounds = array<i64: 1, 1, 256>}, {transform_indices = @transform_3, window_bounds = array<i64: 1, 1, 256>}]} {
    %c0 = arith.constant 0 : index
    %c0_0 = arith.constant 0 : index
    %c0_1 = arith.constant 0 : index
    %0 = vector.load %arg2[%c0, %c0_0, %c0_1] : memref<1x4x256xf32, #tpu.memory_space<vmem>>, vector<1x4x256xf32>
    %1 = vector.shape_cast %0 : vector<1x4x256xf32> to vector<4x256xf32>
    %2 = vector.extract_strided_slice %1 {offsets = [0, 0], sizes = [1, 256], strides = [1, 1]} : vector<4x256xf32> to vector<1x256xf32>
    %3 = vector.extract_strided_slice %1 {offsets = [1, 0], sizes = [1, 256], strides = [1, 1]} : vector<4x256xf32> to vector<1x256xf32>
    %4 = vector.extract_strided_slice %1 {offsets = [2, 0], sizes = [1, 256], strides = [1, 1]} : vector<4x256xf32> to vector<1x256xf32>
    %5 = vector.extract_strided_slice %1 {offsets = [3, 0], sizes = [1, 256], strides = [1, 1]} : vector<4x256xf32> to vector<1x256xf32>
    %6 = arith.subf %4, %2 : vector<1x256xf32>
    %7 = arith.subf %5, %3 : vector<1x256xf32>
    %8 = arith.mulf %6, %7 : vector<1x256xf32>
    %c0_2 = arith.constant 0 : index
    %c0_3 = arith.constant 0 : index
    %c0_4 = arith.constant 0 : index
    %9 = vector.load %arg3[%c0_2, %c0_3, %c0_4] : memref<1x1x256xf32, #tpu.memory_space<vmem>>, vector<1x1x256xf32>
    %10 = vector.shape_cast %9 : vector<1x1x256xf32> to vector<1x256xf32>
    %11 = tpu.iota {dimensions = array<i32: 1>} : vector<1x256xi32>
    %cst = arith.constant 0.000000e+00 : f32
    %12 = vector.broadcast %cst : f32 to vector<8x256xf32>
    %13 = vector.extract_strided_slice %2 {offsets = [0, 0], sizes = [1, 128], strides = [1, 1]} : vector<1x256xf32> to vector<1x128xf32>
    %14 = tpu.transpose %13, [1, 0] : vector<1x128xf32> -> vector<128x1xf32>
    %15 = vector.extract_strided_slice %3 {offsets = [0, 0], sizes = [1, 128], strides = [1, 1]} : vector<1x256xf32> to vector<1x128xf32>
    %16 = tpu.transpose %15, [1, 0] : vector<1x128xf32> -> vector<128x1xf32>
    %17 = vector.extract_strided_slice %4 {offsets = [0, 0], sizes = [1, 128], strides = [1, 1]} : vector<1x256xf32> to vector<1x128xf32>
    %18 = tpu.transpose %17, [1, 0] : vector<1x128xf32> -> vector<128x1xf32>
    %19 = vector.extract_strided_slice %5 {offsets = [0, 0], sizes = [1, 128], strides = [1, 1]} : vector<1x256xf32> to vector<1x128xf32>
    %20 = tpu.transpose %19, [1, 0] : vector<1x128xf32> -> vector<128x1xf32>
    %21 = vector.extract_strided_slice %10 {offsets = [0, 0], sizes = [1, 128], strides = [1, 1]} : vector<1x256xf32> to vector<1x128xf32>
    %22 = tpu.transpose %21, [1, 0] : vector<1x128xf32> -> vector<128x1xf32>
    %23 = vector.broadcast %18 : vector<128x1xf32> to vector<128x256xf32>
    %24 = vector.broadcast %4 : vector<1x256xf32> to vector<128x256xf32>
    %25 = arith.minimumf %23, %24 : vector<128x256xf32>
    %26 = vector.broadcast %14 : vector<128x1xf32> to vector<128x256xf32>
    %27 = vector.broadcast %2 : vector<1x256xf32> to vector<128x256xf32>
    %28 = arith.maximumf %26, %27 : vector<128x256xf32>
    %29 = arith.subf %25, %28 : vector<128x256xf32>
    %cst_5 = arith.constant 0.000000e+00 : f32
    %30 = vector.broadcast %cst_5 : f32 to vector<128x256xf32>
    %31 = arith.maximumf %29, %30 : vector<128x256xf32>
    %32 = vector.broadcast %20 : vector<128x1xf32> to vector<128x256xf32>
    %33 = vector.broadcast %5 : vector<1x256xf32> to vector<128x256xf32>
    %34 = arith.minimumf %32, %33 : vector<128x256xf32>
    %35 = vector.broadcast %16 : vector<128x1xf32> to vector<128x256xf32>
    %36 = vector.broadcast %3 : vector<1x256xf32> to vector<128x256xf32>
    %37 = arith.maximumf %35, %36 : vector<128x256xf32>
    %38 = arith.subf %34, %37 : vector<128x256xf32>
    %cst_6 = arith.constant 0.000000e+00 : f32
    %39 = vector.broadcast %cst_6 : f32 to vector<128x256xf32>
    %40 = arith.maximumf %38, %39 : vector<128x256xf32>
    %41 = arith.mulf %31, %40 : vector<128x256xf32>
    %42 = arith.subf %18, %14 : vector<128x1xf32>
    %43 = arith.subf %20, %16 : vector<128x1xf32>
    %44 = arith.mulf %42, %43 : vector<128x1xf32>
    %45 = vector.broadcast %44 : vector<128x1xf32> to vector<128x256xf32>
    %46 = vector.broadcast %8 : vector<1x256xf32> to vector<128x256xf32>
    %47 = arith.addf %45, %46 : vector<128x256xf32>
    %48 = arith.subf %47, %41 : vector<128x256xf32>
    %49 = tpu.reciprocal %48 {approx = true} : vector<128x256xf32> -> vector<128x256xf32>
    %50 = arith.mulf %48, %49 : vector<128x256xf32>
    %cst_7 = arith.constant 2.000000e+00 : f32
    %51 = vector.broadcast %cst_7 : f32 to vector<128x256xf32>
    %52 = arith.subf %51, %50 : vector<128x256xf32>
    %53 = arith.mulf %49, %52 : vector<128x256xf32>
    %54 = arith.mulf %48, %53 : vector<128x256xf32>
    %cst_8 = arith.constant 2.000000e+00 : f32
    %55 = vector.broadcast %cst_8 : f32 to vector<128x256xf32>
    %56 = arith.subf %55, %54 : vector<128x256xf32>
    %57 = arith.mulf %53, %56 : vector<128x256xf32>
    %58 = arith.mulf %41, %57 : vector<128x256xf32>
    %59 = tpu.iota {dimensions = array<i32: 0>} : vector<128x1xi32>
    %c0_i32 = arith.constant 0 : i32
    %60 = vector.broadcast %c0_i32 : i32 to vector<128x1xi32>
    %61 = arith.addi %60, %59 : vector<128x1xi32>
    %62 = vector.broadcast %22 : vector<128x1xf32> to vector<128x256xf32>
    %63 = vector.broadcast %10 : vector<1x256xf32> to vector<128x256xf32>
    %64 = arith.cmpf ogt, %62, %63 : vector<128x256xf32>
    %65 = vector.broadcast %22 : vector<128x1xf32> to vector<128x256xf32>
    %66 = vector.broadcast %10 : vector<1x256xf32> to vector<128x256xf32>
    %67 = arith.cmpf oeq, %65, %66 : vector<128x256xf32>
    %68 = vector.broadcast %61 : vector<128x1xi32> to vector<128x256xi32>
    %69 = vector.broadcast %11 : vector<1x256xi32> to vector<128x256xi32>
    %70 = arith.cmpi slt, %68, %69 : vector<128x256xi32>
    %71 = arith.andi %67, %70 : vector<128x256xi1>
    %72 = arith.ori %64, %71 : vector<128x256xi1>
    %73 = arith.mulf %58, %58 : vector<128x256xf32>
    %cst_9 = arith.constant 0.000000e+00 : f32
    %74 = vector.broadcast %cst_9 : f32 to vector<128x256xf32>
    %75 = arith.select %72, %73, %74 : vector<128x256xi1>, vector<128x256xf32>
    %c0_10 = arith.constant 0 : index
    %c0_11 = arith.constant 0 : index
    %76 = vector.load %arg5[%c0_10, %c0_11] : memref<256x256xf32, #tpu.memory_space<vmem>>, vector<128x256xf32>
    tpu.vector_store %arg5[%c0_10, %c0_11], %75 {strides = array<i32>} : memref<256x256xf32, #tpu.memory_space<vmem>>, vector<128x256xf32>,
    %77 = vector.extract_strided_slice %75 {offsets = [0, 0], sizes = [8, 256], strides = [1, 1]} : vector<128x256xf32> to vector<8x256xf32>
    %78 = vector.extract_strided_slice %75 {offsets = [8, 0], sizes = [8, 256], strides = [1, 1]} : vector<128x256xf32> to vector<8x256xf32>
    %79 = arith.maximumf %77, %78 : vector<8x256xf32>
    %80 = vector.extract_strided_slice %75 {offsets = [16, 0], sizes = [8, 256], strides = [1, 1]} : vector<128x256xf32> to vector<8x256xf32>
    %81 = arith.maximumf %79, %80 : vector<8x256xf32>
    %82 = vector.extract_strided_slice %75 {offsets = [24, 0], sizes = [8, 256], strides = [1, 1]} : vector<128x256xf32> to vector<8x256xf32>
    %83 = arith.maximumf %81, %82 : vector<8x256xf32>
    %84 = vector.extract_strided_slice %75 {offsets = [32, 0], sizes = [8, 256], strides = [1, 1]} : vector<128x256xf32> to vector<8x256xf32>
    %85 = arith.maximumf %83, %84 : vector<8x256xf32>
    %86 = vector.extract_strided_slice %75 {offsets = [40, 0], sizes = [8, 256], strides = [1, 1]} : vector<128x256xf32> to vector<8x256xf32>
    %87 = arith.maximumf %85, %86 : vector<8x256xf32>
    %88 = vector.extract_strided_slice %75 {offsets = [48, 0], sizes = [8, 256], strides = [1, 1]} : vector<128x256xf32> to vector<8x256xf32>
    %89 = arith.maximumf %87, %88 : vector<8x256xf32>
    %90 = vector.extract_strided_slice %75 {offsets = [56, 0], sizes = [8, 256], strides = [1, 1]} : vector<128x256xf32> to vector<8x256xf32>
    %91 = arith.maximumf %89, %90 : vector<8x256xf32>
    %92 = vector.extract_strided_slice %75 {offsets = [64, 0], sizes = [8, 256], strides = [1, 1]} : vector<128x256xf32> to vector<8x256xf32>
    %93 = arith.maximumf %91, %92 : vector<8x256xf32>
    %94 = vector.extract_strided_slice %75 {offsets = [72, 0], sizes = [8, 256], strides = [1, 1]} : vector<128x256xf32> to vector<8x256xf32>
    %95 = arith.maximumf %93, %94 : vector<8x256xf32>
    %96 = vector.extract_strided_slice %75 {offsets = [80, 0], sizes = [8, 256], strides = [1, 1]} : vector<128x256xf32> to vector<8x256xf32>
    %97 = arith.maximumf %95, %96 : vector<8x256xf32>
    %98 = vector.extract_strided_slice %75 {offsets = [88, 0], sizes = [8, 256], strides = [1, 1]} : vector<128x256xf32> to vector<8x256xf32>
    %99 = arith.maximumf %97, %98 : vector<8x256xf32>
    %100 = vector.extract_strided_slice %75 {offsets = [96, 0], sizes = [8, 256], strides = [1, 1]} : vector<128x256xf32> to vector<8x256xf32>
    %101 = arith.maximumf %99, %100 : vector<8x256xf32>
    %102 = vector.extract_strided_slice %75 {offsets = [104, 0], sizes = [8, 256], strides = [1, 1]} : vector<128x256xf32> to vector<8x256xf32>
    %103 = arith.maximumf %101, %102 : vector<8x256xf32>
    %104 = vector.extract_strided_slice %75 {offsets = [112, 0], sizes = [8, 256], strides = [1, 1]} : vector<128x256xf32> to vector<8x256xf32>
    %105 = arith.maximumf %103, %104 : vector<8x256xf32>
    %106 = vector.extract_strided_slice %75 {offsets = [120, 0], sizes = [8, 256], strides = [1, 1]} : vector<128x256xf32> to vector<8x256xf32>
    %107 = arith.maximumf %105, %106 : vector<8x256xf32>
    %108 = arith.maximumf %12, %107 : vector<8x256xf32>
    %109 = vector.extract_strided_slice %2 {offsets = [0, 128], sizes = [1, 128], strides = [1, 1]} : vector<1x256xf32> to vector<1x128xf32>
    %110 = tpu.transpose %109, [1, 0] : vector<1x128xf32> -> vector<128x1xf32>
    %111 = vector.extract_strided_slice %3 {offsets = [0, 128], sizes = [1, 128], strides = [1, 1]} : vector<1x256xf32> to vector<1x128xf32>
    %112 = tpu.transpose %111, [1, 0] : vector<1x128xf32> -> vector<128x1xf32>
    %113 = vector.extract_strided_slice %4 {offsets = [0, 128], sizes = [1, 128], strides = [1, 1]} : vector<1x256xf32> to vector<1x128xf32>
    %114 = tpu.transpose %113, [1, 0] : vector<1x128xf32> -> vector<128x1xf32>
    %115 = vector.extract_strided_slice %5 {offsets = [0, 128], sizes = [1, 128], strides = [1, 1]} : vector<1x256xf32> to vector<1x128xf32>
    %116 = tpu.transpose %115, [1, 0] : vector<1x128xf32> -> vector<128x1xf32>
    %117 = vector.extract_strided_slice %10 {offsets = [0, 128], sizes = [1, 128], strides = [1, 1]} : vector<1x256xf32> to vector<1x128xf32>
    %118 = tpu.transpose %117, [1, 0] : vector<1x128xf32> -> vector<128x1xf32>
    %119 = vector.broadcast %114 : vector<128x1xf32> to vector<128x256xf32>
    %120 = vector.broadcast %4 : vector<1x256xf32> to vector<128x256xf32>
    %121 = arith.minimumf %119, %120 : vector<128x256xf32>
    %122 = vector.broadcast %110 : vector<128x1xf32> to vector<128x256xf32>
    %123 = vector.broadcast %2 : vector<1x256xf32> to vector<128x256xf32>
    %124 = arith.maximumf %122, %123 : vector<128x256xf32>
    %125 = arith.subf %121, %124 : vector<128x256xf32>
    %cst_12 = arith.constant 0.000000e+00 : f32
    %126 = vector.broadcast %cst_12 : f32 to vector<128x256xf32>
    %127 = arith.maximumf %125, %126 : vector<128x256xf32>
    %128 = vector.broadcast %116 : vector<128x1xf32> to vector<128x256xf32>
    %129 = vector.broadcast %5 : vector<1x256xf32> to vector<128x256xf32>
    %130 = arith.minimumf %128, %129 : vector<128x256xf32>
    %131 = vector.broadcast %112 : vector<128x1xf32> to vector<128x256xf32>
    %132 = vector.broadcast %3 : vector<1x256xf32> to vector<128x256xf32>
    %133 = arith.maximumf %131, %132 : vector<128x256xf32>
    %134 = arith.subf %130, %133 : vector<128x256xf32>
    %cst_13 = arith.constant 0.000000e+00 : f32
    %135 = vector.broadcast %cst_13 : f32 to vector<128x256xf32>
    %136 = arith.maximumf %134, %135 : vector<128x256xf32>
    %137 = arith.mulf %127, %136 : vector<128x256xf32>
    %138 = arith.subf %114, %110 : vector<128x1xf32>
    %139 = arith.subf %116, %112 : vector<128x1xf32>
    %140 = arith.mulf %138, %139 : vector<128x1xf32>
    %141 = vector.broadcast %140 : vector<128x1xf32> to vector<128x256xf32>
    %142 = vector.broadcast %8 : vector<1x256xf32> to vector<128x256xf32>
    %143 = arith.addf %141, %142 : vector<128x256xf32>
    %144 = arith.subf %143, %137 : vector<128x256xf32>
    %145 = tpu.reciprocal %144 {approx = true} : vector<128x256xf32> -> vector<128x256xf32>
    %146 = arith.mulf %144, %145 : vector<128x256xf32>
    %cst_14 = arith.constant 2.000000e+00 : f32
    %147 = vector.broadcast %cst_14 : f32 to vector<128x256xf32>
    %148 = arith.subf %147, %146 : vector<128x256xf32>
    %149 = arith.mulf %145, %148 : vector<128x256xf32>
    %150 = arith.mulf %144, %149 : vector<128x256xf32>
    %cst_15 = arith.constant 2.000000e+00 : f32
    %151 = vector.broadcast %cst_15 : f32 to vector<128x256xf32>
    %152 = arith.subf %151, %150 : vector<128x256xf32>
    %153 = arith.mulf %149, %152 : vector<128x256xf32>
    %154 = arith.mulf %137, %153 : vector<128x256xf32>
    %155 = tpu.iota {dimensions = array<i32: 0>} : vector<128x1xi32>
    %c128_i32 = arith.constant 128 : i32
    %156 = vector.broadcast %c128_i32 : i32 to vector<128x1xi32>
    %157 = arith.addi %156, %155 : vector<128x1xi32>
    %158 = vector.broadcast %118 : vector<128x1xf32> to vector<128x256xf32>
    %159 = vector.broadcast %10 : vector<1x256xf32> to vector<128x256xf32>
    %160 = arith.cmpf ogt, %158, %159 : vector<128x256xf32>
    %161 = vector.broadcast %118 : vector<128x1xf32> to vector<128x256xf32>
    %162 = vector.broadcast %10 : vector<1x256xf32> to vector<128x256xf32>
    %163 = arith.cmpf oeq, %161, %162 : vector<128x256xf32>
    %164 = vector.broadcast %157 : vector<128x1xi32> to vector<128x256xi32>
    %165 = vector.broadcast %11 : vector<1x256xi32> to vector<128x256xi32>
    %166 = arith.cmpi slt, %164, %165 : vector<128x256xi32>
    %167 = arith.andi %163, %166 : vector<128x256xi1>
    %168 = arith.ori %160, %167 : vector<128x256xi1>
    %169 = arith.mulf %154, %154 : vector<128x256xf32>
    %cst_16 = arith.constant 0.000000e+00 : f32
    %170 = vector.broadcast %cst_16 : f32 to vector<128x256xf32>
    %171 = arith.select %168, %169, %170 : vector<128x256xi1>, vector<128x256xf32>
    %c128 = arith.constant 128 : index
    %c0_17 = arith.constant 0 : index
    %172 = vector.load %arg5[%c128, %c0_17] : memref<256x256xf32, #tpu.memory_space<vmem>>, vector<128x256xf32>
    tpu.vector_store %arg5[%c128, %c0_17], %171 {strides = array<i32>} : memref<256x256xf32, #tpu.memory_space<vmem>>, vector<128x256xf32>,
    %173 = vector.extract_strided_slice %171 {offsets = [0, 0], sizes = [8, 256], strides = [1, 1]} : vector<128x256xf32> to vector<8x256xf32>
    %174 = vector.extract_strided_slice %171 {offsets = [8, 0], sizes = [8, 256], strides = [1, 1]} : vector<128x256xf32> to vector<8x256xf32>
    %175 = arith.maximumf %173, %174 : vector<8x256xf32>
    %176 = vector.extract_strided_slice %171 {offsets = [16, 0], sizes = [8, 256], strides = [1, 1]} : vector<128x256xf32> to vector<8x256xf32>
    %177 = arith.maximumf %175, %176 : vector<8x256xf32>
    %178 = vector.extract_strided_slice %171 {offsets = [24, 0], sizes = [8, 256], strides = [1, 1]} : vector<128x256xf32> to vector<8x256xf32>
    %179 = arith.maximumf %177, %178 : vector<8x256xf32>
    %180 = vector.extract_strided_slice %171 {offsets = [32, 0], sizes = [8, 256], strides = [1, 1]} : vector<128x256xf32> to vector<8x256xf32>
    %181 = arith.maximumf %179, %180 : vector<8x256xf32>
    %182 = vector.extract_strided_slice %171 {offsets = [40, 0], sizes = [8, 256], strides = [1, 1]} : vector<128x256xf32> to vector<8x256xf32>
    %183 = arith.maximumf %181, %182 : vector<8x256xf32>
    %184 = vector.extract_strided_slice %171 {offsets = [48, 0], sizes = [8, 256], strides = [1, 1]} : vector<128x256xf32> to vector<8x256xf32>
    %185 = arith.maximumf %183, %184 : vector<8x256xf32>
    %186 = vector.extract_strided_slice %171 {offsets = [56, 0], sizes = [8, 256], strides = [1, 1]} : vector<128x256xf32> to vector<8x256xf32>
    %187 = arith.maximumf %185, %186 : vector<8x256xf32>
    %188 = vector.extract_strided_slice %171 {offsets = [64, 0], sizes = [8, 256], strides = [1, 1]} : vector<128x256xf32> to vector<8x256xf32>
    %189 = arith.maximumf %187, %188 : vector<8x256xf32>
    %190 = vector.extract_strided_slice %171 {offsets = [72, 0], sizes = [8, 256], strides = [1, 1]} : vector<128x256xf32> to vector<8x256xf32>
    %191 = arith.maximumf %189, %190 : vector<8x256xf32>
    %192 = vector.extract_strided_slice %171 {offsets = [80, 0], sizes = [8, 256], strides = [1, 1]} : vector<128x256xf32> to vector<8x256xf32>
    %193 = arith.maximumf %191, %192 : vector<8x256xf32>
    %194 = vector.extract_strided_slice %171 {offsets = [88, 0], sizes = [8, 256], strides = [1, 1]} : vector<128x256xf32> to vector<8x256xf32>
    %195 = arith.maximumf %193, %194 : vector<8x256xf32>
    %196 = vector.extract_strided_slice %171 {offsets = [96, 0], sizes = [8, 256], strides = [1, 1]} : vector<128x256xf32> to vector<8x256xf32>
    %197 = arith.maximumf %195, %196 : vector<8x256xf32>
    %198 = vector.extract_strided_slice %171 {offsets = [104, 0], sizes = [8, 256], strides = [1, 1]} : vector<128x256xf32> to vector<8x256xf32>
    %199 = arith.maximumf %197, %198 : vector<8x256xf32>
    %200 = vector.extract_strided_slice %171 {offsets = [112, 0], sizes = [8, 256], strides = [1, 1]} : vector<128x256xf32> to vector<8x256xf32>
    %201 = arith.maximumf %199, %200 : vector<8x256xf32>
    %202 = vector.extract_strided_slice %171 {offsets = [120, 0], sizes = [8, 256], strides = [1, 1]} : vector<128x256xf32> to vector<8x256xf32>
    %203 = arith.maximumf %201, %202 : vector<8x256xf32>
    %204 = arith.maximumf %108, %203 : vector<8x256xf32>
    %cst_18 = arith.constant dense<0xFF800000> : vector<256xf32>
    %205 = vector.multi_reduction <maximumf>, %204, %cst_18 [0] : vector<8x256xf32> to vector<256xf32>
    %206 = vector.shape_cast %205 : vector<256xf32> to vector<1x256xf32>
    %cst_19 = arith.constant 0x7F800000 : f32
    %207 = vector.broadcast %cst_19 : f32 to vector<8x256xf32>
    %208 = vector.extract_strided_slice %206 {offsets = [0, 0], sizes = [1, 128], strides = [1, 1]} : vector<1x256xf32> to vector<1x128xf32>
    %209 = tpu.transpose %208, [1, 0] : vector<1x128xf32> -> vector<128x1xf32>
    %c0_20 = arith.constant 0 : index
    %c0_21 = arith.constant 0 : index
    %210 = vector.load %arg5[%c0_20, %c0_21] : memref<256x256xf32, #tpu.memory_space<vmem>>, vector<128x256xf32>
    %211 = vector.broadcast %209 : vector<128x1xf32> to vector<128x256xf32>
    %212 = arith.subf %211, %210 : vector<128x256xf32>
    %213 = vector.extract_strided_slice %212 {offsets = [0, 0], sizes = [8, 256], strides = [1, 1]} : vector<128x256xf32> to vector<8x256xf32>
    %214 = vector.extract_strided_slice %212 {offsets = [8, 0], sizes = [8, 256], strides = [1, 1]} : vector<128x256xf32> to vector<8x256xf32>
    %215 = arith.minimumf %213, %214 : vector<8x256xf32>
    %216 = vector.extract_strided_slice %212 {offsets = [16, 0], sizes = [8, 256], strides = [1, 1]} : vector<128x256xf32> to vector<8x256xf32>
    %217 = arith.minimumf %215, %216 : vector<8x256xf32>
    %218 = vector.extract_strided_slice %212 {offsets = [24, 0], sizes = [8, 256], strides = [1, 1]} : vector<128x256xf32> to vector<8x256xf32>
    %219 = arith.minimumf %217, %218 : vector<8x256xf32>
    %220 = vector.extract_strided_slice %212 {offsets = [32, 0], sizes = [8, 256], strides = [1, 1]} : vector<128x256xf32> to vector<8x256xf32>
    %221 = arith.minimumf %219, %220 : vector<8x256xf32>
    %222 = vector.extract_strided_slice %212 {offsets = [40, 0], sizes = [8, 256], strides = [1, 1]} : vector<128x256xf32> to vector<8x256xf32>
    %223 = arith.minimumf %221, %222 : vector<8x256xf32>
    %224 = vector.extract_strided_slice %212 {offsets = [48, 0], sizes = [8, 256], strides = [1, 1]} : vector<128x256xf32> to vector<8x256xf32>
    %225 = arith.minimumf %223, %224 : vector<8x256xf32>
    %226 = vector.extract_strided_slice %212 {offsets = [56, 0], sizes = [8, 256], strides = [1, 1]} : vector<128x256xf32> to vector<8x256xf32>
    %227 = arith.minimumf %225, %226 : vector<8x256xf32>
    %228 = vector.extract_strided_slice %212 {offsets = [64, 0], sizes = [8, 256], strides = [1, 1]} : vector<128x256xf32> to vector<8x256xf32>
    %229 = arith.minimumf %227, %228 : vector<8x256xf32>
    %230 = vector.extract_strided_slice %212 {offsets = [72, 0], sizes = [8, 256], strides = [1, 1]} : vector<128x256xf32> to vector<8x256xf32>
    %231 = arith.minimumf %229, %230 : vector<8x256xf32>
    %232 = vector.extract_strided_slice %212 {offsets = [80, 0], sizes = [8, 256], strides = [1, 1]} : vector<128x256xf32> to vector<8x256xf32>
    %233 = arith.minimumf %231, %232 : vector<8x256xf32>
    %234 = vector.extract_strided_slice %212 {offsets = [88, 0], sizes = [8, 256], strides = [1, 1]} : vector<128x256xf32> to vector<8x256xf32>
    %235 = arith.minimumf %233, %234 : vector<8x256xf32>
    %236 = vector.extract_strided_slice %212 {offsets = [96, 0], sizes = [8, 256], strides = [1, 1]} : vector<128x256xf32> to vector<8x256xf32>
    %237 = arith.minimumf %235, %236 : vector<8x256xf32>
    %238 = vector.extract_strided_slice %212 {offsets = [104, 0], sizes = [8, 256], strides = [1, 1]} : vector<128x256xf32> to vector<8x256xf32>
    %239 = arith.minimumf %237, %238 : vector<8x256xf32>
    %240 = vector.extract_strided_slice %212 {offsets = [112, 0], sizes = [8, 256], strides = [1, 1]} : vector<128x256xf32> to vector<8x256xf32>
    %241 = arith.minimumf %239, %240 : vector<8x256xf32>
    %242 = vector.extract_strided_slice %212 {offsets = [120, 0], sizes = [8, 256], strides = [1, 1]} : vector<128x256xf32> to vector<8x256xf32>
    %243 = arith.minimumf %241, %242 : vector<8x256xf32>
    %244 = arith.minimumf %207, %243 : vector<8x256xf32>
    %245 = vector.extract_strided_slice %206 {offsets = [0, 128], sizes = [1, 128], strides = [1, 1]} : vector<1x256xf32> to vector<1x128xf32>
    %246 = tpu.transpose %245, [1, 0] : vector<1x128xf32> -> vector<128x1xf32>
    %c128_22 = arith.constant 128 : index
    %c0_23 = arith.constant 0 : index
    %247 = vector.load %arg5[%c128_22, %c0_23] : memref<256x256xf32, #tpu.memory_space<vmem>>, vector<128x256xf32>
    %248 = vector.broadcast %246 : vector<128x1xf32> to vector<128x256xf32>
    %249 = arith.subf %248, %247 : vector<128x256xf32>
    %250 = vector.extract_strided_slice %249 {offsets = [0, 0], sizes = [8, 256], strides = [1, 1]} : vector<128x256xf32> to vector<8x256xf32>
    %251 = vector.extract_strided_slice %249 {offsets = [8, 0], sizes = [8, 256], strides = [1, 1]} : vector<128x256xf32> to vector<8x256xf32>
    %252 = arith.minimumf %250, %251 : vector<8x256xf32>
    %253 = vector.extract_strided_slice %249 {offsets = [16, 0], sizes = [8, 256], strides = [1, 1]} : vector<128x256xf32> to vector<8x256xf32>
    %254 = arith.minimumf %252, %253 : vector<8x256xf32>
    %255 = vector.extract_strided_slice %249 {offsets = [24, 0], sizes = [8, 256], strides = [1, 1]} : vector<128x256xf32> to vector<8x256xf32>
    %256 = arith.minimumf %254, %255 : vector<8x256xf32>
    %257 = vector.extract_strided_slice %249 {offsets = [32, 0], sizes = [8, 256], strides = [1, 1]} : vector<128x256xf32> to vector<8x256xf32>
    %258 = arith.minimumf %256, %257 : vector<8x256xf32>
    %259 = vector.extract_strided_slice %249 {offsets = [40, 0], sizes = [8, 256], strides = [1, 1]} : vector<128x256xf32> to vector<8x256xf32>
    %260 = arith.minimumf %258, %259 : vector<8x256xf32>
    %261 = vector.extract_strided_slice %249 {offsets = [48, 0], sizes = [8, 256], strides = [1, 1]} : vector<128x256xf32> to vector<8x256xf32>
    %262 = arith.minimumf %260, %261 : vector<8x256xf32>
    %263 = vector.extract_strided_slice %249 {offsets = [56, 0], sizes = [8, 256], strides = [1, 1]} : vector<128x256xf32> to vector<8x256xf32>
    %264 = arith.minimumf %262, %263 : vector<8x256xf32>
    %265 = vector.extract_strided_slice %249 {offsets = [64, 0], sizes = [8, 256], strides = [1, 1]} : vector<128x256xf32> to vector<8x256xf32>
    %266 = arith.minimumf %264, %265 : vector<8x256xf32>
    %267 = vector.extract_strided_slice %249 {offsets = [72, 0], sizes = [8, 256], strides = [1, 1]} : vector<128x256xf32> to vector<8x256xf32>
    %268 = arith.minimumf %266, %267 : vector<8x256xf32>
    %269 = vector.extract_strided_slice %249 {offsets = [80, 0], sizes = [8, 256], strides = [1, 1]} : vector<128x256xf32> to vector<8x256xf32>
    %270 = arith.minimumf %268, %269 : vector<8x256xf32>
    %271 = vector.extract_strided_slice %249 {offsets = [88, 0], sizes = [8, 256], strides = [1, 1]} : vector<128x256xf32> to vector<8x256xf32>
    %272 = arith.minimumf %270, %271 : vector<8x256xf32>
    %273 = vector.extract_strided_slice %249 {offsets = [96, 0], sizes = [8, 256], strides = [1, 1]} : vector<128x256xf32> to vector<8x256xf32>
    %274 = arith.minimumf %272, %273 : vector<8x256xf32>
    %275 = vector.extract_strided_slice %249 {offsets = [104, 0], sizes = [8, 256], strides = [1, 1]} : vector<128x256xf32> to vector<8x256xf32>
    %276 = arith.minimumf %274, %275 : vector<8x256xf32>
    %277 = vector.extract_strided_slice %249 {offsets = [112, 0], sizes = [8, 256], strides = [1, 1]} : vector<128x256xf32> to vector<8x256xf32>
    %278 = arith.minimumf %276, %277 : vector<8x256xf32>
    %279 = vector.extract_strided_slice %249 {offsets = [120, 0], sizes = [8, 256], strides = [1, 1]} : vector<128x256xf32> to vector<8x256xf32>
    %280 = arith.minimumf %278, %279 : vector<8x256xf32>
    %281 = arith.minimumf %244, %280 : vector<8x256xf32>
    %cst_24 = arith.constant dense<0x7F800000> : vector<256xf32>
    %282 = vector.multi_reduction <minimumf>, %281, %cst_24 [0] : vector<8x256xf32> to vector<256xf32>
    %283 = vector.shape_cast %282 : vector<256xf32> to vector<1x256xf32>
    %c0_25 = arith.constant 0 : index
    %c0_26 = arith.constant 0 : index
    %c0_27 = arith.constant 0 : index
    %284 = vector.load %arg1[%c0_25, %c0_26, %c0_27] : memref<1x3x256xf32, #tpu.memory_space<vmem>>, vector<1x3x256xf32>
    %285 = vector.shape_cast %284 : vector<1x3x256xf32> to vector<3x256xf32>
    %cst_28 = arith.constant 0.000000e+00 : f32
    %286 = vector.broadcast %cst_28 : f32 to vector<1x256xf32>
    %cst_29 = arith.constant 1.000000e+01 : f32
    %287 = vector.broadcast %cst_29 : f32 to vector<1x256xf32>
    %288 = arith.mulf %283, %287 : vector<1x256xf32>
    %289 = math.exp %288 : vector<1x256xf32>
    %290 = vector.extract_strided_slice %285 {offsets = [0, 0], sizes = [1, 256], strides = [1, 1]} : vector<3x256xf32> to vector<1x256xf32>
    %291 = arith.mulf %289, %290 : vector<1x256xf32>
    %292 = arith.addf %286, %291 : vector<1x256xf32>
    %cst_30 = arith.constant 5.000000e+00 : f32
    %293 = vector.broadcast %cst_30 : f32 to vector<1x256xf32>
    %294 = arith.mulf %283, %293 : vector<1x256xf32>
    %295 = math.exp %294 : vector<1x256xf32>
    %296 = vector.extract_strided_slice %285 {offsets = [1, 0], sizes = [1, 256], strides = [1, 1]} : vector<3x256xf32> to vector<1x256xf32>
    %297 = arith.mulf %295, %296 : vector<1x256xf32>
    %298 = arith.addf %292, %297 : vector<1x256xf32>
    %cst_31 = arith.constant 2.500000e+00 : f32
    %299 = vector.broadcast %cst_31 : f32 to vector<1x256xf32>
    %300 = arith.mulf %283, %299 : vector<1x256xf32>
    %301 = math.exp %300 : vector<1x256xf32>
    %302 = vector.extract_strided_slice %285 {offsets = [2, 0], sizes = [1, 256], strides = [1, 1]} : vector<3x256xf32> to vector<1x256xf32>
    %303 = arith.mulf %301, %302 : vector<1x256xf32>
    %304 = arith.addf %298, %303 : vector<1x256xf32>
    %c0_32 = arith.constant 0 : index
    %c0_33 = arith.constant 0 : index
    %c0_34 = arith.constant 0 : index
    %305 = vector.load %arg4[%c0_32, %c0_33, %c0_34] : memref<1x1x256xf32, #tpu.memory_space<vmem>>, vector<1x1x256xf32>
    %306 = vector.shape_cast %305 : vector<1x1x256xf32> to vector<1x256xf32>
    %307 = vector.shape_cast %304 : vector<1x256xf32> to vector<1x1x256xf32>
    tpu.vector_store %arg4[%c0_32, %c0_33, %c0_34], %307 {strides = array<i32>} : memref<1x1x256xf32, #tpu.memory_space<vmem>>, vector<1x1x256xf32>,
    return
  }
  func.func @transform_0(%arg0: i32) -> (i32, i32, i32) {
    %c0_i32 = arith.constant 0 : i32
    %c0_i32_0 = arith.constant 0 : i32
    %c0_i32_1 = arith.constant 0 : i32
    return %arg0, %c0_i32, %c0_i32_0 : i32, i32, i32
  }
  func.func @transform_1(%arg0: i32) -> (i32, i32, i32) {
    %c0_i32 = arith.constant 0 : i32
    %c0_i32_0 = arith.constant 0 : i32
    %c0_i32_1 = arith.constant 0 : i32
    return %arg0, %c0_i32, %c0_i32_0 : i32, i32, i32
  }
  func.func @transform_2(%arg0: i32) -> (i32, i32, i32) {
    %c0_i32 = arith.constant 0 : i32
    %c0_i32_0 = arith.constant 0 : i32
    %c0_i32_1 = arith.constant 0 : i32
    return %arg0, %c0_i32, %c0_i32_0 : i32, i32, i32
  }
  func.func @transform_3(%arg0: i32) -> (i32, i32, i32) {
    %c0_i32 = arith.constant 0 : i32
    %c0_i32_0 = arith.constant 0 : i32
    %c0_i32_1 = arith.constant 0 : i32
    return %arg0, %c0_i32, %c0_i32_0 : i32, i32, i32
  }
}

</mosaic_0001>

<bundles_post_ra>
// kernel: tpu_custom_call.1
= control target key start
LH: loop header
LB: loop body
LE: loop exit
PB: predicated region body
PF: predicated region fallthrough
CT: control target
= control target key end

     0   :  { %8 = vsyncpa [#allocation4], 0  ;;  %s8254_s0 = inlined_call_operand.vmem [shape: f32[2,3,256], index: 0, kind: input, shape index: {}]   ;;  %s8255_s1 = inlined_call_operand.vmem [shape: f32[2,4,256], index: 1, kind: input, shape index: {}]   ;;  %s8256_s2 = inlined_call_operand.vmem [shape: f32[2,1,256], index: 2, kind: input, shape index: {}]   ;;  %s8257_s3 = inlined_call_operand.hbm [shape: f32[2,1,256], index: 3, kind: output, shape index: {}]  }
   0x1   :  { %10 = vsyncpa [#allocation4 + $0x1], 0  ;;  %s4336_s12 = smov 0   ;;  %s4338_s13 = smov 0  }
   0x2   :  { %s4340_s14 = smov 0   ;;  %s4342_s15 = smov 0  }
   0x3 LB: > { %s4357_s16 = sadd.s32 4294967295, %s4313_s15   ;;  %s4049_s17 = sadd.s32 4294967294, %s4313_s15   ;;  %s4313_s15 = sphi %s4342_s15, %s9486_s15   ;;  %s4309_s14 = sphi %s4340_s14, %s9485_s14   ;;  %s4305_s13 = sphi %s4338_s13, %s9484_s13   ;;  %s4301_s12 = sphi %s4336_s12, %s9483_s12  }
   0x4   : > { %s4361_s18 = sadd.s32 1, %s4313_s15   ;;  %s101_s19 = sadd.s32 1, %s4309_s14 }
   0x5   : > { %s98_s20 = ssub.s32 %s4313_s15, %s4361_s18  ;;  %p111_p0 = scmp.ne.s32.totalorder %s4309_s14, %s4305_s13 }
   0x6   : > { %p99_p1 = scmp.eq.s32.totalorder %s98_s20, 0  ;;  %p112_p2 = scmp.eq.s32.totalorder %s4357_s16, 1 }
   0x7   : > { %p117_p3 = scmp.ne.s32.totalorder %s4305_s13, %s4301_s12  ;;  %p118_p4 = scmp.eq.s32.totalorder %s4049_s17, 1 }
   0x8   : > { %s4372_s21 = scalar_select %p99_p1, %s4309_s14, %s101_s19  }
   0x9   : > { %p4374_p5 = por %p112_p2, %p111_p0  ;;  %p4378_p6 = por %p118_p4, %p117_p3 }
   0xa   : > { %p4052_p7 = scmp.ge.s32.totalorder %s4313_s15, 1  ;;  %p159_p8 = scmp.lt.s32.totalorder %s4313_s15, 3 }
   0xc   : > { %p160_p9 = pnand %p4052_p7, %p159_p8 }
   0xe   : > { %163 = sbr.rel (%p160_p9) target bundleno = 1779 (0x6f3), region = 32 }
  0x13   : > { %p192_p10 = scmp.lt.s32.totalorder %s4357_s16, 1  ;;  %s189_s9 = sand.u32 1, %s4305_s13  }
  0x14   : > { %s4053_s10 = sshll.u32 %s189_s9, 1  ;;  %s4061_s11 = sshll.u32 %s4357_s16, 1 }
  0x15   : > { %s4386_s24 = scalar_select %p192_p10, %s4357_s16, 1 }
  0x16   : > { %s3961_s20 = scalar_lea.hbm %s8257_s3, %s4061_s11  ;;  %s4271_s4 = scalar_lea.hbm %s8257_s3, 4 }
  0x17   : > { %s4058_s25 = sshll.u32 %s4386_s24, 1  ;;  %s4064_s26 = sshll.u32 %s4386_s24, 3 }
  0x18   : > { %s205_s29 = scalar_lea.vmem %s8256_s2, %s4058_s25  ;;  %s4400_s5 = scalar_lea.vmem %s8255_s1, %s4064_s26 }
  0x19   : > { %v4393_v0 = vld [vmem:[%s205_s29] sm:$0x3]  ;;  %s196_s8 = scalar_lea.vmem %s8254_s0, %s4064_s26  ;;  %s191_s24 = scalar_lea.vmem [#allocation3], %s4053_s10 }
  0x1a   : > { %8579 = vst [vmem:[#allocation6_spill] sm:$0xff] %v4393_v0  ;;  %354 = vxpose.xlu2.b32.start.end [1/1] (short) %v4393_v0, 128  ;;  %v4404_v1 = vld [vmem:[%s4400_s5] sm:$0xff]  ;;  %s3963_s25 = sshll.u32 %s191_s24, 4  ;;  %s3965_s16 = sshll.u32 %s3961_s20, 4  ;;  %s3964_s25 = int_to_ptr.vmem [resolvable:$true] %s3963_s25  ;;  %s3966_s16 = int_to_ptr.hbm [resolvable:$true] %s3965_s16 }
  0x1b   : > { %220 = vxpose.xlu0.b32.start.end [1/1] (short) %v4404_v1, 128  ;;  %v8262_v2 = vperm.slane %v4404_v1, 2  ;;  %v8264_v3 = vperm.slane %v4404_v1, 4  ;;  %v8261_v4 = vperm.slane %v4404_v1, 1  ;;  %v8259_v5 = vperm.slane %v4404_v1, 3  ;;  %s3951_s26 = scalar_lea.sflag [#allocation4], %s189_s9  ;;  %s4265_s27 = sshra.s32 %s3966_s16, 4  ;;  %s4266_s27 = int_to_ptr.hbm [resolvable:$true] %s4265_s27 }
  0x1c   : > { %v8258_v41 = vperm.slane %v4404_v1, 7  ;;  %v8263_v43 = vperm.slane %v4404_v1, 6  ;;  %v8260_v45 = vperm.slane %v4404_v1, 5  ;;  %s4267_s28 = scalar_lea.hbm %s4266_s27, 2  ;;  %p4272_p0 = scmp.lt.s32.totalorder %s4266_s27, %s8257_s3 }
  0x1d   : > { %288 = vxpose.xlu1.b32.start.end [1/1] (short) %v8262_v2, 128  ;;  %p4268_p11 = scmp.ne.s32.totalorder %s4266_s27, %s4267_s28  ;;  %p4273_p1 = scmp.lt.s32.totalorder %s4271_s4, %s4267_s28 }
  0x1f   : > { %p4269_p12 = pnand %p4268_p11, %p4374_p5  ;;  %p4274_p2 = por %p4273_p1, %p4272_p0 }
  0x21   : > { %p4270_p13 = pneg %p4269_p12 }
  0x23   : > { %p4275_p3 = pnand %p4274_p2, %p4270_p13 }
  0x9a   : > { %1857 = vxpose.xlu2.b32.start.end [1/1] (short) %v8264_v3, 128 }
  0x9b   : > { %254 = vxpose.xlu0.b32.start.end [1/1] (short) %v8261_v4, 128 }
  0x9d   : > { %322 = vxpose.xlu1.b32.start.end [1/1] (short) %v8259_v5, 128 }
  0xb3   : > { %v4419_v6 = vpop.trf.xlu2 }
  0xb4   : > { %8580 = vst [vmem:[#allocation7_spill] sm:$0xff] %v4419_v6 }
  0xbb   : > { %v4421_v7 = vpop.trf.xlu2 }
  0xbc   : > { %8581 = vst [vmem:[#allocation8_spill] sm:$0xff] %v4421_v7 }
  0xbf   : > { %v4423_v8 = vpop.trf.xlu0 }
  0xc1   : > { %v4425_v9 = vpop.trf.xlu1 }
  0xc3   : > { %v4427_v10 = vpop.trf.xlu2 }
  0xc4   : > { %8582 = vst [vmem:[#allocation9_spill] sm:$0xff] %v4427_v10 }
  0xc7   : > { %v4429_v11 = vpop.trf.xlu0 }
  0xc9   : > { %v4431_v12 = vpop.trf.xlu1 }
  0xcb   : > { %v4433_v13 = vpop.trf.xlu2 }
  0xcc   : > { %8583 = vst [vmem:[#allocation10_spill] sm:$0xff] %v4433_v13 }
  0xcf   : > { %v4435_v14 = vpop.trf.xlu0 }
  0xd1   : > { %v4437_v15 = vpop.trf.xlu1 }
  0xd3   : > { %v4439_v16 = vpop.trf.xlu2 }
  0xd4   : > { %8584 = vst [vmem:[#allocation11_spill] sm:$0xff] %v4439_v16 }
  0xd7   : > { %v4441_v17 = vpop.trf.xlu0 }
  0xd9   : > { %v4443_v18 = vpop.trf.xlu1 }
  0xdb   : > { %v4445_v19 = vpop.trf.xlu2 }
  0xdc   : > { %8585 = vst [vmem:[#allocation12_spill] sm:$0xff] %v4445_v19 }
  0xdf   : > { %v4447_v20 = vpop.trf.xlu0 }
  0xe1   : > { %v4449_v21 = vpop.trf.xlu1 }
  0xe3   : > { %v4451_v22 = vpop.trf.xlu2 }
  0xe4   : > { %8586 = vst [vmem:[#allocation13_spill] sm:$0xff] %v4451_v22 }
  0xe7   : > { %v4453_v23 = vpop.trf.xlu0 }
  0xe9   : > { %v4455_v24 = vpop.trf.xlu1 }
  0xeb   : > { %v4457_v25 = vpop.trf.xlu2 }
  0xec   : > { %8587 = vst [vmem:[#allocation14_spill] sm:$0xff] %v4457_v25 }
  0xef   : > { %v4459_v26 = vpop.trf.xlu0 }
  0xf1   : > { %v4461_v27 = vpop.trf.xlu1 }
  0xf3   : > { %v4463_v28 = vpop.trf.xlu2 }
  0xf4   : > { %8588 = vst [vmem:[#allocation15_spill] sm:$0xff] %v4463_v28 }
  0xf7   : > { %v4465_v29 = vpop.trf.xlu0 }
  0xf9   : > { %v4467_v30 = vpop.trf.xlu1 }
  0xfa   : > { %8589 = vst [vmem:[#allocation16_spill] sm:$0xff] %v4467_v30 }
  0xfb   : > { %v4469_v31 = vpop.trf.xlu2 }
  0xfc   : > { %8590 = vst [vmem:[#allocation17_spill] sm:$0xff] %v4469_v31 }
  0xff   : > { %v4471_v32 = vpop.trf.xlu0 }
 0x101   : > { %v4473_v33 = vpop.trf.xlu1 }
 0x102   : > { %8591 = vst [vmem:[#allocation18_spill] sm:$0xff] %v4473_v33 }
 0x103   : > { %v4475_v34 = vpop.trf.xlu2 }
 0x104   : > { %8592 = vst [vmem:[#allocation19_spill] sm:$0xff] %v4475_v34 }
 0x107   : > { %v4477_v35 = vpop.trf.xlu0 }
 0x109   : > { %v4479_v36 = vpop.trf.xlu1 }
 0x10b   : > { %v4481_v37 = vpop.trf.xlu2 }
 0x10c   : > { %8593 = vst [vmem:[#allocation20_spill] sm:$0xff] %v4481_v37 }
 0x10f   : > { %v4483_v38 = vpop.trf.xlu0 }
 0x111   : > { %v4485_v39 = vpop.trf.xlu1 }
 0x112   : > { %8594 = vst [vmem:[#allocation21_spill] sm:$0xff] %v4485_v39 }
 0x113   : > { %v4487_v40 = vpop.trf.xlu2 }
 0x114   : > { %8595 = vst [vmem:[#allocation22_spill] sm:$0xff] %v4487_v40 }
 0x117   : > { %v4490_v42 = vpop.trf.xlu0 }
 0x119   : > { %v4493_v44 = vpop.trf.xlu1 }
 0x11a   : > { %8596 = vst [vmem:[#allocation23_spill] sm:$0xff] %v4493_v44  ;;  %1953 = vxpose.xlu2.b32.start.end [1/1] (short) %v8258_v41, 128 }
 0x11b   : > { %1921 = vxpose.xlu0.b32.start.end [1/1] (short) %v8263_v43, 128  ;;  %v4500_v46 = vpop.trf.xlu2 }
 0x11c   : > { %8597 = vst [vmem:[#allocation24_spill] sm:$0xff] %v4500_v46 }
 0x11d   : > { %1889 = vxpose.xlu1.b32.start.end [1/1] (short) %v8260_v45, 128 }
 0x11f   : > { %v4504_v47 = vpop.trf.xlu0 }
 0x121   : > { %v4506_v48 = vpop.trf.xlu1 }
 0x123   : > { %v4508_v49 = vpop.trf.xlu2 }
 0x124   : > { %8598 = vst [vmem:[#allocation25_spill] sm:$0xff] %v4508_v49 }
 0x127   : > { %v4510_v50 = vpop.trf.xlu0 }
 0x128   : > { %8599 = vst [vmem:[#allocation26_spill] sm:$0xff] %v4510_v50 }
 0x129   : > { %v4512_v51 = vpop.trf.xlu1 }
 0x12a   : > { %8600 = vst [vmem:[#allocation27_spill] sm:$0xff] %v4512_v51 }
 0x12b   : > { %v4514_v52 = vpop.trf.xlu2 }
 0x12c   : > { %8601 = vst [vmem:[#allocation28_spill] sm:$0xff] %v4514_v52 }
 0x12f   : > { %v4516_v53 = vpop.trf.xlu0 }
 0x130   : > { %8602 = vst [vmem:[#allocation29_spill] sm:$0xff] %v4516_v53 }
 0x131   : > { %v4518_v54 = vpop.trf.xlu1 }
 0x132   : > { %8603 = vst [vmem:[#allocation30_spill] sm:$0xff] %v4518_v54 }
 0x133   : > { %v4520_v55 = vpop.trf.xlu2 }
 0x134   : > { %8604 = vst [vmem:[#allocation31_spill] sm:$0xff] %v4520_v55 }
 0x137   : > { %v4522_v56 = vpop.trf.xlu0 }
 0x139   : > { %v4524_v57 = vpop.trf.xlu1 }
 0x13b   : > { %v4526_v58 = vpop.trf.xlu2 }
 0x13c   : > { %8605 = vst [vmem:[#allocation32_spill] sm:$0xff] %v4526_v58 }
 0x13f   : > { %v4528_v59 = vpop.trf.xlu0 }
 0x141   : > { %v4530_v60 = vpop.trf.xlu1 }
 0x143   : > { %v4532_v61 = vpop.trf.xlu2 }
 0x144   : > { %8606 = vst [vmem:[#allocation33_spill] sm:$0xff] %v4532_v61 }
 0x147   : > { %v4534_v62 = vpop.trf.xlu0 }
 0x149   : > { %v4536_v63 = vpop.trf.xlu1 }
 0x14a   : > { %8607 = vst [vmem:[#allocation34_spill] sm:$0xff] %v4536_v63 }
 0x14b   : > { %v4538_v41 = vpop.trf.xlu2 }
 0x14c   : > { %8608 = vst [vmem:[#allocation35_spill] sm:$0xff] %v4538_v41 }
 0x14f   : > { %v4540_v5 = vpop.trf.xlu0 }
 0x150   : > { %8609 = vst [vmem:[#allocation36_spill] sm:$0xff] %v4540_v5 }
 0x151   : > { %v4542_v45 = vpop.trf.xlu1 }
 0x153   : > { %v4544_v4 = vpop.trf.xlu2 }
 0x154   : > { %8610 = vst [vmem:[#allocation37_spill] sm:$0xff] %v4544_v4 }
 0x157   : > { %v4546_v2 = vpop.trf.xlu0 }
 0x159   : > { %v4548_v43 = vpop.trf.xlu1 }
 0x15b   : > { %v4550_v3 = vpop.trf.xlu2 }
 0x15c   : > { %8611 = vst [vmem:[#allocation38_spill] sm:$0xff] %v4550_v3 }
 0x15f   : > { %v4552_v52 = vpop.trf.xlu0 }
 0x161   : > { %v4554_v61 = vpop.trf.xlu1 }
 0x162   : > { %8612 = vst [vmem:[#allocation39_spill] sm:$0xff] %v4554_v61 }
 0x163   : > { %v4556_v58 = vpop.trf.xlu2 }
 0x164   : > { %8613 = vst [vmem:[#allocation40_spill] sm:$0xff] %v4556_v58 }
 0x167   : > { %v4558_v46 = vpop.trf.xlu0 }
 0x168   : > { %8614 = vst [vmem:[#allocation41_spill] sm:$0xff] %v4558_v46 }
 0x169   : > { %v4560_v41 = vpop.trf.xlu1 }
 0x16b   : > { %v4562_v40 = vpop.trf.xlu2 }
 0x16c   : > { %8615 = vst [vmem:[#allocation42_spill] sm:$0xff] %v4562_v40 }
 0x16f   : > { %v4564_v55 = vpop.trf.xlu0 }
 0x171   : > { %v4566_v4 = vpop.trf.xlu1 }
 0x173   : > { %v4568_v34 = vpop.trf.xlu2 }
 0x174   : > { %8616 = vst [vmem:[#allocation43_spill] sm:$0xff] %v4568_v34 }
 0x177   : > { %v4570_v31 = vpop.trf.xlu0 }
 0x179   : > { %v4572_v3 = vpop.trf.xlu1 }
 0x17a   : > { %8617 = vst [vmem:[#allocation44_spill] sm:$0xff] %v4572_v3 }
 0x17b   : > { %v4574_v25 = vpop.trf.xlu2 }
 0x17c   : > { %8618 = vst [vmem:[#allocation45_spill] sm:$0xff] %v4574_v25  ;;  %v4595_v25 = vperm.slane %v4393_v0, 1 }
 0x17e   : > { %8626 = vst [vmem:[#allocation53_spill] sm:$0xff] %v4595_v25 }
 0x17f   : > { %v4576_v22 = vpop.trf.xlu0 }
 0x180   : > { %8619 = vst [vmem:[#allocation46_spill] sm:$0xff] %v4576_v22 }
 0x181   : > { %v4578_v58 = vpop.trf.xlu1 }
 0x182   : > { %8620 = vst [vmem:[#allocation47_spill] sm:$0xff] %v4578_v58 }
 0x183   : > { %v4580_v16 = vpop.trf.xlu2 }
 0x184   : > { %8621 = vst [vmem:[#allocation48_spill] sm:$0xff] %v4580_v16 }
 0x187   : > { %v4582_v13 = vpop.trf.xlu0 }
 0x189   : > { %v4584_v40 = vpop.trf.xlu1 }
 0x18b   : > { %v4586_v7 = vpop.trf.xlu2 }
 0x18c   : > { %8622 = vst [vmem:[#allocation49_spill] sm:$0xff] %v4586_v7 }
 0x18f   : > { %v4588_v6 = vpop.trf.xlu0 }
 0x190   : > { %8623 = vst [vmem:[#allocation50_spill] sm:$0xff] %v4588_v6 }
 0x191   : > { %v4590_v34 = vpop.trf.xlu1 }
 0x192   : > { %8624 = vst [vmem:[#allocation51_spill] sm:$0xff] %v4590_v34 }
 0x193   : > { %v4592_v46 = vpop.trf.xlu2 }
 0x194   : > { %8625 = vst [vmem:[#allocation52_spill] sm:$0xff] %v4592_v46 }
 0x197   : > { %v4597_v22 = vpop.trf.xlu0 }
 0x198   : > { %8627 = vst [vmem:[#allocation54_spill] sm:$0xff] %v4597_v22 }
 0x199   : > { %v4599_v5 = vpop.trf.xlu1 }
 0x19a   : > { %8628 = vst [vmem:[#allocation55_spill] sm:$0xff] %v4599_v5 }
 0x19b   : > { %1985 = vxpose.xlu0.b32.start.end [1/1] (short) %v4595_v25, 128  ;;  %v4602_v16 = vpop.trf.xlu2 }
 0x19c   : > { %8629 = vst [vmem:[#allocation56_spill] sm:$0xff] %v4602_v16 }
 0x19f   : > { %v4604_v49 = vpop.trf.xlu0 }
 0x1a1   : > { %v4606_v7 = vpop.trf.xlu1 }
 0x1a3   : > { %v4608_v37 = vpop.trf.xlu2 }
 0x1a4   : > { %8630 = vst [vmem:[#allocation57_spill] sm:$0xff] %v4608_v37 }
 0x1a7   : > { %v4610_v34 = vpop.trf.xlu0 }
 0x1a8   : > { %8631 = vst [vmem:[#allocation58_spill] sm:$0xff] %v4610_v34 }
 0x1a9   : > { %v4612_v46 = vpop.trf.xlu1 }
 0x1aa   : > { %8632 = vst [vmem:[#allocation59_spill] sm:$0xff] %v4612_v46 }
 0x1ab   : > { %v4614_v0 = vpop.trf.xlu2 }
 0x1ac   : > { %8633 = vst [vmem:[#allocation60_spill] sm:$0xff] %v4614_v0 }
 0x1af   : > { %v4616_v28 = vpop.trf.xlu0 }
 0x1b0   : > { %8634 = vst [vmem:[#allocation61_spill] sm:$0xff] %v4616_v28  ;;  %v4315_v28 = vmov 0  }
 0x1b1   : > { %v4618_v22 = vpop.trf.xlu1  ;;  %4107 = vset.pattern.permute.xlu1 %v4315_v28  ;;  %4108 = vset.pattern.permute.xlu2 %v4315_v28 }
 0x1b2   : > { %8635 = vst [vmem:[#allocation62_spill] sm:$0xff] %v4618_v22 }
 0x1b3   : > { %v4622_v25 = vpop.trf.xlu2 }
 0x1b4   : > { %8636 = vst [vmem:[#allocation63_spill] sm:$0xff] %v4622_v25 }
 0x1b7   : > { %v4620_v3 = vpop.trf.xlu0 }
 0x1b9   : > { %v4624_v16 = vpop.trf.xlu1 }
 0x1bb   : > { %v4628_v61 = vpop.trf.xlu2 }
 0x1bc   : > { %8638 = vst [vmem:[#allocation65_spill] sm:$0xff] %v4628_v61 }
 0x1bf   : > { %v4626_v19 = vpop.trf.xlu0 }
 0x1c0   : > { %8637 = vst [vmem:[#allocation64_spill] sm:$0xff] %v4626_v19 }
 0x1c1   : > { %v4630_v37 = vpop.trf.xlu1 }
 0x1c2   : > { %8639 = vst [vmem:[#allocation66_spill] sm:$0xff] %v4630_v37 }
 0x1c3   : > { %v4634_v46 = vpop.trf.xlu2 }
 0x1c4   : > { %8641 = vst [vmem:[#allocation68_spill] sm:$0xff] %v4634_v46 }
 0x1c7   : > { %v4632_v10 = vpop.trf.xlu0 }
 0x1c8   : > { %8640 = vst [vmem:[#allocation67_spill] sm:$0xff] %v4632_v10 }
 0x1c9   : > { %v4636_v0 = vpop.trf.xlu1 }
 0x1ca   : > { %8642 = vst [vmem:[#allocation69_spill] sm:$0xff] %v4636_v0 }
 0x1cb   : > { %v4640_v25 = vpop.trf.xlu2 }
 0x1cc   : > { %8644 = vst [vmem:[#allocation71_spill] sm:$0xff] %v4640_v25 }
 0x1cf   : > { %v4638_v63 = vpop.trf.xlu0 }
 0x1d0   : > { %8643 = vst [vmem:[#allocation70_spill] sm:$0xff] %v4638_v63 }
 0x1d1   : > { %v4642_v53 = vpop.trf.xlu1 }
 0x1d2   : > { %8645 = vst [vmem:[#allocation72_spill] sm:$0xff] %v4642_v53 }
 0x1d3   : > { %v4648_v37 = vpop.trf.xlu2 }
 0x1d4   : > { %8648 = vst [vmem:[#allocation75_spill] sm:$0xff] %v4648_v37 }
 0x1d7   : > { %v4644_v19 = vpop.trf.xlu0 }
 0x1d8   : > { %8646 = vst [vmem:[#allocation73_spill] sm:$0xff] %v4644_v19 }
 0x1d9   : > { %v4650_v10 = vpop.trf.xlu1 }
 0x1da   : > { %8649 = vst [vmem:[#allocation76_spill] sm:$0xff] %v4650_v10 }
 0x1db   : > { %v4654_v0 = vpop.trf.xlu2 }
 0x1dc   : > { %8651 = vst [vmem:[#allocation78_spill] sm:$0xff] %v4654_v0 }
 0x1df   : > { %v4646_v61 = vpop.trf.xlu0 }
 0x1e0   : > { %8647 = vst [vmem:[#allocation74_spill] sm:$0xff] %v4646_v61 }
 0x1e1   : > { %v4656_v50 = vpop.trf.xlu1 }
 0x1e2   : > { %8652 = vst [vmem:[#allocation79_spill] sm:$0xff] %v4656_v50 }
 0x1e3   : > { %v4661_v25 = vpop.trf.xlu2 }
 0x1e4   : > { %8654 = vst [vmem:[#allocation81_spill] sm:$0xff] %v4661_v25 }
 0x1e7   : > { %v4652_v46 = vpop.trf.xlu0 }
 0x1e8   : > { %8650 = vst [vmem:[#allocation77_spill] sm:$0xff] %v4652_v46 }
 0x1e9   : > { %v4663_v53 = vpop.trf.xlu1 }
 0x1ea   : > { %8655 = vst [vmem:[#allocation82_spill] sm:$0xff] %v4663_v53 }
 0x1eb   : > { %v4669_v10 = vpop.trf.xlu2 }
 0x1ec   : > { %8657 = vst [vmem:[#allocation84_spill] sm:$0xff] %v4669_v10 }
 0x1ef   : > { %398 = vperm.xlu1 %4107, %v4437_v15   ;;  %v4659_v63 = vpop.trf.xlu0 }
 0x1f0   : > { %8653 = vst [vmem:[#allocation80_spill] sm:$0xff] %v4659_v63 }
 0x1f1   : > { %v4671_v37 = vpop.trf.xlu1 }
 0x1f2   : > { %8658 = vst [vmem:[#allocation85_spill] sm:$0xff] %v4671_v37 }
 0x1f3   : > { %v4677_v25 = vpop.trf.xlu2 }
 0x1f4   : > { %8660 = vst [vmem:[#allocation87_spill] sm:$0xff] %v4677_v25 }
 0x1f7   : > { %514 = vperm.xlu1 %4107, %v4435_v14   ;;  %v4666_v61 = vpop.trf.xlu0 }
 0x1f8   : > { %8656 = vst [vmem:[#allocation83_spill] sm:$0xff] %v4666_v61 }
 0x1f9   : > { %v4680_v53 = vpop.trf.xlu1 }
 0x1fa   : > { %8661 = vst [vmem:[#allocation88_spill] sm:$0xff] %v4680_v53 }
 0x1fb   : > { %388 = vperm.xlu2 %4108, %v4425_v9   ;;  %v4686_v37 = vpop.trf.xlu2 }
 0x1fc   : > { %8663 = vst [vmem:[#allocation90_spill] sm:$0xff] %v4686_v37 }
 0x1ff   : > { %524 = vperm.xlu1 %4107, %v4447_v20   ;;  %v4675_v50 = vpop.trf.xlu0 }
 0x200   : > { %8659 = vst [vmem:[#allocation86_spill] sm:$0xff] %v4675_v50 }
 0x201   : > { %v4688_v10 = vpop.trf.xlu1 }
 0x202   : > { %4109 = vset.pattern.permute.xlu0 %v4315_v28  ;;  %8664 = vst [vmem:[#allocation91_spill] sm:$0xff] %v4688_v10 }
 0x203   : > { %403 = vperm.xlu2 %4108, %v4443_v18   ;;  %v4694_v25 = vpop.trf.xlu2 }
 0x204   : > { %8666 = vst [vmem:[#allocation93_spill] sm:$0xff] %v4694_v25 }
 0x207   : > { %534 = vperm.xlu1 %4107, %v4459_v26   ;;  %v4683_v0 = vpop.trf.xlu0 }
 0x208   : > { %8662 = vst [vmem:[#allocation89_spill] sm:$0xff] %v4683_v0 }
 0x209   : > { %v4697_v53 = vpop.trf.xlu1 }
 0x20a   : > { %8667 = vst [vmem:[#allocation94_spill] sm:$0xff] %v4697_v53 }
 0x20b   : > { %408 = vperm.xlu2 %4108, %v4449_v21   ;;  %v4703_v37 = vpop.trf.xlu2 }
 0x20c   : > { %8669 = vst [vmem:[#allocation96_spill] sm:$0xff] %v4703_v37 }
 0x20f   : > { %549 = vperm.xlu1 %4107, %v4477_v35   ;;  %v4692_v28 = vpop.trf.xlu0 }
 0x210   : > { %8665 = vst [vmem:[#allocation92_spill] sm:$0xff] %v4692_v28 }
 0x211   : > { %v4705_v10 = vpop.trf.xlu1 }
 0x212   : > { %8670 = vst [vmem:[#allocation97_spill] sm:$0xff] %v4705_v10 }
 0x213   : > { %413 = vperm.xlu2 %4108, %v4455_v24   ;;  %v4711_v25 = vpop.trf.xlu2 }
 0x214   : > { %8672 = vst [vmem:[#allocation99_spill] sm:$0xff] %v4711_v25 }
 0x217   : > { %564 = vperm.xlu1 %4107, %v4504_v47   ;;  %v4700_v0 = vpop.trf.xlu0 }
 0x218   : > { %8668 = vst [vmem:[#allocation95_spill] sm:$0xff] %v4700_v0 }
 0x219   : > { %v4714_v53 = vpop.trf.xlu1 }
 0x21a   : > { %8673 = vst [vmem:[#allocation100_spill] sm:$0xff] %v4714_v53 }
 0x21b   : > { %418 = vperm.xlu2 %4108, %v4461_v27   ;;  %v4720_v37 = vpop.trf.xlu2 }
 0x21c   : > { %8675 = vst [vmem:[#allocation102_spill] sm:$0xff] %v4720_v37 }
 0x21f   : > { %579 = vperm.xlu1 %4107, %v4522_v56   ;;  %v4709_v28 = vpop.trf.xlu0 }
 0x220   : > { %8671 = vst [vmem:[#allocation98_spill] sm:$0xff] %v4709_v28 }
 0x221   : > { %v4722_v10 = vpop.trf.xlu1 }
 0x222   : > { %8676 = vst [vmem:[#allocation103_spill] sm:$0xff] %v4722_v10 }
 0x223   : > { %423 = vperm.xlu2 %4108, %v4467_v30   ;;  %v4728_v25 = vpop.trf.xlu2 }
 0x224   : > { %8678 = vst [vmem:[#allocation105_spill] sm:$0xff] %v4728_v25 }
 0x227   : > { %696 = vperm.xlu1 %4107, %v4542_v45   ;;  %v4717_v0 = vpop.trf.xlu0 }
 0x228   : > { %8674 = vst [vmem:[#allocation101_spill] sm:$0xff] %v4717_v0 }
 0x229   : > { %v4731_v53 = vpop.trf.xlu1 }
 0x22a   : > { %8679 = vst [vmem:[#allocation106_spill] sm:$0xff] %v4731_v53 }
 0x22b   : > { %428 = vperm.xlu2 %4108, %v4473_v33   ;;  %v4737_v37 = vpop.trf.xlu2 }
 0x22c   : > { %8681 = vst [vmem:[#allocation108_spill] sm:$0xff] %v4737_v37 }
 0x22f   : > { %711 = vperm.xlu1 %4107, %v4560_v41   ;;  %v4726_v28 = vpop.trf.xlu0 }
 0x230   : > { %8677 = vst [vmem:[#allocation104_spill] sm:$0xff] %v4726_v28 }
 0x231   : > { %v4739_v10 = vpop.trf.xlu1 }
 0x232   : > { %8682 = vst [vmem:[#allocation109_spill] sm:$0xff] %v4739_v10 }
 0x233   : > { %433 = vperm.xlu2 %4108, %v4479_v36  }
 0x237   : > { %726 = vperm.xlu1 %4107, %v4578_v58   ;;  %v4734_v0 = vpop.trf.xlu0 }
 0x238   : > { %8680 = vst [vmem:[#allocation107_spill] sm:$0xff] %v4734_v0 }
 0x239   : > { %v4748_v53 = vpop.trf.xlu1 }
 0x23a   : > { %8684 = vst [vmem:[#allocation111_spill] sm:$0xff] %v4748_v53 }
 0x23b   : > { %438 = vperm.xlu2 %4108, %v4485_v39  }
 0x23f   : > { %741 = vperm.xlu1 %4107, %v4599_v5   ;;  %v4743_v28 = vpop.trf.xlu0 }
 0x240   : > { %8683 = vst [vmem:[#allocation110_spill] sm:$0xff] %v4743_v28  ;;  %v8689_v28 = vperm.slane %v4404_v1, 4 }
 0x243   : > { %443 = vperm.xlu2 %4108, %v4493_v44  }
 0x247   : > { %756 = vperm.xlu1 %4107, %v4618_v22   ;;  %v4753_v22 = vpop.trf.xlu0 }
 0x248   : > { %8686 = vst [vmem:[#allocation113_spill] sm:$0xff] %v4753_v22 }
 0x24b   : > { %448 = vperm.xlu2 %4108, %v4506_v48  }
 0x24f   : > { %807 = vperm.xlu1 %4107, %v4534_v62   ;;  %v4766_v53 = vpop.trf.xlu0 }
 0x250   : > { %8691 = vst [vmem:[#allocation117_spill] sm:$0xff] %v4766_v53 }
 0x253   : > { %453 = vperm.xlu2 %4108, %v4512_v51   ;;  %v4763_v51 = vperm.slane %v8689_v28, 0 }
 0x255   : > { %v4745_v25 = vpop.permute.xlu2 %388  ;;  %8690 = vst [vmem:[#allocation116_spill] sm:$0xff] %v4763_v51 }
 0x257   : > { %822 = vperm.xlu1 %4107, %v4552_v52  }
 0x25b   : > { %458 = vperm.xlu2 %4108, %v4518_v54   ;;  %v8692_v54 = vperm.slane %v4404_v1, 6 }
 0x25d   : > { %v4751_v0 = vpop.permute.xlu2 %403  ;;  %v4770_v44 = vperm.slane %v8692_v54, 2  ;;  %v1028_v54 = vsub.f32 %v4530_v60, %v4528_v59 }
 0x25e   : > { %8685 = vst [vmem:[#allocation112_spill] sm:$0xff] %v4751_v0 }
 0x25f   : > { %837 = vperm.xlu1 %4107, %v4570_v31  }
 0x261   : > { %v4756_v10 = vpop.permute.xlu1 %398 }
 0x262   : > { %8687 = vst [vmem:[#allocation114_spill] sm:$0xff] %v4756_v10  ;;  %v475_v5 = vmin.f32 %v4756_v10, %v4770_v44 }
 0x263   : > { %463 = vperm.xlu2 %4108, %v4524_v57  }
 0x265   : > { %v4759_v37 = vpop.permute.xlu2 %408 }
 0x266   : > { %8688 = vst [vmem:[#allocation115_spill] sm:$0xff] %v4759_v37  ;;  %v479_v10 = vmin.f32 %v4759_v37, %v4770_v44 }
 0x267   : > { %852 = vperm.xlu1 %4107, %v4588_v6   ;;  %v4788_v6 = vpop.trf.xlu0 }
 0x268   : > { %8696 = vst [vmem:[#allocation121_spill] sm:$0xff] %v4788_v6  ;;  %v1031_v6 = vsub.f32 %v4548_v43, %v4546_v2 }
 0x269   : > { %v4772_v22 = vpop.permute.xlu1 %514 }
 0x26a   : > { %8693 = vst [vmem:[#allocation118_spill] sm:$0xff] %v4772_v22  ;;  %v593_v39 = vmax.f32 %v4772_v22, %v4763_v51 }
 0x26b   : > { %504 = vperm.xlu2 %4108, %v4423_v8  }
 0x26c   : > { %v4779_v28 = vsub.f32 %v475_v5, %v593_v39  ;;  %v1012_v5 = vsub.f32 %v4425_v9, %v4423_v8  ;;  %v1015_v8 = vsub.f32 %v4443_v18, %v4441_v17  ;;  %v1018_v18 = vsub.f32 %v4461_v27, %v4459_v26 }
 0x26d   : > { %v4781_v33 = vpop.permute.xlu2 %413 }
 0x26e   : > { %8694 = vst [vmem:[#allocation119_spill] sm:$0xff] %v4779_v28  ;;  %v1044_v28 = vmul.f32 %v1028_v54, %v1012_v5  ;;  %v1034_v54 = vsub.f32 %v4566_v4, %v4564_v55 }
 0x26f   : > { %8695 = vst [vmem:[#allocation120_spill] sm:$0xff] %v4781_v33  ;;  %867 = vperm.xlu1 %4107, %v4610_v34   ;;  %v4812_v9 = vpop.trf.xlu0 }
 0x270   : > { %8699 = vst [vmem:[#allocation124_spill] sm:$0xff] %v4812_v9 }
 0x271   : > { %v4786_v53 = vpop.permute.xlu1 %524 }
 0x272   : > { %v597_v22 = vmax.f32 %v4786_v53, %v4763_v51 }
 0x273   : > { %509 = vperm.xlu2 %4108, %v4429_v11  }
 0x274   : > { %v4797_v39 = vsub.f32 %v479_v10, %v597_v22  ;;  %v1047_v22 = vmul.f32 %v1031_v6, %v1015_v8  ;;  %v1037_v6 = vsub.f32 %v4584_v40, %v4582_v13  ;;  %v1021_v8 = vsub.f32 %v4479_v36, %v4477_v35 }
 0x275   : > { %v4799_v34 = vpop.permute.xlu2 %418  ;;  %v1024_v36 = vsub.f32 %v4506_v48, %v4504_v47 }
 0x276   : > { %8697 = vst [vmem:[#allocation122_spill] sm:$0xff] %v4799_v34  ;;  %v483_v30 = vmin.f32 %v4799_v34, %v4770_v44  ;;  %v1053_v26 = vmul.f32 %v1037_v6, %v1021_v8 }
 0x277   : > { %1062 = vperm.xlu1 %4107, %v1044_v28  }
 0x279   : > { %v4803_v58 = vpop.permute.xlu1 %534 }
 0x27a   : > { %8698 = vst [vmem:[#allocation123_spill] sm:$0xff] %v4803_v58  ;;  %v601_v37 = vmax.f32 %v4803_v58, %v4763_v51  ;;  %v8742_v58 = vld [vmem:[#allocation74_spill] sm:$0xff] }
 0x27b   : > { %519 = vperm.xlu2 %4108, %v4441_v17   ;;  %v1050_v17 = vmul.f32 %v1034_v54, %v1018_v18 }
 0x27c   : > { %v4814_v10 = vsub.f32 %v483_v30, %v601_v37  ;;  %v4828_v30 = vpop.trf.xlu0 }
 0x27d   : > { %v4816_v28 = vpop.permute.xlu2 %423  ;;  %8702 = vst [vmem:[#allocation127_spill] sm:$0xff] %v4828_v30  ;;  %v1040_v30 = vsub.f32 %v4606_v7, %v4604_v49 }
 0x27e   : > { %8700 = vst [vmem:[#allocation125_spill] sm:$0xff] %v4814_v10  ;;  %v8735_v10 = vld [vmem:[#allocation25_spill] sm:$0xff] }
 0x27f   : > { %1077 = vperm.xlu1 %4107, %v1047_v22   ;;  %v1056_v6 = vmul.f32 %v1040_v30, %v1024_v36  ;;  %v8714_v36 = vld [vmem:[#allocation34_spill] sm:$0xff] }
 0x281   : > { %v4820_v5 = vpop.permute.xlu1 %549  ;;  %393 = vperm.xlu0 %4109, %v4431_v12  }
 0x282   : > { %8701 = vst [vmem:[#allocation126_spill] sm:$0xff] %v4820_v5  ;;  %v607_v22 = vmax.f32 %v4820_v5, %v4763_v51  ;;  %v8711_v5 = vld [vmem:[#allocation29_spill] sm:$0xff] }
 0x283   : > { %529 = vperm.xlu2 %4108, %v4453_v23  }
 0x284   : > { %v4844_v18 = vpop.trf.xlu0 }
 0x285   : > { %v4826_v9 = vpop.permute.xlu2 %428  ;;  %8705 = vst [vmem:[#allocation130_spill] sm:$0xff] %v4844_v18 }
 0x287   : > { %1092 = vperm.xlu1 %4107, %v1050_v17  }
 0x289   : > { %v4832_v37 = vpop.permute.xlu1 %564  ;;  %539 = vperm.xlu0 %4109, %v4465_v29  }
 0x28a   : > { %8703 = vst [vmem:[#allocation128_spill] sm:$0xff] %v4832_v37 }
 0x28b   : > { %544 = vperm.xlu2 %4108, %v4471_v32  }
 0x28c   : > { %v4863_v18 = vpop.trf.xlu0 }
 0x28d   : > { %v4838_v27 = vpop.permute.xlu2 %433 }
 0x28e   : > { %8704 = vst [vmem:[#allocation129_spill] sm:$0xff] %v4838_v27  ;;  %v489_v54 = vmin.f32 %v4838_v27, %v4770_v44  ;;  %v8738_v27 = vld [vmem:[#allocation36_spill] sm:$0xff] }
 0x28f   : > { %1107 = vperm.xlu1 %4107, %v1053_v26   ;;  %v1043_v26 = vsub.f32 %v4624_v16, %v4620_v3 }
 0x290   : > { %v4846_v17 = vsub.f32 %v489_v54, %v607_v22  ;;  %v8709_v54 = vld [vmem:[#allocation26_spill] sm:$0xff] }
 0x291   : > { %v4850_v35 = vpop.permute.xlu1 %579  ;;  %554 = vperm.xlu0 %4109, %v4483_v38   ;;  %8710 = vst [vmem:[#allocation26_spill] sm:$0xff] %v4863_v18  ;;  %v613_v18 = vmax.f32 %v4832_v37, %v4763_v51 }
 0x292   : > { %8706 = vst [vmem:[#allocation131_spill] sm:$0xff] %v4846_v17  ;;  %v1027_v17 = vsub.f32 %v4524_v57, %v4522_v56  ;;  %v8717_v57 = vld [vmem:[#allocation9_spill] sm:$0xff] }
 0x293   : > { %8707 = vst [vmem:[#allocation132_spill] sm:$0xff] %v4850_v35  ;;  %559 = vperm.xlu2 %4108, %v4490_v42  }
 0x294   : > { %v1059_v47 = vmul.f32 %v1043_v26, %v1027_v17 }
 0x295   : > { %v4856_v8 = vpop.permute.xlu2 %438 }
 0x297   : > { %1122 = vperm.xlu1 %4107, %v1056_v6   ;;  %v4874_v6 = vpop.trf.xlu0 }
 0x298   : > { %8715 = vst [vmem:[#allocation34_spill] sm:$0xff] %v4874_v6 }
 0x299   : > { %v4860_v22 = vpop.permute.xlu1 %696  ;;  %569 = vperm.xlu0 %4109, %v8709_v54  }
 0x29a   : > { %8708 = vst [vmem:[#allocation133_spill] sm:$0xff] %v4860_v22 }
 0x29b   : > { %574 = vperm.xlu2 %4108, %v8711_v5  }
 0x29d   : > { %v4868_v48 = vpop.permute.xlu2 %443 }
 0x29e   : > { %8712 = vst [vmem:[#allocation29_spill] sm:$0xff] %v4868_v48 }
 0x29f   : > { %1137 = vperm.xlu1 %4107, %v1059_v47   ;;  %v4891_v6 = vpop.trf.xlu0 }
 0x2a1   : > { %v4870_v30 = vpop.permute.xlu1 %711  ;;  %686 = vperm.xlu0 %4109, %v4530_v60   ;;  %v8720_v60 = vld [vmem:[#allocation39_spill] sm:$0xff] }
 0x2a2   : > { %8713 = vst [vmem:[#allocation134_spill] sm:$0xff] %v4870_v30  ;;  %v8722_v30 = vld [vmem:[#allocation12_spill] sm:$0xff] }
 0x2a3   : > { %691 = vperm.xlu2 %4108, %v8714_v36   ;;  %8721 = vst [vmem:[#allocation39_spill] sm:$0xff] %v4891_v6 }
 0x2a5   : > { %v4876_v22 = vpop.permute.xlu2 %448 }
 0x2a6   : > { %8716 = vst [vmem:[#allocation135_spill] sm:$0xff] %v4876_v22  ;;  %v495_v56 = vmin.f32 %v4876_v22, %v4770_v44  ;;  %v8724_v22 = vld [vmem:[#allocation44_spill] sm:$0xff] }
 0x2a7   : > { %1496 = vperm.xlu1 %4107, %v8717_v57   ;;  %v4901_v57 = vpop.trf.xlu0 }
 0x2a8   : > { %v4883_v17 = vsub.f32 %v495_v56, %v613_v18  ;;  %v8726_v56 = vld [vmem:[#allocation15_spill] sm:$0xff] }
 0x2a9   : > { %v4885_v26 = vpop.permute.xlu1 %726  ;;  %701 = vperm.xlu0 %4109, %v4548_v43   ;;  %8727 = vst [vmem:[#allocation15_spill] sm:$0xff] %v4901_v57 }
 0x2aa   : > { %8718 = vst [vmem:[#allocation9_spill] sm:$0xff] %v4883_v17 }
 0x2ab   : > { %8719 = vst [vmem:[#allocation136_spill] sm:$0xff] %v4885_v26  ;;  %706 = vperm.xlu2 %4108, %v8720_v60   ;;  %v8729_v26 = vld [vmem:[#allocation51_spill] sm:$0xff] }
 0x2ad   : > { %v4889_v47 = vpop.permute.xlu2 %453 }
 0x2af   : > { %1511 = vperm.xlu1 %4107, %v8722_v30   ;;  %v619_v30 = vmax.f32 %v4850_v35, %v4763_v51  ;;  %v4919_v57 = vpop.trf.xlu0  ;;  %v471_v35 = vmin.f32 %v4745_v25, %v4770_v44 }
 0x2b0   : > { %8733 = vst [vmem:[#allocation138_spill] sm:$0xff] %v4919_v57  ;;  %v8737_v57 = vld [vmem:[#allocation64_spill] sm:$0xff] }
 0x2b1   : > { %v4894_v37 = vpop.permute.xlu1 %741  ;;  %716 = vperm.xlu0 %4109, %v4566_v4  }
 0x2b2   : > { %8723 = vst [vmem:[#allocation12_spill] sm:$0xff] %v4894_v37  ;;  %v8731_v37 = vld [vmem:[#allocation20_spill] sm:$0xff] }
 0x2b3   : > { %721 = vperm.xlu2 %4108, %v8724_v22  }
 0x2b5   : > { %v4898_v18 = vpop.permute.xlu2 %458 }
 0x2b6   : > { %8725 = vst [vmem:[#allocation44_spill] sm:$0xff] %v4898_v18 }
 0x2b7   : > { %1526 = vperm.xlu1 %4107, %v8726_v56  }
 0x2b9   : > { %v4903_v43 = vpop.permute.xlu1 %756  ;;  %731 = vperm.xlu0 %4109, %v4584_v40   ;;  %v8734_v40 = vld [vmem:[#allocation59_spill] sm:$0xff] }
 0x2ba   : > { %8728 = vst [vmem:[#allocation137_spill] sm:$0xff] %v4903_v43 }
 0x2bb   : > { %736 = vperm.xlu2 %4108, %v8729_v26  }
 0x2bd   : > { %v4907_v6 = vpop.permute.xlu2 %463 }
 0x2be   : > { %8730 = vst [vmem:[#allocation51_spill] sm:$0xff] %v4907_v6  ;;  %v501_v4 = vmin.f32 %v4907_v6, %v4770_v44 }
 0x2bf   : > { %1541 = vperm.xlu1 %4107, %v8731_v37  }
 0x2c0   : > { %v4914_v17 = vsub.f32 %v501_v4, %v619_v30 }
 0x2c1   : > { %v4916_v56 = vpop.permute.xlu1 %807  ;;  %746 = vperm.xlu0 %4109, %v4606_v7   ;;  %v4935_v7 = vpop.trf.xlu0 }
 0x2c2   : > { %8732 = vst [vmem:[#allocation20_spill] sm:$0xff] %v4914_v17 }
 0x2c3   : > { %751 = vperm.xlu2 %4108, %v8734_v40   ;;  %8736 = vst [vmem:[#allocation59_spill] sm:$0xff] %v4935_v7  ;;  %v8740_v7 = vld [vmem:[#allocation41_spill] sm:$0xff] }
 0x2c5   : > { %v4922_v43 = vpop.permute.xlu2 %504 }
 0x2c6   : > { %v589_v6 = vmax.f32 %v4922_v43, %v4763_v51 }
 0x2c7   : > { %1556 = vperm.xlu1 %4107, %v8735_v10  }
 0x2c8   : > { %v4929_v37 = vsub.f32 %v471_v35, %v589_v6 }
 0x2c9   : > { %v4931_v30 = vpop.permute.xlu1 %822  ;;  %761 = vperm.xlu0 %4109, %v4624_v16   ;;  %v4946_v35 = vpop.trf.xlu0  ;;  %v477_v16 = vmin.f32 %v4751_v0, %v4770_v44 }
 0x2ca   : > { %8739 = vst [vmem:[#allocation25_spill] sm:$0xff] %v4946_v35  ;;  %v481_v35 = vmin.f32 %v4781_v33, %v4770_v44  ;;  %v487_v33 = vmin.f32 %v4826_v9, %v4770_v44 }
 0x2cb   : > { %802 = vperm.xlu2 %4108, %v4528_v59  }
 0x2cd   : > { %v4937_v4 = vpop.permute.xlu2 %509 }
 0x2cf   : > { %2019 = vperm.xlu1 %4107, %v8737_v57  }
 0x2d1   : > { %v4940_v17 = vpop.permute.xlu1 %837  ;;  %812 = vperm.xlu0 %4109, %v8738_v27   ;;  %v4966_v0 = vpop.trf.xlu0 }
 0x2d2   : > { %8743 = vst [vmem:[#allocation41_spill] sm:$0xff] %v4966_v0 }
 0x2d3   : > { %817 = vperm.xlu2 %4108, %v4546_v2  }
 0x2d5   : > { %v4944_v10 = vpop.permute.xlu2 %519 }
 0x2d6   : > { %v595_v59 = vmax.f32 %v4944_v10, %v4763_v51 }
 0x2d7   : > { %2034 = vperm.xlu1 %4107, %v4644_v19  }
 0x2d8   : > { %v4953_v6 = vsub.f32 %v477_v16, %v595_v59  ;;  %v8745_v59 = vld [vmem:[#allocation46_spill] sm:$0xff] }
 0x2d9   : > { %827 = vperm.xlu0 %4109, %v8740_v7   ;;  %v4956_v57 = vpop.permute.xlu1 %852  ;;  %v4986_v0 = vpop.trf.xlu0 }
 0x2da   : > { %8750 = vst [vmem:[#allocation141_spill] sm:$0xff] %v4986_v0  ;;  %v1029_v0 = vsub.f32 %v8714_v36, %v4534_v62  ;;  %v499_v62 = vmin.f32 %v4898_v18, %v4770_v44 }
 0x2db   : > { %832 = vperm.xlu2 %4108, %v4564_v55  }
 0x2dd   : > { %v4959_v2 = vpop.permute.xlu2 %529 }
 0x2de   : > { %8741 = vst [vmem:[#allocation36_spill] sm:$0xff] %v4959_v2  ;;  %v599_v34 = vmax.f32 %v4959_v2, %v4763_v51 }
 0x2df   : > { %2039 = vperm.xlu1 %4107, %v8742_v58  }
 0x2e0   : > { %v4968_v16 = vsub.f32 %v481_v35, %v599_v34  ;;  %v8748_v34 = vld [vmem:[#allocation54_spill] sm:$0xff] }
 0x2e1   : > { %842 = vperm.xlu0 %4109, %v8745_v59   ;;  %v4971_v19 = vpop.permute.xlu1 %867 }
 0x2e2   : > { %8744 = vst [vmem:[#allocation139_spill] sm:$0xff] %v4968_v16  ;;  %v493_v16 = vmin.f32 %v4868_v48, %v4770_v44 }
 0x2e3   : > { %847 = vperm.xlu2 %4108, %v4582_v13  }
 0x2e5   : > { %v4974_v55 = vpop.permute.xlu2 %544 }
 0x2e6   : > { %8746 = vst [vmem:[#allocation46_spill] sm:$0xff] %v4974_v55  ;;  %v605_v2 = vmax.f32 %v4974_v55, %v4763_v51 }
 0x2e7   : > { %2044 = vperm.xlu1 %4107, %v4652_v46   ;;  %v8754_v46 = vld [vmem:[#allocation61_spill] sm:$0xff] }
 0x2e8   : > { %v4981_v58 = vsub.f32 %v487_v33, %v605_v2 }
 0x2e9   : > { %857 = vperm.xlu0 %4109, %v8748_v34   ;;  %v4984_v35 = vpop.permute.xlu1 %1062 }
 0x2ea   : > { %8747 = vst [vmem:[#allocation140_spill] sm:$0xff] %v4981_v58  ;;  %v591_v58 = vmax.f32 %v4937_v4, %v4763_v51 }
 0x2eb   : > { %8749 = vst [vmem:[#allocation54_spill] sm:$0xff] %v4984_v35  ;;  %862 = vperm.xlu2 %4108, %v4604_v49  }
 0x2ed   : > { %v4989_v13 = vpop.permute.xlu2 %559 }
 0x2ee   : > { %8751 = vst [vmem:[#allocation142_spill] sm:$0xff] %v4989_v13  ;;  %v611_v55 = vmax.f32 %v4989_v13, %v4763_v51  ;;  %v1014_v13 = vsub.f32 %v4437_v15, %v4435_v14  ;;  %v8762_v15 = vperm.slane %v4404_v1, 3 }
 0x2ef   : > { %2049 = vperm.xlu1 %4107, %v4659_v63   ;;  %v1013_v63 = vsub.f32 %v4431_v12, %v4429_v11  ;;  %v8756_v11 = vperm.slane %v4404_v1, 2 }
 0x2f0   : > { %v4996_v33 = vsub.f32 %v493_v16, %v611_v55  ;;  %v1030_v16 = vsub.f32 %v4542_v45, %v8738_v27  ;;  %v8757_v27 = vperm.slane %v4404_v1, 1 }
 0x2f1   : > { %v4998_v2 = vpop.permute.xlu1 %1077  ;;  %872 = vperm.xlu0 %4109, %v8754_v46   ;;  %v5023_v12 = vperm.slane %v8756_v11, 2  ;;  %v8764_v11 = vperm.slane %v4404_v1, 7 }
 0x2f2   : > { %8752 = vst [vmem:[#allocation143_spill] sm:$0xff] %v4996_v33  ;;  %v582_v33 = vperm.slane %v4404_v1, 0  ;;  %v5029_v48 = vperm.slane %v8757_v27, 1 }
 0x2f3   : > { %8753 = vst [vmem:[#allocation144_spill] sm:$0xff] %v4998_v2  ;;  %v394_v49 = vpop.permute.xlu0 %393  ;;  %877 = vperm.xlu2 %4108, %v4620_v3   ;;  %v1045_v2 = vmul.f32 %v1029_v0, %v1013_v63  ;;  %v5042_v63 = vperm.slane %v8762_v15, 3 }
 0x2f4   : > { %v473_v35 = vmin.f32 %v394_v49, %v4770_v44  ;;  %8758 = vst [vmem:[#allocation145_spill] sm:$0xff] %v5029_v48  ;;  %v5037_v0 = vperm.slane %v582_v33, 0  ;;  %v472_v14 = vmin.f32 %v394_v49, %v5023_v12  ;;  %v485_v33 = vmin.f32 %v4816_v28, %v4770_v44 }
 0x2f5   : > { %v5011_v55 = vpop.permute.xlu2 %574  ;;  %8763 = vst [vmem:[#allocation148_spill] sm:$0xff] %v5042_v63 }
 0x2f6   : > { %8755 = vst [vmem:[#allocation61_spill] sm:$0xff] %v5011_v55  ;;  %v623_v36 = vsub.f32 %v473_v35, %v591_v58  ;;  %v617_v3 = vmax.f32 %v5011_v55, %v4763_v51  ;;  %v8759_v58 = vperm.slane %v4404_v1, 5  ;;  %v1046_v55 = vmul.f32 %v1030_v16, %v1014_v13 }
 0x2f7   : > { %2054 = vperm.xlu1 %4107, %v4666_v61   ;;  %8761 = vst [vmem:[#allocation147_spill] sm:$0xff] %v5037_v0  ;;  %v5050_v13 = vperm.slane %v8764_v11, 3  ;;  %v1016_v16 = vsub.f32 %v4449_v21, %v4447_v20  ;;  %v886_v1 = vmax.f32 %v4916_v56, %v5029_v48  ;;  %v1017_v20 = vsub.f32 %v4455_v24, %v4453_v23  ;;  %v8766_v23 = vld [vmem:[#allocation115_spill] sm:$0xff] }
 0x2f8   : > { %v5025_v45 = vsub.f32 %v499_v62, %v617_v3  ;;  %v5033_v35 = vperm.slane %v8759_v58, 1  ;;  %v1032_v62 = vsub.f32 %v8720_v60, %v4552_v52  ;;  %v1033_v52 = vsub.f32 %v4560_v41, %v8740_v7 }
 0x2f9   : > { %v5035_v18 = vpop.permute.xlu1 %1092  ;;  %1067 = vperm.xlu0 %4109, %v1045_v2   ;;  %8765 = vst [vmem:[#allocation149_spill] sm:$0xff] %v5050_v13  ;;  %v590_v2 = vmax.f32 %v4937_v4, %v5037_v0  ;;  %v478_v24 = vmin.f32 %v8766_v23, %v5023_v12 }
 0x2fa   : > { %8760 = vst [vmem:[#allocation146_spill] sm:$0xff] %v5033_v35  ;;  %v887_v60 = vmax.f32 %v4916_v56, %v5033_v35  ;;  %v1048_v21 = vmul.f32 %v1032_v62, %v1016_v16  ;;  %v1049_v11 = vmul.f32 %v1033_v52, %v1017_v20  ;;  %v596_v56 = vmax.f32 %v4786_v53, %v5037_v0 }
 0x2fb   : > { %v5046_v3 = vpop.permute.xlu0 %539  ;;  %1072 = vperm.xlu2 %4108, %v1046_v55   ;;  %v622_v27 = vsub.f32 %v472_v14, %v590_v2  ;;  %v491_v16 = vmin.f32 %v4856_v8, %v4770_v44  ;;  %v893_v20 = vmax.f32 %v4931_v30, %v5033_v35 }
 0x2fc   : > { %v603_v49 = vmax.f32 %v5046_v3, %v4763_v51 }
 0x2fd   : > { %v692_v55 = vpop.permute.xlu2 %691  ;;  %v654_v14 = vmax.f32 %v622_v27, 0.0  ;;  %v628_v27 = vsub.f32 %v478_v24, %v596_v56  ;;  %v8772_v24 = vld [vmem:[#allocation50_spill] sm:$0xff] }
 0x2fe   : > { %v5066_v58 = vsub.f32 %v485_v33, %v603_v49  ;;  %v770_v4 = vmin.f32 %v692_v55, %v5042_v63  ;;  %v771_v15 = vmin.f32 %v692_v55, %v5050_v13  ;;  %v655_v33 = vmax.f32 %v623_v36, 0.0 }
 0x2ff   : > { %2059 = vperm.xlu1 %4107, %v4675_v50   ;;  %v1035_v55 = vsub.f32 %v8724_v22, %v4570_v31  ;;  %v8768_v31 = vld [vmem:[#allocation47_spill] sm:$0xff] }
 0x300   : > { %v918_v41 = vsub.f32 %v770_v4, %v886_v1  ;;  %v919_v7 = vsub.f32 %v771_v15, %v887_v60  ;;  %v8767_v1 = vld [vmem:[#allocation16_spill] sm:$0xff]  ;;  %v1036_v22 = vsub.f32 %v8768_v31, %v8745_v59  ;;  %v892_v4 = vmax.f32 %v4931_v30, %v5029_v48  ;;  %v8773_v31 = vld [vmem:[#allocation55_spill] sm:$0xff] }
 0x301   : > { %v5075_v61 = vpop.permute.xlu1 %1107  ;;  %1082 = vperm.xlu0 %4109, %v1048_v21   ;;  %v1019_v60 = vsub.f32 %v8767_v1, %v4465_v29  ;;  %v1038_v30 = vsub.f32 %v8729_v26, %v8772_v24  ;;  %v660_v1 = vmax.f32 %v628_v27, 0.0  ;;  %v496_v26 = vmin.f32 %v4889_v47, %v5023_v12  ;;  %v8775_v24 = vld [vmem:[#allocation92_spill] sm:$0xff]  ;;  %v8850_v50 = vld [vmem:[#allocation131_spill] sm:$0xff] }
 0x302   : > { %v950_v2 = vmax.f32 %v918_v41, 0.0  ;;  %v951_v49 = vmax.f32 %v919_v7, 0.0 }
 0x303   : > { %v5081_v62 = vpop.permute.xlu0 %554  ;;  %1087 = vperm.xlu2 %4108, %v1049_v11   ;;  %v8769_v11 = vld [vmem:[#allocation18_spill] sm:$0xff] }
 0x304   : > { %v609_v53 = vmax.f32 %v5081_v62, %v4763_v51  ;;  %v5087_v52 = vmul.f32 %v951_v49, %v655_v33  ;;  %v5089_v36 = vmul.f32 %v950_v2, %v654_v14  ;;  %v1020_v29 = vsub.f32 %v8769_v11, %v4471_v32  ;;  %v8770_v33 = vld [vmem:[#allocation89_spill] sm:$0xff] }
 0x305   : > { %v707_v15 = vpop.permute.xlu2 %706  ;;  %v1051_v14 = vmul.f32 %v1035_v55, %v1019_v60  ;;  %v8771_v2 = vld [vmem:[#allocation21_spill] sm:$0xff]  ;;  %v661_v32 = vmax.f32 %v4797_v39, 0.0  ;;  %v8382_v11 = vlaneseq }
 0x306   : > { %v5099_v21 = vsub.f32 %v491_v16, %v609_v53  ;;  %v776_v41 = vmin.f32 %v707_v15, %v5042_v63  ;;  %v777_v7 = vmin.f32 %v707_v15, %v5050_v13  ;;  %v1022_v49 = vsub.f32 %v8771_v2, %v4483_v38 }
 0x307   : > { %2064 = vperm.xlu1 %4107, %v8770_v33   ;;  %v1052_v23 = vmul.f32 %v1036_v22, %v1020_v29  ;;  %v602_v16 = vmax.f32 %v5046_v3, %v5037_v0  ;;  %v484_v38 = vmin.f32 %v4816_v28, %v5023_v12  ;;  %v497_v3 = vmin.f32 %v4889_v47, %v4770_v44 }
 0x308   : > { %v924_v59 = vsub.f32 %v776_v41, %v892_v4  ;;  %v925_v56 = vsub.f32 %v777_v7, %v893_v20  ;;  %v1039_v4 = vsub.f32 %v8773_v31, %v8748_v34  ;;  %v898_v34 = vmax.f32 %v4940_v17, %v5029_v48 }
 0x309   : > { %v5112_v53 = vpop.permute.xlu1 %1122  ;;  %1097 = vperm.xlu0 %4109, %v1051_v14   ;;  %v899_v28 = vmax.f32 %v4940_v17, %v5033_v35  ;;  %v634_v41 = vsub.f32 %v484_v38, %v602_v16  ;;  %v608_v16 = vmax.f32 %v5081_v62, %v5037_v0  ;;  %v667_v38 = vmax.f32 %v5066_v58, 0.0 }
 0x30a   : > { %v956_v55 = vmax.f32 %v924_v59, 0.0  ;;  %v957_v60 = vmax.f32 %v925_v56, 0.0  ;;  %v8774_v56 = vld [vmem:[#allocation23_spill] sm:$0xff] }
 0x30b   : > { %v570_v22 = vpop.permute.xlu0 %569  ;;  %1102 = vperm.xlu2 %4108, %v1052_v23   ;;  %v1023_v2 = vsub.f32 %v8774_v56, %v4490_v42  ;;  %v1054_v23 = vmul.f32 %v1038_v30, %v1022_v49  ;;  %v666_v31 = vmax.f32 %v634_v41, 0.0  ;;  %v8777_v49 = vld [vmem:[#allocation6_spill] sm:$0xff]  ;;  %v904_v56 = vmax.f32 %v4956_v57, %v5029_v48 }
 0x30c   : > { %v614_v27 = vmax.f32 %v570_v22, %v5037_v0  ;;  %v615_v39 = vmax.f32 %v570_v22, %v4763_v51  ;;  %v5125_v15 = vmul.f32 %v957_v60, %v661_v32  ;;  %v5127_v20 = vmul.f32 %v956_v55, %v660_v1  ;;  %v8780_v22 = vld [vmem:[#allocation58_spill] sm:$0xff] }
 0x30d   : > { %v722_v7 = vpop.permute.xlu2 %721  ;;  %v1055_v17 = vmul.f32 %v1039_v4, %v1023_v2  ;;  %v5147_v60 = vshrl.u32 %v8382_v11, 7  ;;  %v5151_v30 = vperm.slane %v8777_v49, 0  ;;  %v1041_v62 = vsub.f32 %v8734_v40, %v8780_v22  ;;  %v8860_v51 = vld [vmem:[#allocation134_spill] sm:$0xff] }
 0x30e   : > { %v5133_v47 = vsub.f32 %v496_v26, %v614_v27  ;;  %v5135_v29 = vsub.f32 %v497_v3, %v615_v39  ;;  %v782_v14 = vmin.f32 %v722_v7, %v5042_v63  ;;  %v783_v59 = vmin.f32 %v722_v7, %v5050_v13  ;;  %v8779_v3 = vld [vmem:[#allocation27_spill] sm:$0xff] }
 0x30f   : > { %2069 = vperm.xlu1 %4107, %v8775_v24   ;;  %8776 = vst [vmem:[#allocation115_spill] sm:$0xff] %v5147_v60  ;;  %v1025_v4 = vsub.f32 %v8779_v3, %v8709_v54  ;;  %v490_v27 = vmin.f32 %v4856_v8, %v5023_v12  ;;  %v8783_v54 = vld [vmem:[#allocation62_spill] sm:$0xff]  ;;  %v5172_v8 = vand.u32 127, %v8382_v11  ;;  %v905_v2 = vmax.f32 %v4956_v57, %v5033_v35  ;;  %v8805_v11 = vld [vmem:[#allocation101_spill] sm:$0xff] }
 0x310   : > { %v930_v1 = vsub.f32 %v782_v14, %v898_v34  ;;  %v931_v32 = vsub.f32 %v783_v59, %v899_v28  ;;  %8778 = vst [vmem:[#allocation16_spill] sm:$0xff] %v5151_v30  ;;  %v1042_v7 = vsub.f32 %v8783_v54, %v8754_v46  ;;  %v5175_v59 = vadd.s32 16, %v5147_v60  ;;  %v8786_v46 = vld [vmem:[#allocation30_spill] sm:$0xff] }
 0x311   : > { %v5144_v55 = vpop.permute.xlu1 %1137  ;;  %1112 = vperm.xlu0 %4109, %v1054_v23   ;;  %v640_v40 = vsub.f32 %v490_v27, %v608_v16  ;;  %8784 = vst [vmem:[#allocation21_spill] sm:$0xff] %v5172_v8  ;;  %v8787_v16 = vld [vmem:[#allocation95_spill] sm:$0xff]  ;;  %v673_v57 = vmax.f32 %v5099_v21, 0.0  ;;  %v8791_v54 = vmov 0 }
 0x312   : > { %v962_v26 = vmax.f32 %v930_v1, 0.0  ;;  %v963_v42 = vmax.f32 %v931_v32, 0.0  ;;  %8785 = vst [vmem:[#allocation50_spill] sm:$0xff] %v5175_v59  ;;  %v1026_v32 = vsub.f32 %v8786_v46, %v8711_v5  ;;  %vm1637_vm0 = vcmp.lt.s32.totalorder %v5175_v59, %v5172_v8 }
 0x313   : > { %v5159_v39 = vpop.permute.xlu0 %686  ;;  %1117 = vperm.xlu2 %4108, %v1055_v17   ;;  %v1057_v17 = vmul.f32 %v1041_v62, %v1025_v4 }
 0x314   : > { %v768_v58 = vmin.f32 %v5159_v39, %v5042_v63  ;;  %v769_v34 = vmin.f32 %v5159_v39, %v5050_v13  ;;  %v5165_v28 = vmul.f32 %v963_v42, %v667_v38  ;;  %v5167_v41 = vmul.f32 %v962_v26, %v666_v31 }
 0x315   : > { %v737_v14 = vpop.permute.xlu2 %736  ;;  %v1058_v26 = vmul.f32 %v1042_v7, %v1026_v32  ;;  %v672_v42 = vmax.f32 %v640_v40, 0.0  ;;  %v5210_v40 = vadd.s32 40, %v5147_v60 }
 0x316   : > { %8781 = vst [vmem:[#allocation47_spill] sm:$0xff] %v5165_v28  ;;  %v788_v23 = vmin.f32 %v737_v14, %v5042_v63  ;;  %v789_v1 = vmin.f32 %v737_v14, %v5050_v13  ;;  %v910_v14 = vmax.f32 %v4971_v19, %v5029_v48 }
 0x317   : > { %8782 = vst [vmem:[#allocation18_spill] sm:$0xff] %v5167_v41  ;;  %2074 = vperm.xlu1 %4107, %v8787_v16   ;;  %vm1643_vm5 = vcmp.lt.s32.totalorder %v5210_v40, %v5172_v8 }
 0x318   : > { %v936_v31 = vsub.f32 %v788_v23, %v904_v56  ;;  %v937_v38 = vsub.f32 %v789_v1, %v905_v2  ;;  %8794 = vst [vmem:[#allocation58_spill] sm:$0xff] %v5210_v40  ;;  %v911_v56 = vmax.f32 %v4971_v19, %v5033_v35  ;;  %v8795_v1 = vld [vmem:[#allocation98_spill] sm:$0xff]  ;;  %v679_v19 = vmax.f32 %v5135_v29, 0.0 }
 0x319   : > { %v5188_v49 = vpop.permute.xlu1 %1496  ;;  %1127 = vperm.xlu0 %4109, %v1057_v17   ;;  %v588_v17 = vmax.f32 %v4922_v43, %v5037_v0  ;;  %v470_v43 = vmin.f32 %v4745_v25, %v5023_v12  ;;  %v8801_v25 = vmov 0 }
 0x31a   : > { %8788 = vst [vmem:[#allocation55_spill] sm:$0xff] %v5188_v49  ;;  %v968_v3 = vmax.f32 %v936_v31, 0.0  ;;  %v969_v22 = vmax.f32 %v937_v38, 0.0  ;;  %vm1573_vm1 = vcmp.gt.f32.partialorder %v5188_v49, %v5151_v30  ;;  %vm1605_vm2 = vcmp.eq.f32.partialorder %v5188_v49, %v5151_v30 }
 0x31b   : > { %v5195_v5 = vpop.permute.xlu0 %701  ;;  %1132 = vperm.xlu2 %4108, %v1058_v26   ;;  %vm1669_vm3 = vmand %vm1605_vm2, %vm1637_vm0  ;;  %v678_v31 = vmax.f32 %v5133_v47, 0.0  ;;  %v8797_v26 = vld [vmem:[#allocation7_spill] sm:$0xff] }
 0x31c   : > { %v774_v4 = vmin.f32 %v5195_v5, %v5042_v63  ;;  %v775_v62 = vmin.f32 %v5195_v5, %v5050_v13  ;;  %v5201_v27 = vmul.f32 %v969_v22, %v673_v57  ;;  %v5203_v21 = vmul.f32 %v968_v3, %v672_v42  ;;  %vm5205_vm4 = vmor %vm1573_vm1, %vm1669_vm3  ;;  %v8798_v3 = vld [vmem:[#allocation8_spill] sm:$0xff] }
 0x31d   : > { %v8792_v54 = vsel %vm5205_vm4, 4294967295, %v8791_v54  ;;  %v752_v7 = vpop.permute.xlu2 %751 }
 0x31e   : > { %8789 = vst [vmem:[#allocation23_spill] sm:$0xff] %v5201_v27  ;;  %v794_v2 = vmin.f32 %v752_v7, %v5042_v63  ;;  %v795_v23 = vmin.f32 %v752_v7, %v5050_v13  ;;  %v8848_v27 = vld [vmem:[#allocation128_spill] sm:$0xff] }
 0x31f   : > { %8790 = vst [vmem:[#allocation6_spill] sm:$0xff] %v5203_v21  ;;  %2079 = vperm.xlu1 %4107, %v8795_v1   ;;  %v8834_v1 = vld [vmem:[#allocation125_spill] sm:$0xff] }
 0x320   : > { %8793 = vst [vmem:[#allocation27_spill] sm:$0xff] %v8792_v54  ;;  %v942_v46 = vsub.f32 %v794_v2, %v910_v14  ;;  %v943_v32 = vsub.f32 %v795_v23, %v911_v56  ;;  %v620_v56 = vsub.f32 %v470_v43, %v588_v17  ;;  %v5250_v23 = vadd.s32 64, %v5147_v60  ;;  %v8807_v43 = vld [vmem:[#allocation10_spill] sm:$0xff] }
 0x321   : > { %v5224_v38 = vpop.permute.xlu1 %1511  ;;  %1486 = vperm.xlu0 %4109, %v8797_v26   ;;  %v4250_v26 = vld [vmem:[%s4400_s5] sm:$0xff] }
 0x322   : > { %8796 = vst [vmem:[#allocation62_spill] sm:$0xff] %v5224_v38  ;;  %v974_v42 = vmax.f32 %v942_v46, 0.0  ;;  %v975_v57 = vmax.f32 %v943_v32, 0.0  ;;  %vm1579_vm6 = vcmp.gt.f32.partialorder %v5224_v38, %v5151_v30  ;;  %vm1611_vm7 = vcmp.eq.f32.partialorder %v5224_v38, %v5151_v30  ;;  %v8869_v38 = vld [vmem:[#allocation28_spill] sm:$0xff] }
 0x323   : > { %v5234_v47 = vpop.permute.xlu0 %716  ;;  %1491 = vperm.xlu2 %4108, %v8798_v3   ;;  %vm1675_vm8 = vmand %vm1611_vm7, %vm1643_vm5  ;;  %8804 = vst [vmem:[#allocation150_spill] sm:$0xff] %v5250_v23  ;;  %v208_v3 = vrot.slane %v4250_v26, 6  ;;  %vm1649_vm10 = vcmp.lt.s32.totalorder %v5250_v23, %v5172_v8  ;;  %v659_v23 = vmax.f32 %v4953_v6, 0.0 }
 0x324   : > { %v5241_v7 = vmul.f32 %v975_v57, %v679_v19  ;;  %v5243_v14 = vmul.f32 %v974_v42, %v678_v31  ;;  %vm5245_vm9 = vmor %vm1579_vm6, %vm1675_vm8  ;;  %v652_v19 = vmax.f32 %v620_v56, 0.0  ;;  %v594_v42 = vmax.f32 %v4944_v10, %v5037_v0  ;;  %v8809_v56 = vld [vmem:[#allocation11_spill] sm:$0xff] }
 0x325   : > { %v8802_v25 = vsel %vm5245_vm9, 4294967295, %v8801_v25  ;;  %v803_v2 = vpop.permute.xlu2 %802  ;;  %v210_v39 = vsub.f32 %v4250_v26, %v208_v3 }
 0x326   : > { %8799 = vst [vmem:[#allocation30_spill] sm:$0xff] %v5241_v7  ;;  %v884_v46 = vmax.f32 %v803_v2, %v5029_v48  ;;  %v885_v32 = vmax.f32 %v803_v2, %v5033_v35  ;;  %v653_v2 = vmax.f32 %v4929_v37, 0.0 }
 0x327   : > { %8800 = vst [vmem:[#allocation7_spill] sm:$0xff] %v5243_v14  ;;  %2084 = vperm.xlu1 %4107, %v8805_v11  }
 0x328   : > { %8803 = vst [vmem:[#allocation8_spill] sm:$0xff] %v8802_v25  ;;  %v916_v17 = vsub.f32 %v768_v58, %v884_v46  ;;  %v917_v31 = vsub.f32 %v769_v34, %v885_v32  ;;  %v8808_v58 = vld [vmem:[#allocation112_spill] sm:$0xff]  ;;  %v8862_v25 = vld [vmem:[#allocation9_spill] sm:$0xff] }
 0x329   : > { %v5266_v57 = vpop.permute.xlu1 %1526  ;;  %1501 = vperm.xlu0 %4109, %v8807_v43   ;;  %v476_v34 = vmin.f32 %v8808_v58, %v5023_v12  ;;  %v5292_v43 = vadd.s32 88, %v5147_v60 }
 0x32a   : > { %8806 = vst [vmem:[#allocation151_spill] sm:$0xff] %v5266_v57  ;;  %v948_v22 = vmax.f32 %v916_v17, 0.0  ;;  %v949_v29 = vmax.f32 %v917_v31, 0.0  ;;  %vm1585_vm11 = vcmp.gt.f32.partialorder %v5266_v57, %v5151_v30  ;;  %vm1617_vm12 = vcmp.eq.f32.partialorder %v5266_v57, %v5151_v30 }
 0x32b   : > { %v5276_v10 = vpop.permute.xlu0 %731  ;;  %1506 = vperm.xlu2 %4108, %v8809_v56   ;;  %vm1681_vm13 = vmand %vm1617_vm12, %vm1649_vm10  ;;  %v626_v3 = vsub.f32 %v476_v34, %v594_v42  ;;  %v8810_v17 = vmov 0  ;;  %8813 = vst [vmem:[#allocation112_spill] sm:$0xff] %v5292_v43  ;;  %v8815_v34 = vld [vmem:[#allocation123_spill] sm:$0xff]  ;;  %vm1655_vm15 = vcmp.lt.s32.totalorder %v5292_v43, %v5172_v8  ;;  %v8830_v43 = vld [vmem:[#allocation114_spill] sm:$0xff]  ;;  %v677_v57 = vmax.f32 %v8862_v25, 0.0 }
 0x32c   : > { %v5279_v46 = vmul.f32 %v948_v22, %v652_v19  ;;  %v5281_v32 = vmul.f32 %v949_v29, %v653_v2  ;;  %vm5287_vm14 = vmor %vm1585_vm11, %vm1681_vm13  ;;  %v4059_v19 = vrot.slane %v210_v39, 9  ;;  %v8814_v2 = vld [vmem:[#allocation104_spill] sm:$0xff]  ;;  %v600_v56 = vmax.f32 %v8815_v34, %v5037_v0 }
 0x32d   : > { %v8811_v17 = vsel %vm5287_vm14, 4294967295, %v8810_v17  ;;  %v818_v31 = vpop.permute.xlu2 %817  ;;  %v658_v26 = vmax.f32 %v626_v3, 0.0  ;;  %v8866_v25 = vld [vmem:[#allocation12_spill] sm:$0xff] }
 0x32e   : > { %8812 = vst [vmem:[#allocation10_spill] sm:$0xff] %v8811_v17  ;;  %v890_v22 = vmax.f32 %v818_v31, %v5029_v48  ;;  %v891_v29 = vmax.f32 %v818_v31, %v5033_v35  ;;  %v8817_v31 = vld [vmem:[#allocation13_spill] sm:$0xff]  ;;  %v215_v5 = vmul.f32 %v4059_v19, %v210_v39  ;;  %v8829_v39 = vmin.f32 %v5234_v47, %v5050_v13 }
 0x32f   : > { %2089 = vperm.xlu1 %4107, %v8814_v2   ;;  %v474_v2 = vmin.f32 %v8830_v43, %v5023_v12 }
 0x330   : > { %v922_v58 = vsub.f32 %v774_v4, %v890_v22  ;;  %v923_v42 = vsub.f32 %v775_v62, %v891_v29  ;;  %v8818_v4 = vld [vmem:[#allocation122_spill] sm:$0xff] }
 0x331   : > { %v5307_v37 = vpop.permute.xlu1 %1541  ;;  %1516 = vperm.xlu0 %4109, %v8817_v31   ;;  %v482_v62 = vmin.f32 %v8818_v4, %v5023_v12  ;;  %v8819_v22 = vld [vmem:[#allocation14_spill] sm:$0xff]  ;;  %v5333_v31 = vadd.s32 112, %v5147_v60  ;;  %v8827_v4 = vld [vmem:[#allocation107_spill] sm:$0xff] }
 0x332   : > { %8816 = vst [vmem:[#allocation11_spill] sm:$0xff] %v5307_v37  ;;  %v954_v40 = vmax.f32 %v922_v58, 0.0  ;;  %v955_v59 = vmax.f32 %v923_v42, 0.0  ;;  %vm1591_vm0 = vcmp.gt.f32.partialorder %v5307_v37, %v5151_v30  ;;  %vm1623_vm1 = vcmp.eq.f32.partialorder %v5307_v37, %v5151_v30 }
 0x333   : > { %v5317_v3 = vpop.permute.xlu0 %746  ;;  %1521 = vperm.xlu2 %4108, %v8819_v22   ;;  %vm1687_vm2 = vmand %vm1623_vm1, %vm1655_vm15  ;;  %v632_v19 = vsub.f32 %v482_v62, %v600_v56  ;;  %v8822_v58 = vmov 0  ;;  %8825 = vst [vmem:[#allocation14_spill] sm:$0xff] %v5333_v31  ;;  %v1141_v22 = vperm.slane %v215_v5, 2  ;;  %v8828_v56 = vmin.f32 %v5234_v47, %v5042_v63 }
 0x334   : > { %v5320_v29 = vmul.f32 %v954_v40, %v658_v26  ;;  %v5322_v34 = vmul.f32 %v955_v59, %v659_v23  ;;  %vm5328_vm3 = vmor %vm1591_vm0, %vm1687_vm2  ;;  %v8826_v23 = vld [vmem:[#allocation118_spill] sm:$0xff]  ;;  %vm1661_vm5 = vcmp.lt.s32.totalorder %v5333_v31, %v5172_v8  ;;  %v1142_v47 = vperm.slane %v215_v5, 6 }
 0x335   : > { %v8823_v58 = vsel %vm5328_vm3, 4294967295, %v8822_v58  ;;  %v833_v42 = vpop.permute.xlu2 %832  ;;  %v592_v26 = vmax.f32 %v8826_v23, %v5037_v0  ;;  %v664_v11 = vmax.f32 %v632_v19, 0.0 }
 0x336   : > { %8820 = vst [vmem:[#allocation123_spill] sm:$0xff] %v5320_v29  ;;  %v896_v40 = vmax.f32 %v833_v42, %v5029_v48  ;;  %v897_v59 = vmax.f32 %v833_v42, %v5033_v35  ;;  %v8831_v42 = vld [vmem:[#allocation129_spill] sm:$0xff] }
 0x337   : > { %8821 = vst [vmem:[#allocation13_spill] sm:$0xff] %v5322_v34  ;;  %2094 = vperm.xlu1 %4107, %v8827_v4   ;;  %v488_v7 = vmin.f32 %v8831_v42, %v5023_v12  ;;  %v8833_v4 = vld [vmem:[#allocation17_spill] sm:$0xff]  ;;  %v5358_v43 = vsub.f32 %v474_v2, %v592_v26  ;;  %v8836_v42 = vld [vmem:[#allocation19_spill] sm:$0xff]  ;;  %v8847_v26 = vld [vmem:[#allocation120_spill] sm:$0xff] }
 0x338   : > { %8824 = vst [vmem:[#allocation122_spill] sm:$0xff] %v8823_v58  ;;  %v928_v62 = vsub.f32 %v8828_v56, %v896_v40  ;;  %v929_v6 = vsub.f32 %v8829_v39, %v897_v59  ;;  %v665_v40 = vmax.f32 %v8834_v1, 0.0  ;;  %v8835_v39 = vld [vmem:[#allocation126_spill] sm:$0xff]  ;;  %v8846_v2 = vld [vmem:[#allocation119_spill] sm:$0xff]  ;;  %v480_v24 = vmin.f32 %v8847_v26, %v5023_v12 }
 0x339   : > { %v5352_v23 = vpop.permute.xlu1 %1556  ;;  %1531 = vperm.xlu0 %4109, %v8833_v4   ;;  %v606_v19 = vmax.f32 %v8835_v39, %v5037_v0  ;;  %v5387_v39 = vperm.slane %v1142_v47, 2  ;;  %v657_v31 = vmax.f32 %v8846_v2, 0.0  ;;  %v8853_v26 = vld [vmem:[#allocation22_spill] sm:$0xff]  ;;  %v8856_v47 = vld [vmem:[#allocation24_spill] sm:$0xff] }
 0x33a   : > { %8832 = vst [vmem:[#allocation118_spill] sm:$0xff] %v5352_v23  ;;  %v960_v56 = vmax.f32 %v928_v62, 0.0  ;;  %v961_v16 = vmax.f32 %v929_v6, 0.0  ;;  %vm1597_vm6 = vcmp.gt.f32.partialorder %v5352_v23, %v5151_v30  ;;  %vm1629_vm7 = vcmp.eq.f32.partialorder %v5352_v23, %v5151_v30  ;;  %v8874_v30 = vld [vmem:[#allocation67_spill] sm:$0xff] }
 0x33b   : > { %v5364_v59 = vpop.permute.xlu0 %761  ;;  %1536 = vperm.xlu2 %4108, %v8836_v42   ;;  %vm1693_vm8 = vmand %vm1629_vm7, %vm1661_vm5  ;;  %v638_v5 = vsub.f32 %v488_v7, %v606_v19  ;;  %v8839_v6 = vmov 0  ;;  %8844 = vst [vmem:[#allocation126_spill] sm:$0xff] %v5387_v39  ;;  %v656_v42 = vmax.f32 %v5358_v43, 0.0  ;;  %v8845_v19 = vld [vmem:[#allocation31_spill] sm:$0xff] }
 0x33c   : > { %v5367_v4 = vmul.f32 %v960_v56, %v664_v11  ;;  %v5369_v1 = vmul.f32 %v961_v16, %v665_v40  ;;  %vm5376_vm10 = vmor %vm1597_vm6, %vm1693_vm8  ;;  %v8842_v11 = vld [vmem:[#allocation135_spill] sm:$0xff]  ;;  %v5385_v56 = vperm.slane %v1141_v22, 2  ;;  %v8849_v22 = vmin.f32 %v5276_v10, %v5042_v63 }
 0x33d   : > { %v8840_v6 = vsel %vm5376_vm10, 4294967295, %v8839_v6  ;;  %v848_v62 = vpop.permute.xlu2 %847  ;;  %v494_v16 = vmin.f32 %v8842_v11, %v5023_v12  ;;  %v612_v11 = vmax.f32 %v8848_v27, %v5037_v0  ;;  %v670_v43 = vmax.f32 %v638_v5, 0.0  ;;  %v8854_v27 = vld [vmem:[#allocation132_spill] sm:$0xff]  ;;  %v8855_v5 = vld [vmem:[#allocation133_spill] sm:$0xff] }
 0x33e   : > { %8837 = vst [vmem:[#allocation114_spill] sm:$0xff] %v5367_v4  ;;  %v902_v40 = vmax.f32 %v848_v62, %v5029_v48  ;;  %v903_v7 = vmax.f32 %v848_v62, %v5033_v35  ;;  %v671_v62 = vmax.f32 %v8850_v50, 0.0  ;;  %v772_v50 = vmin.f32 %v8855_v5, %v5042_v63 }
 0x33f   : > { %8838 = vst [vmem:[#allocation129_spill] sm:$0xff] %v5369_v1  ;;  %2131 = vperm.xlu1 %4107, %v8845_v19   ;;  %v618_v19 = vmax.f32 %v8854_v27, %v5037_v0  ;;  %v5411_v58 = vsub.f32 %v494_v16, %v612_v11  ;;  %v8857_v16 = vld [vmem:[#allocation29_spill] sm:$0xff]  ;;  %v779_v11 = vmin.f32 %v8860_v51, %v5050_v13 }
 0x340   : > { %8841 = vst [vmem:[#allocation17_spill] sm:$0xff] %v8840_v6  ;;  %v934_v33 = vsub.f32 %v8849_v22, %v902_v40  ;;  %v8851_v6 = vmin.f32 %v5276_v10, %v5050_v13  ;;  %v773_v10 = vmin.f32 %v8855_v5, %v5050_v13  ;;  %v778_v5 = vmin.f32 %v8860_v51, %v5042_v63  ;;  %v8870_v51 = vld [vmem:[#allocation46_spill] sm:$0xff] }
 0x341   : > { %8843 = vst [vmem:[#allocation125_spill] sm:$0xff] %v5385_v56  ;;  %v5406_v23 = vpop.permute.xlu1 %2019  ;;  %1546 = vperm.xlu0 %4109, %v8853_v26   ;;  %v676_v17 = vmax.f32 %v5411_v58, 0.0  ;;  %v8865_v58 = vld [vmem:[#allocation51_spill] sm:$0xff]  ;;  %v604_v14 = vmax.f32 %v8870_v51, %v5037_v0  ;;  %v8875_v51 = vld [vmem:[#allocation137_spill] sm:$0xff] }
 0x342   : > { %v935_v2 = vsub.f32 %v8851_v6, %v903_v7  ;;  %8852 = vst [vmem:[#allocation19_spill] sm:$0xff] %v5406_v23  ;;  %v966_v40 = vmax.f32 %v934_v33, 0.0  ;;  %v8858_v33 = vld [vmem:[#allocation54_spill] sm:$0xff] }
 0x343   : > { %v813_v26 = vpop.permute.xlu0 %812  ;;  %1551 = vperm.xlu2 %4108, %v8856_v47   ;;  %v1147_v27 = vadd.f32 %v5385_v56, %v8858_v33 }
 0x344   : > { %v967_v6 = vmax.f32 %v935_v2, 0.0  ;;  %v5426_v22 = vmul.f32 %v966_v40, %v670_v43  ;;  %v888_v37 = vmax.f32 %v813_v26, %v5029_v48  ;;  %v1148_v2 = vadd.f32 %v5387_v39, %v8858_v33 }
 0x345   : > { %v889_v47 = vmax.f32 %v813_v26, %v5033_v35  ;;  %v863_v23 = vpop.permute.xlu2 %862  ;;  %v5440_v43 = vsub.f32 %v1147_v27, %v5279_v46  ;;  %v8864_v26 = vld [vmem:[#allocation136_spill] sm:$0xff]  ;;  %v500_v27 = vmin.f32 %v8865_v58, %v5023_v12 }
 0x346   : > { %8859 = vst [vmem:[#allocation135_spill] sm:$0xff] %v5426_v22  ;;  %v5433_v7 = vmul.f32 %v967_v6, %v671_v62  ;;  %v920_v40 = vsub.f32 %v772_v50, %v888_v37  ;;  %v5444_v54 = vsub.f32 %v1148_v2, %v5281_v32  ;;  %v908_v62 = vmax.f32 %v863_v23, %v5029_v48  ;;  %v8863_v6 = vld [vmem:[#allocation32_spill] sm:$0xff] }
 0x347   : > { %v921_v33 = vsub.f32 %v773_v10, %v889_v47  ;;  %2136 = vperm.xlu1 %4107, %v8863_v6   ;;  %v8867_v2 = vld [vmem:[#allocation36_spill] sm:$0xff]  ;;  %4110 = vrcp.f32 %v5440_v43  ;;  %v909_v58 = vmax.f32 %v863_v23, %v5033_v35  ;;  %v8876_v23 = vmin.f32 %v5317_v3, %v5050_v13 }
 0x348   : > { %8861 = vst [vmem:[#allocation119_spill] sm:$0xff] %v5433_v7  ;;  %v952_v37 = vmax.f32 %v920_v40, 0.0  ;;  %v598_v47 = vmax.f32 %v8867_v2, %v5037_v0  ;;  %v8871_v50 = vld [vmem:[#allocation44_spill] sm:$0xff]  ;;  %4112 = vrcp.f32 %v5444_v54 }
 0x349   : > { %v953_v6 = vmax.f32 %v921_v33, 0.0  ;;  %v5460_v49 = vpop.permute.xlu1 %2034  ;;  %1561 = vperm.xlu0 %4109, %v8869_v38   ;;  %v8873_v33 = vmin.f32 %v5317_v3, %v5042_v63  ;;  %v941_v10 = vsub.f32 %v8876_v23, %v909_v58 }
 0x34a   : > { %8868 = vst [vmem:[#allocation120_spill] sm:$0xff] %v5460_v49  ;;  %v5466_v40 = vmul.f32 %v952_v37, %v656_v42  ;;  %v5480_v37 = vsub.f32 %v500_v27, %v618_v19  ;;  %v8877_v42 = vmin.f32 %v4826_v9, %v5023_v12  ;;  %v8878_v27 = vld [vmem:[#allocation144_spill] sm:$0xff] }
 0x34b   : > { %v5472_v2 = vmul.f32 %v953_v6, %v657_v31  ;;  %v940_v38 = vsub.f32 %v8873_v33, %v908_v62  ;;  %v828_v21 = vpop.permute.xlu0 %827  ;;  %2024 = vperm.xlu2 %4108, %v8874_v30   ;;  %v630_v6 = vsub.f32 %v480_v24, %v598_v47  ;;  %v1153_v3 = vadd.f32 %v5385_v56, %v8878_v27  ;;  %v8880_v31 = vld [vmem:[#allocation33_spill] sm:$0xff] }
 0x34c   : > { %v894_v33 = vmax.f32 %v828_v21, %v5029_v48  ;;  %v5493_v19 = vsub.f32 %v8877_v42, %v604_v14  ;;  %v973_v58 = vmax.f32 %v941_v10, 0.0  ;;  %v895_v23 = vmax.f32 %v828_v21, %v5033_v35 }
 0x34d   : > { %8872 = vst [vmem:[#allocation128_spill] sm:$0xff] %v5472_v2  ;;  %v972_v8 = vmax.f32 %v940_v38, 0.0  ;;  %v878_v30 = vpop.permute.xlu2 %877  ;;  %v1154_v47 = vadd.f32 %v5387_v39, %v8878_v27  ;;  %v4111_v9 = vpop.eup %4110  ;;  %v682_v14 = vmax.f32 %v5480_v37, 0.0  ;;  %v5507_v42 = vsub.f32 %v1153_v3, %v5320_v29  ;;  %v8884_v37 = vld [vmem:[#allocation20_spill] sm:$0xff]  ;;  %v8885_v3 = vld [vmem:[#allocation139_spill] sm:$0xff]  ;;  %v8894_v29 = vld [vmem:[#allocation37_spill] sm:$0xff] }
 0x34e   : > { %v926_v62 = vsub.f32 %v778_v5, %v894_v33  ;;  %v5509_v10 = vmul.f32 %v973_v58, %v677_v57  ;;  %v927_v21 = vsub.f32 %v779_v11, %v895_v23  ;;  %v5511_v49 = vpop.eup %4112  ;;  %v662_v24 = vmax.f32 %v630_v6, 0.0  ;;  %v8883_v33 = vld [vmem:[#allocation70_spill] sm:$0xff] }
 0x34f   : > { %v5502_v38 = vmul.f32 %v972_v8, %v676_v17  ;;  %2141 = vperm.xlu1 %4107, %v8880_v31   ;;  %v5514_v60 = vsub.f32 %v1154_v47, %v5322_v34  ;;  %v914_v17 = vmax.f32 %v878_v30, %v5029_v48  ;;  %v683_v27 = vmax.f32 %v8884_v37, 0.0  ;;  %v8886_v58 = vld [vmem:[#allocation142_spill] sm:$0xff] }
 0x350   : > { %8881 = vst [vmem:[#allocation22_spill] sm:$0xff] %v5509_v10  ;;  %v958_v8 = vmax.f32 %v926_v62, 0.0  ;;  %v663_v31 = vmax.f32 %v8885_v3, 0.0  ;;  %v668_v57 = vmax.f32 %v5493_v19, 0.0  ;;  %v959_v11 = vmax.f32 %v927_v21, 0.0 }
 0x351   : > { %8879 = vst [vmem:[#allocation131_spill] sm:$0xff] %v5502_v38  ;;  %v5517_v5 = vpop.permute.xlu1 %2039  ;;  %2029 = vperm.xlu0 %4109, %v8883_v33   ;;  %v610_v6 = vmax.f32 %v8886_v58, %v5037_v0  ;;  %v1159_v23 = vadd.f32 %v5385_v56, %v5035_v18  ;;  %v1160_v62 = vadd.f32 %v5387_v39, %v5035_v18  ;;  %v8888_v33 = vld [vmem:[#allocation35_spill] sm:$0xff]  ;;  %4114 = vrcp.f32 %v5507_v42 }
 0x352   : > { %8882 = vst [vmem:[#allocation132_spill] sm:$0xff] %v5517_v5  ;;  %v5529_v47 = vmul.f32 %v958_v8, %v662_v24  ;;  %v1243_v37 = vmul.f32 %v4111_v9, %v5440_v43  ;;  %v1244_v19 = vmul.f32 %v5511_v49, %v5444_v54  ;;  %v5536_v21 = vmul.f32 %v959_v11, %v663_v31 }
 0x353   : > { %v843_v28 = vpop.permute.xlu0 %842  ;;  %2146 = vperm.xlu2 %4108, %v8888_v33   ;;  %4116 = vrcp.f32 %v5514_v60  ;;  %v915_v3 = vmax.f32 %v878_v30, %v5033_v35  ;;  %v8890_v18 = vmin.f32 %v5364_v59, %v5042_v63  ;;  %v5548_v33 = vsub.f32 %v1159_v23, %v5367_v4  ;;  %v8891_v30 = vld [vmem:[#allocation140_spill] sm:$0xff] }
 0x354   : > { %8887 = vst [vmem:[#allocation133_spill] sm:$0xff] %v5529_v47  ;;  %v900_v11 = vmax.f32 %v843_v28, %v5029_v48  ;;  %v901_v41 = vmax.f32 %v843_v28, %v5033_v35  ;;  %v8892_v47 = vld [vmem:[#allocation61_spill] sm:$0xff]  ;;  %v1275_v23 = vsub.f32 2.0, %v1243_v37  ;;  %v5562_v4 = vsub.f32 %v1160_v62, %v5369_v1 }
 0x355   : > { %8889 = vst [vmem:[#allocation24_spill] sm:$0xff] %v5536_v21  ;;  %v946_v24 = vsub.f32 %v8890_v18, %v914_v17  ;;  %v5545_v58 = vpop.permute.xlu2 %1072  ;;  %v669_v21 = vmax.f32 %v8891_v30, 0.0  ;;  %v616_v17 = vmax.f32 %v8892_v47, %v5037_v0  ;;  %v8893_v18 = vmin.f32 %v5364_v59, %v5050_v13 }
 0x356   : > { %v8895_v31 = vmin.f32 %v8864_v26, %v5042_v63  ;;  %v8896_v30 = vmin.f32 %v8864_v26, %v5050_v13  ;;  %v8897_v47 = vmin.f32 %v8857_v16, %v5023_v12  ;;  %4118 = vrcp.f32 %v5548_v33 }
 0x357   : > { %v947_v8 = vsub.f32 %v8893_v18, %v915_v3  ;;  %v978_v34 = vmax.f32 %v946_v24, 0.0  ;;  %2151 = vperm.xlu1 %4107, %v8894_v29   ;;  %v1177_v3 = vadd.f32 %v5385_v56, %v5144_v55  ;;  %v8899_v18 = vld [vmem:[#allocation38_spill] sm:$0xff]  ;;  %v8900_v16 = vmin.f32 %v8871_v50, %v5023_v12 }
 0x358   : > { %v932_v28 = vsub.f32 %v8895_v31, %v900_v11  ;;  %v933_v5 = vsub.f32 %v8896_v30, %v901_v41  ;;  %v5573_v59 = vsub.f32 %v8897_v47, %v610_v6  ;;  %v4115_v31 = vpop.eup %4114  ;;  %v1276_v11 = vsub.f32 2.0, %v1244_v19  ;;  %v8901_v47 = vld [vmem:[#allocation40_spill] sm:$0xff] }
 0x359   : > { %v979_v37 = vmax.f32 %v947_v8, 0.0  ;;  %v5577_v24 = vmul.f32 %v978_v34, %v682_v14  ;;  %v5579_v62 = vpop.permute.xlu1 %2044  ;;  %2156 = vperm.xlu0 %4109, %v8899_v18   ;;  %v5583_v30 = vpop.eup %4116  ;;  %v5588_v6 = vsub.f32 %v8900_v16, %v616_v17  ;;  %v1178_v34 = vadd.f32 %v5387_v39, %v5144_v55  ;;  %v8905_v16 = vld [vmem:[#allocation42_spill] sm:$0xff] }
 0x35a   : > { %8898 = vst [vmem:[#allocation29_spill] sm:$0xff] %v5579_v62  ;;  %v964_v41 = vmax.f32 %v932_v28, 0.0  ;;  %v965_v26 = vmax.f32 %v933_v5, 0.0  ;;  %v5598_v28 = vmul.f32 %v4111_v9, %v1275_v23  ;;  %4120 = vrcp.f32 %v5562_v4 }
 0x35b   : > { %v5592_v14 = vmul.f32 %v979_v37, %v683_v27  ;;  %v5595_v8 = vsub.f32 %v1177_v3, %v5577_v24  ;;  %v858_v19 = vpop.permute.xlu0 %857  ;;  %2161 = vperm.xlu2 %4108, %v8901_v47   ;;  %v674_v17 = vmax.f32 %v5573_v59, 0.0  ;;  %v1249_v55 = vmul.f32 %v4115_v31, %v5507_v42  ;;  %v8904_v59 = vld [vmem:[#allocation143_spill] sm:$0xff] }
 0x35c   : > { %v5601_v5 = vmul.f32 %v964_v41, %v668_v57  ;;  %v5603_v50 = vmul.f32 %v965_v26, %v669_v21  ;;  %v5614_v9 = vmul.f32 %v5511_v49, %v1276_v11  ;;  %v1250_v57 = vmul.f32 %v5583_v30, %v5514_v60  ;;  %v4119_v49 = vpop.eup %4118 }
 0x35d   : > { %v5608_v27 = vsub.f32 %v1178_v34, %v5592_v14  ;;  %4122 = vrcp.f32 %v5595_v8  ;;  %v5611_v3 = vpop.permute.xlu2 %1087  ;;  %v675_v37 = vmax.f32 %v8904_v59, 0.0  ;;  %v906_v41 = vmax.f32 %v858_v19, %v5029_v48  ;;  %v8909_v34 = vld [vmem:[#allocation43_spill] sm:$0xff] }
 0x35e   : > { %8902 = vst [vmem:[#allocation54_spill] sm:$0xff] %v5601_v5  ;;  %v907_v26 = vmax.f32 %v858_v19, %v5033_v35  ;;  %v1165_v21 = vadd.f32 %v5385_v56, %v5075_v61  ;;  %v1339_v23 = vmul.f32 %v5598_v28, %v5440_v43  ;;  %v1166_v59 = vadd.f32 %v5387_v39, %v5075_v61 }
 0x35f   : > { %8903 = vst [vmem:[#allocation134_spill] sm:$0xff] %v5603_v50  ;;  %4124 = vrcp.f32 %v5608_v27  ;;  %2166 = vperm.xlu1 %4107, %v8905_v16   ;;  %v1281_v47 = vsub.f32 2.0, %v1249_v55  ;;  %v8906_v19 = vmin.f32 %v8866_v25, %v5042_v63  ;;  %v8907_v16 = vmin.f32 %v8866_v25, %v5050_v13  ;;  %v8910_v50 = vld [vmem:[#allocation45_spill] sm:$0xff] }
 0x360   : > { %v4121_v29 = vpop.eup %4120  ;;  %v1340_v43 = vmul.f32 %v5614_v9, %v5444_v54  ;;  %v1282_v0 = vsub.f32 2.0, %v1250_v57  ;;  %v5647_v61 = vsub.f32 %v1165_v21, %v5426_v22  ;;  %v1371_v5 = vsub.f32 2.0, %v1339_v23 }
 0x361   : > { %v938_v62 = vsub.f32 %v8906_v19, %v906_v41  ;;  %v939_v11 = vsub.f32 %v8907_v16, %v907_v26  ;;  %v5641_v18 = vpop.permute.xlu1 %2049  ;;  %2171 = vperm.xlu0 %4109, %v8909_v34   ;;  %v1255_v19 = vmul.f32 %v4119_v49, %v5548_v33  ;;  %v5656_v54 = vsub.f32 %v1166_v59, %v5433_v7 }
 0x362   : > { %8908 = vst [vmem:[#allocation9_spill] sm:$0xff] %v5641_v18  ;;  %v5660_v22 = vmul.f32 %v4115_v31, %v1281_v47  ;;  %v1171_v23 = vadd.f32 %v5385_v56, %v5112_v53  ;;  %4126 = vrcp.f32 %v5647_v61  ;;  %v5674_v31 = vmul.f32 %v5583_v30, %v1282_v0 }
 0x363   : > { %v4123_v41 = vpop.eup %4122  ;;  %v970_v25 = vmax.f32 %v938_v62, 0.0  ;;  %v971_v26 = vmax.f32 %v939_v11, 0.0  ;;  %v873_v34 = vpop.permute.xlu0 %872  ;;  %2176 = vperm.xlu2 %4108, %v8910_v50   ;;  %v1256_v62 = vmul.f32 %v4121_v29, %v5562_v4  ;;  %v1287_v47 = vsub.f32 2.0, %v1255_v19 }
 0x364   : > { %v1273_v57 = vmul.f32 %v4123_v41, %v5595_v8  ;;  %v912_v21 = vmax.f32 %v873_v34, %v5029_v48  ;;  %v1372_v48 = vsub.f32 2.0, %v1340_v43  ;;  %4128 = vrcp.f32 %v5656_v54 }
 0x365   : > { %v4125_v55 = vpop.eup %4124  ;;  %v5663_v11 = vmul.f32 %v970_v25, %v674_v17  ;;  %v5665_v1 = vmul.f32 %v971_v26, %v675_v37  ;;  %v5667_v16 = vpop.permute.xlu2 %1102  ;;  %v913_v17 = vmax.f32 %v873_v34, %v5033_v35  ;;  %v8912_v25 = vld [vmem:[#allocation48_spill] sm:$0xff]  ;;  %v8913_v18 = vmin.f32 %v8875_v51, %v5042_v63 }
 0x366   : > { %v1274_v59 = vmul.f32 %v4125_v55, %v5608_v27  ;;  %v1305_v50 = vsub.f32 2.0, %v1273_v57  ;;  %v1345_v43 = vmul.f32 %v5660_v22, %v5507_v42  ;;  %v1288_v0 = vsub.f32 2.0, %v1256_v62  ;;  %v8916_v57 = vld [vmem:[#allocation49_spill] sm:$0xff] }
 0x367   : > { %8911 = vst [vmem:[#allocation136_spill] sm:$0xff] %v5665_v1  ;;  %2181 = vperm.xlu1 %4107, %v8912_v25   ;;  %v944_v7 = vsub.f32 %v8913_v18, %v912_v21  ;;  %v1403_v1 = vmul.f32 %v1371_v5, %v5598_v28  ;;  %v8914_v30 = vmin.f32 %v8875_v51, %v5050_v13 }
 0x368   : > { %v1306_v37 = vsub.f32 2.0, %v1274_v59  ;;  %v1337_v26 = vmul.f32 %v4123_v41, %v1305_v50  ;;  %v1172_v50 = vadd.f32 %v5387_v39, %v5112_v53  ;;  %v1346_v28 = vmul.f32 %v5674_v31, %v5514_v60  ;;  %v8917_v59 = vld [vmem:[#allocation52_spill] sm:$0xff] }
 0x369   : > { %v945_v34 = vsub.f32 %v8914_v30, %v913_v17  ;;  %v5688_v19 = vpop.permute.xlu1 %2054  ;;  %2186 = vperm.xlu0 %4109, %v8916_v57   ;;  %v976_v21 = vmax.f32 %v944_v7, 0.0  ;;  %v1319_v42 = vmul.f32 %v4119_v49, %v1287_v47  ;;  %v1151_v5 = vadd.f32 %v5385_v56, %v5545_v58  ;;  %v4127_v17 = vpop.eup %4126 }
 0x36a   : > { %8915 = vst [vmem:[#allocation51_spill] sm:$0xff] %v5688_v19  ;;  %v1338_v41 = vmul.f32 %v4125_v55, %v1306_v37  ;;  %v1369_v18 = vmul.f32 %v1337_v26, %v5595_v8  ;;  %v1152_v53 = vadd.f32 %v5387_v39, %v5545_v58  ;;  %v8918_v7 = vmax.f32 %v5588_v6, 0.0 }
 0x36b   : > { %v977_v51 = vmax.f32 %v945_v34, 0.0  ;;  %v1068_v62 = vpop.permute.xlu0 %1067  ;;  %2191 = vperm.xlu2 %4108, %v8917_v59   ;;  %v1404_v60 = vmul.f32 %v1372_v48, %v5614_v9  ;;  %v1435_v49 = vmul.f32 %v1403_v1, %v5279_v46  ;;  %v1377_v55 = vsub.f32 2.0, %v1345_v43  ;;  %v4129_v34 = vpop.eup %4128 }
 0x36c   : > { %v1370_v30 = vmul.f32 %v1338_v41, %v5608_v27  ;;  %v1401_v35 = vsub.f32 2.0, %v1369_v18  ;;  %v5704_v8 = vmul.f32 %v976_v21, %v8918_v7  ;;  %v1320_v47 = vmul.f32 %v4121_v29, %v1288_v0  ;;  %v8920_v29 = vld [vmem:[#allocation56_spill] sm:$0xff] }
 0x36d   : > { %v5708_v37 = vpop.permute.xlu2 %1117  ;;  %v5711_v59 = vsub.f32 %v1171_v23, %v5502_v38  ;;  %v8919_v58 = vmax.f32 %v5025_v45, 0.0  ;;  %v1378_v6 = vsub.f32 2.0, %v1346_v28  ;;  %v1351_v21 = vmul.f32 %v1319_v42, %v5548_v33  ;;  %v8932_v45 = vld [vmem:[#allocation13_spill] sm:$0xff] }
 0x36e   : > { %v1402_v27 = vsub.f32 2.0, %v1370_v30  ;;  %v1433_v18 = vmul.f32 %v1401_v35, %v1337_v26  ;;  %v1261_v48 = vmul.f32 %v4127_v17, %v5647_v61  ;;  %v5720_v46 = vsub.f32 %v1151_v5, %v5466_v40 }
 0x36f   : > { %v5715_v57 = vmul.f32 %v977_v51, %v8919_v58  ;;  %2196 = vperm.xlu1 %4107, %v8920_v29   ;;  %v5727_v35 = vsub.f32 %v1152_v53, %v5472_v2  ;;  %v1352_v23 = vmul.f32 %v1320_v47, %v5562_v4  ;;  %v1262_v33 = vmul.f32 %v4129_v34, %v5656_v54  ;;  %v8926_v53 = vld [vmem:[#allocation60_spill] sm:$0xff] }
 0x370   : > { %v1434_v1 = vmul.f32 %v1402_v27, %v1338_v41  ;;  %v5724_v9 = vmul.f32 %v1433_v18, %v5577_v24  ;;  %v5734_v26 = vsub.f32 %v1172_v50, %v5509_v10  ;;  %v8924_v24 = vld [vmem:[#allocation57_spill] sm:$0xff]  ;;  %4130 = vrcp.f32 %v5711_v59 }
 0x371   : > { %v5738_v0 = vpop.permute.xlu1 %2059  ;;  %2201 = vperm.xlu0 %4109, %v8924_v24   ;;  %v1149_v28 = vadd.f32 %v5385_v56, %v1068_v62  ;;  %v1150_v4 = vadd.f32 %v5387_v39, %v1068_v62  ;;  %v1383_v5 = vsub.f32 2.0, %v1351_v21  ;;  %v1293_v51 = vsub.f32 2.0, %v1261_v48 }
 0x372   : > { %8921 = vst [vmem:[#allocation12_spill] sm:$0xff] %v5724_v9  ;;  %v5743_v41 = vmul.f32 %v1434_v1, %v5592_v14  ;;  %4132 = vrcp.f32 %v5720_v46  ;;  %v1409_v27 = vmul.f32 %v1377_v55, %v5660_v22  ;;  %v1384_v18 = vsub.f32 2.0, %v1352_v23  ;;  %v8927_v55 = vld [vmem:[#allocation63_spill] sm:$0xff] }
 0x373   : > { %8922 = vst [vmem:[#allocation36_spill] sm:$0xff] %v5734_v26  ;;  %v1083_v30 = vpop.permute.xlu0 %1082  ;;  %2206 = vperm.xlu2 %4108, %v8926_v53   ;;  %4134 = vrcp.f32 %v5727_v35  ;;  %v5753_v7 = vsub.f32 %v1149_v28, %v5089_v36  ;;  %v5756_v14 = vsub.f32 %v1150_v4, %v5087_v52  ;;  %v1294_v58 = vsub.f32 2.0, %v1262_v33  ;;  %v8944_v9 = vld [vmem:[#allocation71_spill] sm:$0xff] }
 0x374   : > { %8923 = vst [vmem:[#allocation28_spill] sm:$0xff] %v5738_v0  ;;  %4136 = vrcp.f32 %v5734_v26  ;;  %v1410_v48 = vmul.f32 %v1378_v6, %v5674_v31  ;;  %v1155_v1 = vadd.f32 %v5385_v56, %v1083_v30  ;;  %v1156_v28 = vadd.f32 %v5387_v39, %v1083_v30 }
 0x375   : > { %8925 = vst [vmem:[#allocation46_spill] sm:$0xff] %v5743_v41  ;;  %v5762_v21 = vpop.permute.xlu2 %1132  ;;  %4138 = vrcp.f32 %v5753_v7  ;;  %v1415_v4 = vmul.f32 %v1383_v5, %v1319_v42  ;;  %v5768_v50 = vmul.f32 %v4127_v17, %v1293_v51  ;;  %v1157_v22 = vadd.f32 %v5385_v56, %v5611_v3  ;;  %v8928_v5 = vld [vmem:[#allocation123_spill] sm:$0xff] }
 0x376   : > { %4140 = vrcp.f32 %v5756_v14  ;;  %v5774_v23 = vpop.eup %4130  ;;  %v5777_v31 = vmul.f32 %v1404_v60, %v5281_v32  ;;  %v1158_v6 = vadd.f32 %v5387_v39, %v5611_v3  ;;  %v5782_v33 = vsub.f32 %v1155_v1, %v5127_v20  ;;  %v8931_v32 = vld [vmem:[#allocation65_spill] sm:$0xff]  ;;  %v8943_v41 = vld [vmem:[#allocation47_spill] sm:$0xff] }
 0x377   : > { %2307 = vperm.xlu1 %4107, %v8927_v55   ;;  %v5785_v42 = vsub.f32 %v1156_v28, %v5125_v15  ;;  %v5788_v51 = vmul.f32 %v1409_v27, %v8928_v5  ;;  %v1416_v30 = vmul.f32 %v1384_v18, %v1320_v47  ;;  %v5790_v62 = vmul.f32 %v4129_v34, %v1294_v58  ;;  %v8934_v27 = vld [vmem:[#allocation114_spill] sm:$0xff]  ;;  %v8936_v58 = vld [vmem:[#allocation133_spill] sm:$0xff]  ;;  %v8938_v47 = vld [vmem:[#allocation24_spill] sm:$0xff] }
 0x378   : > { %v4133_v17 = vpop.eup %4132  ;;  %v5795_v60 = vmul.f32 %v1435_v49, %v1435_v49  ;;  %v5798_v1 = vmul.f32 %v1410_v48, %v8932_v45  ;;  %4142 = vrcp.f32 %v5782_v33  ;;  %v5808_v18 = vmul.f32 %v1415_v4, %v8934_v27  ;;  %v8937_v48 = vld [vmem:[#allocation68_spill] sm:$0xff] }
 0x379   : > { %8929 = vst [vmem:[#allocation44_spill] sm:$0xff] %v5788_v51  ;;  %v5792_v43 = vpop.permute.xlu1 %2064  ;;  %2312 = vperm.xlu0 %4109, %v8931_v32   ;;  %v4135_v3 = vpop.eup %4134  ;;  %v1357_v49 = vmul.f32 %v5768_v50, %v5647_v61  ;;  %v5813_v5 = vsub.f32 %v1157_v22, %v8936_v58  ;;  %4144 = vrcp.f32 %v5785_v42  ;;  %v1247_v53 = vmul.f32 %v4133_v17, %v5720_v46  ;;  %v8939_v61 = vld [vmem:[#allocation129_spill] sm:$0xff] }
 0x37a   : > { %8930 = vst [vmem:[#allocation137_spill] sm:$0xff] %v5792_v43  ;;  %v5805_v34 = vpop.eup %4136  ;;  %v5819_v24 = vsub.f32 %v1158_v6, %v8938_v47  ;;  %v5824_v25 = vmul.f32 %v1416_v30, %v8939_v61  ;;  %v1358_v22 = vmul.f32 %v5790_v62, %v5656_v54  ;;  %v1248_v13 = vmul.f32 %v4135_v3, %v5727_v35  ;;  %v8942_v43 = vld [vmem:[#allocation18_spill] sm:$0xff] }
 0x37b   : > { %8933 = vst [vmem:[#allocation144_spill] sm:$0xff] %v5798_v1  ;;  %v1098_v45 = vpop.permute.xlu0 %1097  ;;  %2317 = vperm.xlu2 %4108, %v8937_v48   ;;  %v4139_v28 = vpop.eup %4138  ;;  %v1163_v6 = vadd.f32 %v5385_v56, %v5667_v16  ;;  %v1389_v61 = vsub.f32 2.0, %v1357_v49  ;;  %v1267_v54 = vmul.f32 %v5774_v23, %v5711_v59  ;;  %4146 = vrcp.f32 %v5813_v5 }
 0x37c   : > { %8935 = vst [vmem:[#allocation20_spill] sm:$0xff] %v5808_v18  ;;  %v1161_v4 = vadd.f32 %v5385_v56, %v1098_v45  ;;  %v1162_v27 = vadd.f32 %v5387_v39, %v1098_v45  ;;  %v4141_v29 = vpop.eup %4140  ;;  %v1245_v63 = vmul.f32 %v4139_v28, %v5753_v7  ;;  %v1268_v55 = vmul.f32 %v5805_v34, %v5734_v26 }
 0x37d   : > { %8940 = vst [vmem:[#allocation139_spill] sm:$0xff] %v5824_v25  ;;  %v5830_v0 = vpop.permute.xlu2 %1491  ;;  %v1246_v19 = vmul.f32 %v4141_v29, %v5756_v14  ;;  %v1279_v10 = vsub.f32 2.0, %v1247_v53  ;;  %4148 = vrcp.f32 %v5819_v24  ;;  %v1164_v49 = vadd.f32 %v5387_v39, %v5667_v16 }
 0x37e   : > { %8941 = vst [vmem:[#allocation142_spill] sm:$0xff] %v5830_v0  ;;  %v5836_v45 = vsub.f32 %v1161_v4, %v8942_v43  ;;  %v5839_v30 = vsub.f32 %v1162_v27, %v8943_v41  ;;  %v1277_v48 = vsub.f32 2.0, %v1245_v63  ;;  %v4143_v32 = vpop.eup %4142  ;;  %v1280_v27 = vsub.f32 2.0, %v1248_v13  ;;  %v8946_v63 = vld [vmem:[#allocation75_spill] sm:$0xff] }
 0x37f   : > { %2322 = vperm.xlu1 %4107, %v8944_v9   ;;  %v1278_v4 = vsub.f32 2.0, %v1246_v19  ;;  %v4145_v38 = vpop.eup %4144  ;;  %v1251_v18 = vmul.f32 %v4143_v32, %v5782_v33  ;;  %v8947_v9 = vld [vmem:[#allocation54_spill] sm:$0xff]  ;;  %v1299_v19 = vsub.f32 2.0, %v1267_v54 }
 0x380   : > { %v1309_v25 = vmul.f32 %v4139_v28, %v1277_v48  ;;  %v5855_v58 = vsub.f32 %v1163_v6, %v8947_v9  ;;  %v1252_v53 = vmul.f32 %v4145_v38, %v5785_v42  ;;  %4150 = vrcp.f32 %v5836_v45  ;;  %v8949_v28 = vld [vmem:[#allocation78_spill] sm:$0xff] }
 0x381   : > { %v5851_v47 = vpop.permute.xlu1 %2069  ;;  %2327 = vperm.xlu0 %4109, %v8946_v63   ;;  %v1310_v26 = vmul.f32 %v4141_v29, %v1278_v4  ;;  %v1283_v1 = vsub.f32 2.0, %v1251_v18  ;;  %4152 = vrcp.f32 %v5839_v30  ;;  %v1390_v48 = vsub.f32 2.0, %v1358_v22  ;;  %v5867_v4 = vpop.eup %4146 }
 0x382   : > { %8945 = vst [vmem:[#allocation140_spill] sm:$0xff] %v5851_v47  ;;  %v1341_v13 = vmul.f32 %v1309_v25, %v5753_v7  ;;  %v5864_v63 = vmul.f32 %v4133_v17, %v1279_v10  ;;  %v1284_v29 = vsub.f32 2.0, %v1252_v53  ;;  %v5870_v9 = vmul.f32 %v1389_v61, %v5768_v50  ;;  %v8952_v61 = vld [vmem:[#allocation81_spill] sm:$0xff] }
 0x383   : > { %v5861_v16 = vpop.permute.xlu0 %1112  ;;  %2332 = vperm.xlu2 %4108, %v8949_v28   ;;  %v1342_v6 = vmul.f32 %v1310_v26, %v5756_v14  ;;  %v5872_v54 = vmul.f32 %v4135_v3, %v1280_v27  ;;  %v1315_v18 = vmul.f32 %v4143_v32, %v1283_v1  ;;  %v5876_v2 = vpop.eup %4148  ;;  %v8951_v28 = vld [vmem:[#allocation134_spill] sm:$0xff]  ;;  %4154 = vrcp.f32 %v5855_v58 }
 0x384   : > { %8948 = vst [vmem:[#allocation61_spill] sm:$0xff] %v5861_v16  ;;  %v1373_v7 = vsub.f32 2.0, %v1341_v13  ;;  %v5879_v22 = vsub.f32 %v1164_v49, %v8951_v28  ;;  %v1316_v14 = vmul.f32 %v4145_v38, %v1284_v29  ;;  %v1300_v17 = vsub.f32 2.0, %v1268_v55  ;;  %v8954_v13 = vld [vmem:[#allocation84_spill] sm:$0xff] }
 0x385   : > { %v5874_v51 = vpop.permute.xlu2 %1506  ;;  %v1374_v10 = vsub.f32 2.0, %v1342_v6  ;;  %v5883_v53 = vmul.f32 %v5774_v23, %v1299_v19  ;;  %v1347_v3 = vmul.f32 %v1315_v18, %v5782_v33  ;;  %v5889_v1 = vmul.f32 %v5864_v63, %v5720_v46 }
 0x386   : > { %8950 = vst [vmem:[#allocation143_spill] sm:$0xff] %v5874_v51  ;;  %v1405_v50 = vmul.f32 %v1373_v7, %v1309_v25  ;;  %v4151_v32 = vpop.eup %4150  ;;  %v1253_v27 = vmul.f32 %v5867_v4, %v5813_v5  ;;  %v1348_v38 = vmul.f32 %v1316_v14, %v5785_v42  ;;  %v5895_v23 = vmul.f32 %v1390_v48, %v5790_v62  ;;  %v8957_v7 = vld [vmem:[#allocation87_spill] sm:$0xff] }
 0x387   : > { %2337 = vperm.xlu1 %4107, %v8952_v61   ;;  %v1406_v49 = vmul.f32 %v1374_v10, %v1310_v26  ;;  %v4153_v55 = vpop.eup %4152  ;;  %v5899_v25 = vmul.f32 %v5872_v54, %v5727_v35  ;;  %v1379_v19 = vsub.f32 2.0, %v1347_v3  ;;  %v5909_v26 = vmul.f32 %v5876_v2, %v5819_v24 }
 0x388   : > { %v5902_v33 = vmul.f32 %v1405_v50, %v5089_v36  ;;  %4156 = vrcp.f32 %v5879_v22  ;;  %v1380_v42 = vsub.f32 2.0, %v1348_v38  ;;  %v5916_v35 = vmul.f32 %v5805_v34, %v1300_v17  ;;  %v8962_v17 = vld [vmem:[#allocation90_spill] sm:$0xff] }
 0x389   : > { %v5904_v46 = vpop.permute.xlu1 %2074  ;;  %2342 = vperm.xlu0 %4109, %v8954_v13   ;;  %v5913_v62 = vmul.f32 %v1406_v49, %v5087_v52  ;;  %v5920_v36 = vmul.f32 %v5883_v53, %v5711_v59  ;;  %v1411_v48 = vmul.f32 %v1379_v19, %v1315_v18  ;;  %v1257_v6 = vmul.f32 %v4151_v32, %v5836_v45  ;;  %v5926_v10 = vpop.eup %4154  ;;  %v8958_v18 = vld [vmem:[#allocation115_spill] sm:$0xff] }
 0x38a   : > { %8953 = vst [vmem:[#allocation123_spill] sm:$0xff] %v5904_v46  ;;  %v1285_v50 = vsub.f32 2.0, %v1253_v27  ;;  %v1412_v3 = vmul.f32 %v1380_v42, %v1316_v14  ;;  %v1258_v34 = vmul.f32 %v4153_v55, %v5839_v30  ;;  %v5933_v38 = vadd.s32 32, %v8958_v18 }
 0x38b   : > { %8955 = vst [vmem:[#allocation13_spill] sm:$0xff] %v5913_v62  ;;  %v5923_v29 = vpop.permute.xlu0 %1127  ;;  %2347 = vperm.xlu2 %4108, %v8957_v7   ;;  %v1443_v59 = vmul.f32 %v1411_v48, %v5127_v20  ;;  %v1289_v49 = vsub.f32 2.0, %v1257_v6  ;;  %v1169_v46 = vadd.f32 %v5385_v56, %v5708_v37  ;;  %v5945_v42 = vmul.f32 %v5926_v10, %v5855_v58 }
 0x38c   : > { %8956 = vst [vmem:[#allocation114_spill] sm:$0xff] %v5923_v29  ;;  %v5941_v27 = vmul.f32 %v1412_v3, %v5125_v15  ;;  %v1290_v14 = vsub.f32 2.0, %v1258_v34  ;;  %v1170_v20 = vadd.f32 %v5387_v39, %v5708_v37  ;;  %v5955_v15 = vadd.s32 8, %v8958_v18 }
 0x38d   : > { %8959 = vst [vmem:[#allocation129_spill] sm:$0xff] %v5933_v38  ;;  %v5935_v19 = vpop.permute.xlu2 %1521  ;;  %v1321_v48 = vmul.f32 %v4151_v32, %v1289_v49  ;;  %v1167_v34 = vadd.f32 %v5385_v56, %v5861_v16  ;;  %v8964_v32 = vld [vmem:[#allocation21_spill] sm:$0xff]  ;;  %v8965_v49 = vld [vmem:[#allocation16_spill] sm:$0xff] }
 0x38e   : > { %8960 = vst [vmem:[#allocation18_spill] sm:$0xff] %v5935_v19  ;;  %v5952_v52 = vpop.eup %4156  ;;  %v1322_v62 = vmul.f32 %v4153_v55, %v1290_v14  ;;  %vm1641_vm11 = vcmp.lt.s32.totalorder %v5933_v38, %v8964_v32  ;;  %vm1577_vm12 = vcmp.gt.f32.partialorder %v5874_v51, %v8965_v49  ;;  %v8966_v55 = vld [vmem:[#allocation93_spill] sm:$0xff]  ;;  %v5970_v14 = vsub.f32 %v1169_v46, %v5663_v11  ;;  %v8968_v38 = vld [vmem:[#allocation136_spill] sm:$0xff] }
 0x38f   : > { %8961 = vst [vmem:[#allocation47_spill] sm:$0xff] %v5941_v27  ;;  %2352 = vperm.xlu1 %4107, %v8962_v17   ;;  %v1737_v27 = vmul.f32 %v1443_v59, %v1443_v59  ;;  %v1353_v37 = vmul.f32 %v1321_v48, %v5836_v45  ;;  %v8967_v17 = vld [vmem:[#allocation6_spill] sm:$0xff]  ;;  %vm1609_vm13 = vcmp.eq.f32.partialorder %v5874_v51, %v8965_v49 }
 0x390   : > { %8963 = vst [vmem:[#allocation134_spill] sm:$0xff] %v5955_v15  ;;  %v1354_v3 = vmul.f32 %v1322_v62, %v5839_v30  ;;  %v5974_v16 = vsub.f32 %v1167_v34, %v8967_v17  ;;  %v5979_v45 = vmul.f32 %v5867_v4, %v1285_v50  ;;  %v1260_v59 = vmul.f32 %v5952_v52, %v5879_v22  ;;  %vm1673_vm15 = vmand %vm1609_vm13, %vm1641_vm11  ;;  %v8969_v30 = vld [vmem:[#allocation96_spill] sm:$0xff] }
 0x391   : > { %v5966_v6 = vpop.permute.xlu1 %2079  ;;  %2357 = vperm.xlu0 %4109, %v8966_v55   ;;  %v5984_v47 = vsub.f32 %v1170_v20, %v8968_v38  ;;  %v1385_v55 = vsub.f32 2.0, %v1353_v37  ;;  %v1291_v34 = vsub.f32 2.0, %v5945_v42  ;;  %vm1705_vm0 = vmor %vm1577_vm12, %vm1673_vm15  ;;  %v1173_v4 = vadd.f32 %v5385_v56, %v5923_v29  ;;  %v8972_v37 = vld [vmem:[#allocation7_spill] sm:$0xff] }
 0x392   : > { %v1386_v7 = vsub.f32 2.0, %v1354_v3  ;;  %4158 = vrcp.f32 %v5974_v16  ;;  %vm1635_vm1 = vcmp.lt.s32.totalorder %v5955_v15, %v8964_v32  ;;  %vm1603_vm2 = vcmp.eq.f32.partialorder %v5830_v0, %v8965_v49 }
 0x393   : > { %v5986_v46 = vpop.permute.xlu0 %1486  ;;  %2362 = vperm.xlu2 %4108, %v8969_v30   ;;  %v1417_v50 = vmul.f32 %v1385_v55, %v1321_v48  ;;  %v6000_v20 = vsel %vm1705_vm0, %v1737_v27, 0.0  ;;  %4160 = vrcp.f32 %v5970_v14  ;;  %v6006_v51 = vsub.f32 %v1173_v4, %v8972_v37  ;;  %v8974_v27 = vld [vmem:[#allocation99_spill] sm:$0xff]  ;;  %vm6022_vm7 = vmand %vm1603_vm2, %vm1635_vm1 }
 0x394   : > { %8970 = vst [vmem:[#allocation81_spill] sm:$0xff] %v6000_v20  ;;  %v1418_v3 = vmul.f32 %v1386_v7, %v1322_v62  ;;  %v6009_v30 = vadd.s32 56, %v8958_v18  ;;  %v1731_v48 = vmul.f32 %v5902_v33, %v5902_v33  ;;  %vm1571_vm5 = vcmp.gt.f32.partialorder %v5830_v0, %v8965_v49  ;;  %v8979_v33 = vld [vmem:[#allocation55_spill] sm:$0xff] }
 0x395   : > { %v6002_v42 = vpop.permute.xlu2 %1536  ;;  %v1449_v55 = vmul.f32 %v1417_v50, %v8942_v43  ;;  %vm1583_vm6 = vcmp.gt.f32.partialorder %v5935_v19, %v8965_v49  ;;  %4162 = vrcp.f32 %v6006_v51  ;;  %vm1615_vm11 = vcmp.eq.f32.partialorder %v5935_v19, %v8965_v49  ;;  %v8978_v43 = vld [vmem:[#allocation53_spill] sm:$0xff] }
 0x396   : > { %8971 = vst [vmem:[#allocation84_spill] sm:$0xff] %v6002_v42  ;;  %v6020_v62 = vmul.f32 %v1418_v3, %v8943_v41  ;;  %vm1647_vm8 = vcmp.lt.s32.totalorder %v6009_v30, %v8964_v32  ;;  %vm1574_vm12 = vcmp.gt.f32.partialorder %v8979_v33, %v8978_v43  ;;  %vm1606_vm13 = vcmp.eq.f32.partialorder %v8979_v33, %v8978_v43  ;;  %v9016_v33 = vld [vmem:[#allocation151_spill] sm:$0xff] }
 0x397   : > { %8973 = vst [vmem:[#allocation6_spill] sm:$0xff] %v6009_v30  ;;  %2367 = vperm.xlu1 %4107, %v8974_v27   ;;  %v1292_v41 = vsub.f32 2.0, %v1260_v59  ;;  %4164 = vrcp.f32 %v5984_v47  ;;  %v1175_v4 = vadd.f32 %v5385_v56, %v5762_v21  ;;  %v1743_v50 = vmul.f32 %v1449_v55, %v1449_v55  ;;  %vm1679_vm15 = vmand %vm1615_vm11, %vm1647_vm8  ;;  %v8981_v30 = vld [vmem:[#allocation102_spill] sm:$0xff]  ;;  %v8984_v55 = vld [vmem:[#allocation105_spill] sm:$0xff] }
 0x398   : > { %8975 = vst [vmem:[#allocation136_spill] sm:$0xff] %v6020_v62  ;;  %v4159_v15 = vpop.eup %4158  ;;  %v8982_v62 = vsub.f32 2.0, %v5909_v26  ;;  %v6048_v59 = vmul.f32 %v5979_v45, %v5813_v5  ;;  %vm1711_vm0 = vmor %vm1583_vm6, %vm1679_vm15  ;;  %vm1633_vm1 = vcmp.lt.s32.totalorder %v8958_v18, %v8964_v32  ;;  %vm1569_vm2 = vcmp.gt.f32.partialorder %v5986_v46, %v8965_v49 }
 0x399   : > { %v6038_v3 = vpop.permute.xlu1 %2084  ;;  %2372 = vperm.xlu0 %4109, %v8981_v30   ;;  %vm1699_vm8 = vmor %vm1571_vm5, %vm6022_vm7  ;;  %v6063_v5 = vsel %vm1711_vm0, %v1743_v50, 0.0  ;;  %vm1570_vm11 = vcmp.gt.f32.partialorder %v5986_v46, %v8978_v43  ;;  %vm1601_vm6 = vcmp.eq.f32.partialorder %v5986_v46, %v8965_v49  ;;  %v6075_v7 = vmul.f32 %v5926_v10, %v1291_v34  ;;  %v8997_v30 = vld [vmem:[#allocation69_spill] sm:$0xff] }
 0x39a   : > { %8980 = vst [vmem:[#allocation7_spill] sm:$0xff] %v6038_v3  ;;  %v6044_v20 = vmul.f32 %v5876_v2, %v8982_v62  ;;  %v1263_v2 = vmul.f32 %v4159_v15, %v5974_v16  ;;  %v6072_v62 = vpop.eup %4160  ;;  %v1176_v56 = vadd.f32 %v5387_v39, %v5762_v21  ;;  %vm1602_vm5 = vcmp.eq.f32.partialorder %v5986_v46, %v8978_v43  ;;  %vm1665_vm7 = vmand %vm1601_vm6, %vm1633_vm1  ;;  %v8994_v46 = vld [vmem:[#allocation66_spill] sm:$0xff]  ;;  %v9011_v39 = vld [vmem:[#allocation76_spill] sm:$0xff] }
 0x39b   : > { %8983 = vst [vmem:[#allocation55_spill] sm:$0xff] %v6063_v5  ;;  %v6069_v26 = vpop.permute.xlu0 %1501  ;;  %2377 = vperm.xlu2 %4108, %v8984_v55   ;;  %v6081_v50 = vsel %vm1699_vm8, %v1731_v48, 0.0  ;;  %v6084_v5 = vmul.f32 %v5952_v52, %v1292_v41  ;;  %v6087_v19 = vsub.f32 %v1175_v4, %v5704_v8  ;;  %vm1697_vm15 = vmor %vm1569_vm2, %vm1665_vm7  ;;  %v1730_v21 = vmul.f32 %v5777_v31, %v5777_v31  ;;  %v4163_v34 = vpop.eup %4162 }
 0x39c   : > { %8985 = vst [vmem:[#allocation152_spill] sm:$0xff] %v6081_v50  ;;  %v1295_v0 = vsub.f32 2.0, %v1263_v2  ;;  %v8987_v48 = vsub.f32 2.0, %v5889_v1  ;;  %v8988_v52 = vsub.f32 2.0, %v5899_v25  ;;  %vm1698_vm0 = vmor %vm1570_vm11, %vm1602_vm5  ;;  %v6106_v4 = vsel %vm1697_vm15, %v5795_v60, 0.0 }
 0x39d   : > { %v6094_v10 = vpop.permute.xlu2 %1551  ;;  %8989 = vst [vmem:[#allocation154_spill] sm:$0xff] %v6106_v4  ;;  %v6109_v31 = vadd.s32 80, %v8958_v18  ;;  %v6111_v2 = vpop.eup %4164  ;;  %v6115_v1 = vmul.f32 %v6044_v20, %v5819_v24  ;;  %v1269_v25 = vmul.f32 %v4163_v34, %v6006_v51  ;;  %v6124_v60 = vmul.f32 %v6075_v7, %v5855_v58  ;;  %vm6160_vm8 = vmor %vm1574_vm12, %vm1606_vm13 }
 0x39e   : > { %8986 = vst [vmem:[#allocation153_spill] sm:$0xff] %v6094_v10  ;;  %v1407_v50 = vmul.f32 %v8987_v48, %v5864_v63  ;;  %v1408_v41 = vmul.f32 %v8988_v52, %v5872_v54  ;;  %v1327_v63 = vmul.f32 %v4159_v15, %v1295_v0  ;;  %v6118_v54 = vsel %vm1698_vm0, %v1730_v21, 0.0  ;;  %v8992_v48 = vld [vmem:[#allocation108_spill] sm:$0xff] }
 0x39f   : > { %8990 = vst [vmem:[#allocation155_spill] sm:$0xff] %v6109_v31  ;;  %2382 = vperm.xlu1 %4107, %v8992_v48   ;;  %v1265_v52 = vmul.f32 %v6072_v62, %v5970_v14  ;;  %v6129_v4 = vsub.f32 %v1176_v56, %v5715_v57  ;;  %v6133_v0 = vmul.f32 %v6084_v5, %v5879_v22  ;;  %4166 = vrcp.f32 %v6087_v19 }
 0x3a0   : > { %8991 = vst [vmem:[#allocation156_spill] sm:$0xff] %v6118_v54  ;;  %v1359_v24 = vmul.f32 %v1327_v63, %v5974_v16  ;;  %v1301_v15 = vsub.f32 2.0, %v1269_v25  ;;  %v1266_v58 = vmul.f32 %v6111_v2, %v5984_v47  ;;  %vm1653_vm1 = vcmp.lt.s32.totalorder %v6109_v31, %v8964_v32  ;;  %v8996_v25 = vld [vmem:[#allocation128_spill] sm:$0xff] }
 0x3a1   : > { %v6137_v21 = vpop.permute.xlu1 %2089  ;;  %2419 = vperm.xlu0 %4109, %v8994_v46   ;;  %vm1621_vm2 = vcmp.eq.f32.partialorder %v6002_v42, %v8965_v49  ;;  %v6147_v56 = vadd.s32 24, %v8958_v18  ;;  %v1439_v16 = vmul.f32 %v1407_v50, %v5466_v40  ;;  %v1440_v48 = vmul.f32 %v1408_v41, %v8996_v25  ;;  %v9004_v31 = vld [vmem:[#allocation44_spill] sm:$0xff] }
 0x3a2   : > { %8993 = vst [vmem:[#allocation157_spill] sm:$0xff] %v6137_v21  ;;  %v1391_v22 = vsub.f32 2.0, %v1359_v24  ;;  %v1333_v54 = vmul.f32 %v4163_v34, %v1301_v15  ;;  %v1297_v24 = vsub.f32 2.0, %v1265_v52  ;;  %4168 = vrcp.f32 %v6129_v4  ;;  %vm6176_vm12 = vmand %vm1621_vm2, %vm1653_vm1 }
 0x3a3   : > { %8995 = vst [vmem:[#allocation66_spill] sm:$0xff] %v6147_v56  ;;  %v6151_v55 = vpop.permute.xlu0 %1516  ;;  %2424 = vperm.xlu2 %4108, %v8997_v30   ;;  %vm1639_vm11 = vcmp.lt.s32.totalorder %v6147_v56, %v8964_v32  ;;  %vm1575_vm6 = vcmp.gt.f32.partialorder %v6069_v26, %v8965_v49  ;;  %vm1576_vm13 = vcmp.gt.f32.partialorder %v6069_v26, %v8978_v43  ;;  %v1298_v41 = vsub.f32 2.0, %v1266_v58  ;;  %v9005_v56 = vld [vmem:[#allocation72_spill] sm:$0xff] }
 0x3a4   : > { %v1423_v40 = vmul.f32 %v1391_v22, %v1327_v63  ;;  %v1365_v50 = vmul.f32 %v1333_v54, %v6006_v51  ;;  %vm1607_vm5 = vcmp.eq.f32.partialorder %v6069_v26, %v8965_v49  ;;  %v9003_v51 = vld [vmem:[#allocation62_spill] sm:$0xff]  ;;  %vm1589_vm0 = vcmp.gt.f32.partialorder %v6002_v42, %v8965_v49 }
 0x3a5   : > { %v6184_v34 = vpop.permute.xlu2 %2024  ;;  %vm1612_vm15 = vcmp.eq.f32.partialorder %v9003_v51, %v8978_v43  ;;  %vm1608_vm1 = vcmp.eq.f32.partialorder %v6069_v26, %v8978_v43  ;;  %vm1671_vm2 = vmand %vm1607_vm5, %vm1639_vm11  ;;  %v1733_v63 = vmul.f32 %v1439_v16, %v1439_v16  ;;  %v6194_v52 = vpop.eup %4166  ;;  %v1734_v25 = vmul.f32 %v1440_v48, %v1440_v48 }
 0x3a6   : > { %9002 = vst [vmem:[#allocation128_spill] sm:$0xff] %v6184_v34  ;;  %v1455_v15 = vmul.f32 %v1423_v40, %v8967_v17  ;;  %v1397_v22 = vsub.f32 2.0, %v1365_v50  ;;  %vm1703_vm7 = vmor %vm1575_vm6, %vm1671_vm2  ;;  %v1735_v58 = vmul.f32 %v9004_v31, %v9004_v31  ;;  %v1382_v27 = vsub.f32 2.0, %v6115_v1  ;;  %v9006_v17 = vld [vmem:[#allocation144_spill] sm:$0xff] }
 0x3a7   : > { %2429 = vperm.xlu1 %4107, %v9005_v56   ;;  %v1387_v21 = vsub.f32 2.0, %v6124_v60  ;;  %vm1704_vm11 = vmor %vm1576_vm13, %vm1608_vm1  ;;  %v1736_v16 = vmul.f32 %v9006_v17, %v9006_v17  ;;  %v6212_v50 = vsel %vm5205_vm4, %v1733_v63, 0.0  ;;  %v6216_v31 = vsel %vm6160_vm8, %v1734_v25, 0.0  ;;  %v9017_v25 = vld [vmem:[#allocation135_spill] sm:$0xff] }
 0x3a8   : > { %9008 = vst [vmem:[#allocation69_spill] sm:$0xff] %v6212_v50  ;;  %v1749_v48 = vmul.f32 %v1455_v15, %v1455_v15  ;;  %v1429_v3 = vmul.f32 %v1397_v22, %v1333_v54  ;;  %v6218_v1 = vsel %vm1703_vm7, %v1735_v58, 0.0  ;;  %v6223_v26 = vpop.eup %4168  ;;  %v1388_v17 = vsub.f32 2.0, %v6133_v0  ;;  %vm1717_vm4 = vmor %vm1589_vm0, %vm6176_vm12  ;;  %v9015_v22 = vld [vmem:[#allocation79_spill] sm:$0xff] }
 0x3a9   : > { %9009 = vst [vmem:[#allocation62_spill] sm:$0xff] %v6216_v31  ;;  %v6220_v60 = vpop.permute.xlu1 %2094  ;;  %2434 = vperm.xlu0 %4109, %v9011_v39   ;;  %v6227_v40 = vmul.f32 %v6072_v62, %v1297_v24  ;;  %v1271_v54 = vmul.f32 %v6194_v52, %v6087_v19  ;;  %v6236_v29 = vsel %vm1704_vm11, %v1736_v16, 0.0  ;;  %v6239_v63 = vmul.f32 %v6111_v2, %v1298_v41 }
 0x3aa   : > { %9010 = vst [vmem:[#allocation44_spill] sm:$0xff] %v6218_v1  ;;  %v1461_v15 = vmul.f32 %v1429_v3, %v8972_v37  ;;  %v6242_v0 = vsel %vm1717_vm4, %v1749_v48, 0.0  ;;  %v6245_v62 = vadd.s32 104, %v8958_v18  ;;  %vm1586_vm8 = vcmp.gt.f32.partialorder %v9016_v33, %v8978_v43  ;;  %v9018_v37 = vld [vmem:[#allocation36_spill] sm:$0xff] }
 0x3ab   : > { %9012 = vst [vmem:[#allocation72_spill] sm:$0xff] %v6236_v29  ;;  %v6247_v24 = vpop.permute.xlu0 %1531  ;;  %2439 = vperm.xlu2 %4108, %v9015_v22   ;;  %vm1618_vm6 = vcmp.eq.f32.partialorder %v9016_v33, %v8978_v43  ;;  %v6256_v2 = vmul.f32 %v5870_v9, %v9017_v25  ;;  %v6260_v3 = vmul.f32 %v5916_v35, %v9018_v37  ;;  %v9019_v41 = vsub.f32 2.0, %v6048_v59 }
 0x3ac   : > { %9013 = vst [vmem:[#allocation144_spill] sm:$0xff] %v6242_v0  ;;  %v1414_v16 = vmul.f32 %v1382_v27, %v6044_v20  ;;  %v1395_v48 = vsub.f32 2.0, %v5920_v36  ;;  %v1755_v0 = vmul.f32 %v1461_v15, %v1461_v15  ;;  %vm1659_vm12 = vcmp.lt.s32.totalorder %v6245_v62, %v8964_v32 }
 0x3ad   : > { %9014 = vst [vmem:[#allocation27_spill] sm:$0xff] %v6245_v62  ;;  %v1413_v58 = vmul.f32 %v9019_v41, %v5979_v45  ;;  %vm1595_vm13 = vcmp.gt.f32.partialorder %v6094_v10, %v8965_v49  ;;  %v6271_v9 = vpop.permute.xlu2 %2146  ;;  %v1419_v25 = vmul.f32 %v1387_v21, %v6075_v7  ;;  %v1420_v37 = vmul.f32 %v1388_v17, %v6084_v5  ;;  %v9021_v7 = vld [vmem:[#allocation82_spill] sm:$0xff]  ;;  %v9022_v5 = vld [vmem:[#allocation133_spill] sm:$0xff]  ;;  %v9023_v17 = vld [vmem:[#allocation24_spill] sm:$0xff] }
 0x3ae   : > { %v1272_v45 = vmul.f32 %v6223_v26, %v6129_v4  ;;  %vm1627_vm5 = vcmp.eq.f32.partialorder %v6094_v10, %v8965_v49  ;;  %v1361_v36 = vmul.f32 %v6227_v40, %v5970_v14  ;;  %v6283_v20 = vmul.f32 %v6239_v63, %v5984_v47  ;;  %v9029_v41 = vld [vmem:[#allocation85_spill] sm:$0xff]  ;;  %v9032_v10 = vld [vmem:[#allocation139_spill] sm:$0xff] }
 0x3af   : > { %v1303_v27 = vsub.f32 2.0, %v1271_v54  ;;  %vm1691_vm7 = vmand %vm1627_vm5, %vm1659_vm12  ;;  %v6286_v59 = vadd.s32 48, %v8958_v18  ;;  %2444 = vperm.xlu1 %4107, %v9021_v7   ;;  %v1445_v21 = vmul.f32 %v1413_v58, %v9022_v5  ;;  %v1446_v15 = vmul.f32 %v1414_v16, %v9023_v17  ;;  %v9030_v5 = vld [vmem:[#allocation20_spill] sm:$0xff]  ;;  %v9031_v17 = vld [vmem:[#allocation119_spill] sm:$0xff] }
 0x3b0   : > { %vm1723_vm0 = vmor %vm1595_vm13, %vm1691_vm7  ;;  %vm1581_vm1 = vcmp.gt.f32.partialorder %v6151_v55, %v8965_v49  ;;  %vm1582_vm2 = vcmp.gt.f32.partialorder %v6151_v55, %v8978_v43  ;;  %vm9024_vm11 = vcmp.gt.f32.partialorder %v9003_v51, %v8978_v43  ;;  %vm1613_vm13 = vcmp.eq.f32.partialorder %v6151_v55, %v8965_v49 }
 0x3b1   : > { %9020 = vst [vmem:[#allocation76_spill] sm:$0xff] %v6286_v59  ;;  %vm6301_vm4 = vmor %vm9024_vm11, %vm1612_vm15  ;;  %v6305_v14 = vsel %vm1723_vm0, %v1755_v0, 0.0  ;;  %vm1645_vm12 = vcmp.lt.s32.totalorder %v6286_v59, %v8964_v32  ;;  %vm1614_vm5 = vcmp.eq.f32.partialorder %v6151_v55, %v8978_v43  ;;  %v6313_v54 = vpop.permute.xlu1 %2131  ;;  %2449 = vperm.xlu0 %4109, %v9029_v41   ;;  %v1304_v51 = vsub.f32 2.0, %v1272_v45 }
 0x3b2   : > { %9027 = vst [vmem:[#allocation79_spill] sm:$0xff] %v6305_v14  ;;  %vm1677_vm15 = vmand %vm1613_vm13, %vm1645_vm12  ;;  %v1739_v58 = vmul.f32 %v1445_v21, %v1445_v21  ;;  %v1740_v16 = vmul.f32 %v1446_v15, %v1446_v15  ;;  %v1741_v0 = vmul.f32 %v9030_v5, %v9030_v5  ;;  %v1454_v62 = vmul.f32 %v5895_v23, %v9031_v17  ;;  %v9033_v15 = vld [vmem:[#allocation88_spill] sm:$0xff] }
 0x3b3   : > { %9028 = vst [vmem:[#allocation151_spill] sm:$0xff] %v6313_v54  ;;  %v1396_v59 = vsub.f32 2.0, %v6260_v3  ;;  %v6322_v14 = vmul.f32 %v6194_v52, %v1303_v27  ;;  %vm1709_vm7 = vmor %vm1581_vm1, %vm1677_vm15  ;;  %v1742_v45 = vmul.f32 %v9032_v10, %v9032_v10  ;;  %v6329_v21 = vpop.permute.xlu0 %1546  ;;  %2454 = vperm.xlu2 %4108, %v9033_v15   ;;  %v1427_v5 = vmul.f32 %v1395_v48, %v5883_v53 }
 0x3b4   : > { %vm1710_vm0 = vmor %vm1582_vm2, %vm1614_vm5  ;;  %v6341_v52 = vsel %vm5245_vm9, %v1739_v58, 0.0  ;;  %v6345_v10 = vsel %vm6301_vm4, %v1740_v16, 0.0  ;;  %v6347_v3 = vsel %vm1709_vm7, %v1741_v0, 0.0  ;;  %v1393_v27 = vsub.f32 2.0, %v1361_v36  ;;  %v9040_v58 = vld [vmem:[#allocation54_spill] sm:$0xff]  ;;  %v9044_v16 = vld [vmem:[#allocation147_spill] sm:$0xff] }
 0x3b5   : > { %9035 = vst [vmem:[#allocation135_spill] sm:$0xff] %v6341_v52  ;;  %v1394_v53 = vsub.f32 2.0, %v6283_v20  ;;  %v6350_v48 = vsel %vm1710_vm0, %v1742_v45, 0.0  ;;  %v6353_v17 = vadd.s32 72, %v8958_v18  ;;  %v6355_v55 = vpop.permute.xlu2 %2161  ;;  %v6358_v23 = vmul.f32 %v6223_v26, %v1304_v51  ;;  %vm6370_vm1 = vmor %vm1586_vm8, %vm1618_vm6 }
 0x3b6   : > { %9036 = vst [vmem:[#allocation36_spill] sm:$0xff] %v6345_v10  ;;  %v1451_v42 = vmul.f32 %v1419_v25, %v9040_v58  ;;  %v1452_v47 = vmul.f32 %v1420_v37, %v8951_v28  ;;  %vm1587_vm9 = vcmp.gt.f32.partialorder %v6247_v24, %v8965_v49  ;;  %v1367_v26 = vmul.f32 %v6322_v14, %v6087_v19  ;;  %v9043_v28 = vld [vmem:[#allocation91_spill] sm:$0xff]  ;;  %v9046_v58 = vld [vmem:[#allocation94_spill] sm:$0xff] }
 0x3b7   : > { %9037 = vst [vmem:[#allocation82_spill] sm:$0xff] %v6347_v3  ;;  %vm1651_vm2 = vcmp.lt.s32.totalorder %v6353_v17, %v8964_v32  ;;  %vm1588_vm11 = vcmp.gt.f32.partialorder %v6247_v24, %v8978_v43  ;;  %vm1619_vm4 = vcmp.eq.f32.partialorder %v6247_v24, %v8965_v49  ;;  %2459 = vperm.xlu1 %4107, %v9043_v28  }
 0x3b8   : > { %9038 = vst [vmem:[#allocation133_spill] sm:$0xff] %v6350_v48  ;;  %vm1620_vm8 = vcmp.eq.f32.partialorder %v6247_v24, %v8978_v43  ;;  %vm1683_vm6 = vmand %vm1619_vm4, %vm1651_vm2  ;;  %v1745_v33 = vmul.f32 %v1451_v42, %v1451_v42  ;;  %v1746_v25 = vmul.f32 %v1452_v47, %v1452_v47  ;;  %v1747_v19 = vmul.f32 %v6256_v2, %v6256_v2 }
 0x3b9   : > { %9039 = vst [vmem:[#allocation24_spill] sm:$0xff] %v6353_v17  ;;  %v1428_v37 = vmul.f32 %v1396_v59, %v5916_v35  ;;  %v1425_v20 = vmul.f32 %v1393_v27, %v6227_v40  ;;  %vm1715_vm12 = vmor %vm1587_vm9, %vm1683_vm6  ;;  %v1748_v51 = vmul.f32 %v1454_v62, %v1454_v62  ;;  %v2215_v0 = vmax.f32 %v6271_v9, %v9044_v16  ;;  %v6391_v45 = vpop.permute.xlu1 %2136  ;;  %v9051_v62 = vld [vmem:[#allocation116_spill] sm:$0xff] }
 0x3ba   : > { %9045 = vst [vmem:[#allocation85_spill] sm:$0xff] %v6391_v45  ;;  %2464 = vperm.xlu0 %4109, %v9046_v58   ;;  %vm1716_vm13 = vmor %vm1588_vm11, %vm1620_vm8  ;;  %v6399_v2 = vsel %vm5287_vm14, %v1745_v33, 0.0  ;;  %v6403_v35 = vsel %vm6370_vm1, %v1746_v25, 0.0  ;;  %v6405_v40 = vsel %vm1715_vm12, %v1747_v19, 0.0  ;;  %v2216_v59 = vmax.f32 %v6271_v9, %v9051_v62  ;;  %v9053_v17 = vld [vmem:[#allocation120_spill] sm:$0xff]  ;;  %v9056_v25 = vld [vmem:[#allocation97_spill] sm:$0xff] }
 0x3bb   : > { %9048 = vst [vmem:[#allocation20_spill] sm:$0xff] %v6399_v2  ;;  %v1426_v27 = vmul.f32 %v1394_v53, %v6239_v63  ;;  %v1368_v47 = vmul.f32 %v6358_v23, %v6129_v4  ;;  %v6412_v24 = vsel %vm1716_vm13, %v1748_v51, 0.0  ;;  %v9054_v33 = vmin.f32 %v9053_v17, %v5023_v12  ;;  %v6419_v36 = vpop.permute.xlu0 %1561  ;;  %2469 = vperm.xlu2 %4108, %v9056_v25   ;;  %v9060_v53 = vld [vmem:[#allocation11_spill] sm:$0xff] }
 0x3bc   : > { %9049 = vst [vmem:[#allocation119_spill] sm:$0xff] %v6403_v35  ;;  %v1399_v19 = vsub.f32 2.0, %v1367_v26  ;;  %v9057_v9 = vmin.f32 %v9053_v17, %v4770_v44  ;;  %v2210_v4 = vmax.f32 %v6313_v54, %v9051_v62  ;;  %v6430_v63 = vadd.s32 96, %v8958_v18  ;;  %v9061_v51 = vld [vmem:[#allocation131_spill] sm:$0xff]  ;;  %v9062_v17 = vld [vmem:[#allocation22_spill] sm:$0xff] }
 0x3bd   : > { %9050 = vst [vmem:[#allocation139_spill] sm:$0xff] %v6405_v40  ;;  %v6417_v42 = vsub.f32 %v9054_v33, %v2215_v0  ;;  %vm1592_vm14 = vcmp.gt.f32.partialorder %v9060_v53, %v8978_v43  ;;  %vm1624_vm5 = vcmp.eq.f32.partialorder %v9060_v53, %v8978_v43  ;;  %v1459_v0 = vmul.f32 %v1427_v5, %v9061_v51  ;;  %v6438_v33 = vpop.permute.xlu2 %2176  ;;  %v9066_v54 = vld [vmem:[#allocation63_spill] sm:$0xff] }
 0x3be   : > { %9052 = vst [vmem:[#allocation88_spill] sm:$0xff] %v6412_v24  ;;  %v6425_v40 = vsub.f32 %v9057_v9, %v2216_v59  ;;  %v1457_v26 = vmul.f32 %v1425_v20, %v5663_v11  ;;  %v1460_v59 = vmul.f32 %v1428_v37, %v9062_v17  ;;  %v9063_v9 = vld [vmem:[#allocation19_spill] sm:$0xff]  ;;  %vm1657_vm15 = vcmp.lt.s32.totalorder %v6430_v63, %v8964_v32  ;;  %v9067_v11 = vld [vmem:[#allocation100_spill] sm:$0xff]  ;;  %vm6454_vm0 = vmor %vm1592_vm14, %vm1624_vm5 }
 0x3bf   : > { %9055 = vst [vmem:[#allocation8_spill] sm:$0xff] %v6417_v42  ;;  %v2641_v24 = vsub.f32 %v9066_v54, %v8994_v46  ;;  %v1458_v53 = vmul.f32 %v1426_v27, %v8968_v38  ;;  %vm1593_vm7 = vcmp.gt.f32.partialorder %v6329_v21, %v8965_v49  ;;  %2474 = vperm.xlu1 %4107, %v9067_v11   ;;  %v1400_v37 = vsub.f32 2.0, %v1368_v47  ;;  %v9070_v27 = vld [vmem:[#allocation103_spill] sm:$0xff] }
 0x3c0   : > { %9058 = vst [vmem:[#allocation54_spill] sm:$0xff] %v6425_v40  ;;  %v9064_v40 = vmin.f32 %v9063_v9, %v4770_v44  ;;  %v1431_v20 = vmul.f32 %v1399_v19, %v6322_v14  ;;  %vm1594_vm9 = vcmp.gt.f32.partialorder %v6329_v21, %v8978_v43  ;;  %vm1625_vm1 = vcmp.eq.f32.partialorder %v6329_v21, %v8965_v49 }
 0x3c1   : > { %9059 = vst [vmem:[#allocation91_spill] sm:$0xff] %v6430_v63  ;;  %vm1626_vm2 = vcmp.eq.f32.partialorder %v6329_v21, %v8978_v43  ;;  %vm1689_vm11 = vmand %vm1625_vm1, %vm1657_vm15  ;;  %v1751_v38 = vmul.f32 %v1457_v26, %v1457_v26  ;;  %v1752_v46 = vmul.f32 %v1458_v53, %v1458_v53  ;;  %v1753_v54 = vmul.f32 %v1459_v0, %v1459_v0  ;;  %v9075_v53 = vld [vmem:[#allocation106_spill] sm:$0xff] }
 0x3c2   : > { %v6444_v42 = vsub.f32 %v9064_v40, %v2210_v4  ;;  %v6465_v40 = vpop.permute.xlu1 %2141  ;;  %2479 = vperm.xlu0 %4109, %v9070_v27   ;;  %v2100_v14 = vmin.f32 %v6184_v34, %v4770_v44  ;;  %vm1721_vm4 = vmor %vm1593_vm7, %vm1689_vm11  ;;  %v1754_v47 = vmul.f32 %v1460_v59, %v1460_v59  ;;  %v2221_v19 = vmax.f32 %v6355_v55, %v9044_v16  ;;  %v9081_v34 = vld [vmem:[#allocation64_spill] sm:$0xff] }
 0x3c3   : > { %v2222_v4 = vmax.f32 %v6355_v55, %v9051_v62  ;;  %vm1722_vm8 = vmor %vm1594_vm9, %vm1626_vm2  ;;  %v6479_v0 = vsel %vm5328_vm3, %v1751_v38, 0.0  ;;  %v6483_v26 = vsel %vm6454_vm0, %v1752_v46, 0.0  ;;  %v6485_v17 = vsel %vm1721_vm4, %v1753_v54, 0.0  ;;  %v6489_v59 = vpop.permute.xlu0 %2029  ;;  %2484 = vperm.xlu2 %4108, %v9075_v53   ;;  %v9076_v55 = vld [vmem:[#allocation65_spill] sm:$0xff]  ;;  %v9080_v54 = vld [vmem:[#allocation31_spill] sm:$0xff] }
 0x3c4   : > { %9065 = vst [vmem:[#allocation147_spill] sm:$0xff] %v6444_v42  ;;  %v2212_v21 = vmax.f32 %v6391_v45, %v9051_v62  ;;  %v2642_v63 = vsub.f32 %v9076_v55, %v8997_v30  ;;  %v1432_v51 = vmul.f32 %v1400_v37, %v6358_v23  ;;  %v6495_v38 = vsel %vm1722_vm8, %v1754_v47, 0.0  ;;  %v9078_v42 = vld [vmem:[#allocation9_spill] sm:$0xff]  ;;  %v9084_v37 = vld [vmem:[#allocation32_spill] sm:$0xff]  ;;  %v9085_v47 = vld [vmem:[#allocation67_spill] sm:$0xff] }
 0x3c5   : > { %9072 = vst [vmem:[#allocation94_spill] sm:$0xff] %v6479_v0  ;;  %v9079_v5 = vmin.f32 %v9078_v42, %v5023_v12  ;;  %v9082_v45 = vmin.f32 %v9078_v42, %v4770_v44  ;;  %v6512_v30 = vadd.s32 120, %v8958_v18  ;;  %v2192_v23 = vpop.permute.xlu2 %2191  ;;  %v2626_v55 = vsub.f32 %v9085_v47, %v9084_v37  ;;  %v9094_v47 = vld [vmem:[#allocation68_spill] sm:$0xff] }
 0x3c6   : > { %9073 = vst [vmem:[#allocation10_spill] sm:$0xff] %v6483_v26  ;;  %v6509_v26 = vsub.f32 %v2100_v14, %v2212_v21  ;;  %vm1599_vm13 = vcmp.gt.f32.partialorder %v6419_v36, %v8965_v49  ;;  %vm1600_vm5 = vcmp.gt.f32.partialorder %v6419_v36, %v8978_v43  ;;  %vm1631_vm15 = vcmp.eq.f32.partialorder %v6419_v36, %v8965_v49 }
 0x3c7   : > { %9074 = vst [vmem:[#allocation116_spill] sm:$0xff] %v6485_v17  ;;  %v6500_v46 = vsub.f32 %v9079_v5, %v2221_v19  ;;  %v2625_v17 = vsub.f32 %v9081_v34, %v9080_v54  ;;  %v6507_v9 = vsub.f32 %v9082_v45, %v2222_v4  ;;  %v9086_v19 = vld [vmem:[#allocation118_spill] sm:$0xff]  ;;  %v1463_v34 = vmul.f32 %v1431_v20, %v5704_v8  ;;  %v9087_v45 = vld [vmem:[#allocation109_spill] sm:$0xff]  ;;  %v9093_v5 = vld [vmem:[#allocation12_spill] sm:$0xff] }
 0x3c8   : > { %9077 = vst [vmem:[#allocation120_spill] sm:$0xff] %v6495_v38  ;;  %vm1598_vm3 = vcmp.gt.f32.partialorder %v9086_v19, %v8978_v43  ;;  %vm1630_vm6 = vcmp.eq.f32.partialorder %v9086_v19, %v8978_v43  ;;  %vm1663_vm12 = vcmp.lt.s32.totalorder %v6512_v30, %v8964_v32  ;;  %2489 = vperm.xlu1 %4107, %v9087_v45   ;;  %v9092_v20 = vld [vmem:[#allocation70_spill] sm:$0xff] }
 0x3c9   : > { %9083 = vst [vmem:[#allocation97_spill] sm:$0xff] %v6512_v30  ;;  %v2657_v42 = vmul.f32 %v2641_v24, %v2625_v17  ;;  %v2658_v14 = vmul.f32 %v2642_v63, %v2626_v55  ;;  %v1464_v4 = vmul.f32 %v1432_v51, %v5715_v57  ;;  %vm6527_vm14 = vmor %vm1598_vm3, %vm1630_vm6  ;;  %vm1632_vm7 = vcmp.eq.f32.partialorder %v6419_v36, %v8978_v43  ;;  %v9090_v57 = vld [vmem:[#allocation111_spill] sm:$0xff]  ;;  %v9091_v63 = vld [vmem:[#allocation33_spill] sm:$0xff] }
 0x3ca   : > { %v1757_v8 = vmul.f32 %v1463_v34, %v1463_v34  ;;  %v6537_v24 = vpop.permute.xlu1 %2151  ;;  %2494 = vperm.xlu0 %4109, %v9090_v57   ;;  %v2627_v17 = vsub.f32 %v9092_v20, %v9091_v63  ;;  %vm1695_vm0 = vmand %vm1631_vm15, %vm1663_vm12  ;;  %v1759_v54 = vmul.f32 %v9093_v5, %v9093_v5  ;;  %v2227_v37 = vmax.f32 %v6438_v33, %v9044_v16  ;;  %v9095_v19 = vld [vmem:[#allocation46_spill] sm:$0xff]  ;;  %v9098_v20 = vld [vmem:[#allocation71_spill] sm:$0xff] }
 0x3cb   : > { %v1758_v51 = vmul.f32 %v1464_v4, %v1464_v4  ;;  %v2643_v55 = vsub.f32 %v9094_v47, %v9005_v56  ;;  %vm1727_vm9 = vmor %vm1599_vm13, %vm1695_vm0  ;;  %v1760_v34 = vmul.f32 %v9095_v19, %v9095_v19  ;;  %v2228_v4 = vmax.f32 %v6438_v33, %v9051_v62  ;;  %v2157_v63 = vpop.permute.xlu0 %2156  ;;  %2675 = vperm.xlu2 %4108, %v2657_v42  }
 0x3cc   : > { %v6552_v18 = vsel %vm5376_vm10, %v1757_v8, 0.0  ;;  %v2644_v5 = vsub.f32 %v9098_v20, %v9011_v39  ;;  %vm1728_vm1 = vmor %vm1600_vm5, %vm1632_vm7  ;;  %v6568_v30 = vsel %vm1727_vm9, %v1759_v54, 0.0  ;;  %v9101_v8 = vld [vmem:[#allocation137_spill] sm:$0xff]  ;;  %v9104_v39 = vld [vmem:[#allocation75_spill] sm:$0xff]  ;;  %v2121_v54 = vmin.f32 %v5966_v6, %v5023_v12 }
 0x3cd   : > { %9097 = vst [vmem:[#allocation11_spill] sm:$0xff] %v6552_v18  ;;  %v6566_v56 = vsel %vm6527_vm14, %v1758_v51, 0.0  ;;  %v9102_v33 = vmin.f32 %v9101_v8, %v5023_v12  ;;  %v2645_v47 = vsub.f32 %v9104_v39, %v9015_v22  ;;  %v6577_v19 = vsel %vm1728_vm1, %v1760_v34, 0.0  ;;  %v2207_v51 = vpop.permute.xlu2 %2206  ;;  %v9108_v39 = vld [vmem:[#allocation35_spill] sm:$0xff] }
 0x3ce   : > { %9099 = vst [vmem:[#allocation131_spill] sm:$0xff] %v6566_v56  ;;  %v9106_v36 = vmin.f32 %v9101_v8, %v4770_v44  ;;  %v2102_v22 = vmin.f32 %v6489_v59, %v4770_v44  ;;  %v2233_v34 = vmax.f32 %v2192_v23, %v9044_v16  ;;  %v9109_v8 = vld [vmem:[#allocation73_spill] sm:$0xff]  ;;  %v2234_v21 = vmax.f32 %v2192_v23, %v9051_v62 }
 0x3cf   : > { %9100 = vst [vmem:[#allocation22_spill] sm:$0xff] %v6568_v30  ;;  %v6573_v42 = vsub.f32 %v9102_v33, %v2227_v37  ;;  %v2214_v37 = vmax.f32 %v6465_v40, %v9051_v62  ;;  %v2659_v33 = vmul.f32 %v2643_v55, %v2627_v17  ;;  %v9111_v30 = vld [vmem:[#allocation74_spill] sm:$0xff]  ;;  %v2218_v17 = vmax.f32 %v6537_v24, %v9051_v62 }
 0x3d0   : > { %9105 = vst [vmem:[#allocation100_spill] sm:$0xff] %v6577_v19  ;;  %v6582_v20 = vsub.f32 %v9106_v36, %v2228_v4  ;;  %v2628_v4 = vsub.f32 %v9109_v8, %v9108_v39  ;;  %v2122_v36 = vmin.f32 %v5966_v6, %v4770_v44  ;;  %2680 = vperm.xlu1 %4107, %v2658_v14   ;;  %v9110_v19 = vld [vmem:[#allocation37_spill] sm:$0xff]  ;;  %v9112_v6 = vld [vmem:[#allocation38_spill] sm:$0xff] }
 0x3d1   : > { %9103 = vst [vmem:[#allocation63_spill] sm:$0xff] %v6573_v42  ;;  %v2629_v49 = vsub.f32 %v9111_v30, %v9110_v19  ;;  %v6600_v32 = vsub.f32 %v2102_v22, %v2214_v37  ;;  %v9113_v8 = vld [vmem:[#allocation77_spill] sm:$0xff]  ;;  %v9114_v14 = vld [vmem:[#allocation78_spill] sm:$0xff]  ;;  %v2219_v30 = vmax.f32 %v2157_v63, %v9044_v16  ;;  %v2127_v19 = vmin.f32 %v6220_v60, %v5023_v12 }
 0x3d2   : > { %9107 = vst [vmem:[#allocation103_spill] sm:$0xff] %v6582_v20  ;;  %v6602_v20 = vsub.f32 %v2121_v54, %v2233_v34  ;;  %v2660_v42 = vmul.f32 %v2644_v5, %v2628_v4  ;;  %v6604_v56 = vsub.f32 %v2122_v36, %v2234_v21  ;;  %v2167_v55 = vpop.permute.xlu1 %2166  ;;  %2685 = vperm.xlu0 %4109, %v2659_v33   ;;  %v9115_v5 = vld [vmem:[#allocation132_spill] sm:$0xff] }
 0x3d3   : > { %v2661_v39 = vmul.f32 %v2645_v47, %v2629_v49  ;;  %v2630_v23 = vsub.f32 %v9113_v8, %v9112_v6  ;;  %v2646_v18 = vsub.f32 %v9114_v14, %v9021_v7  ;;  %v9116_v21 = vmin.f32 %v9115_v5, %v4770_v44  ;;  %v2172_v47 = vpop.permute.xlu0 %2171  ;;  %v9117_v7 = vld [vmem:[#allocation29_spill] sm:$0xff] }
 0x3d4   : > { %v2220_v37 = vmax.f32 %v2157_v63, %v9051_v62  ;;  %v2239_v49 = vmax.f32 %v2207_v51, %v9044_v16  ;;  %2690 = vperm.xlu2 %4108, %v2660_v42   ;;  %v2128_v22 = vmin.f32 %v6220_v60, %v4770_v44  ;;  %v9118_v34 = vmin.f32 %v9117_v7, %v5023_v12 }
 0x3d5   : > { %v6618_v54 = vsub.f32 %v9116_v21, %v2218_v17  ;;  %v2240_v4 = vmax.f32 %v2207_v51, %v9051_v62  ;;  %v2223_v36 = vmax.f32 %v2167_v55, %v9044_v16  ;;  %v2647_v17 = vsub.f32 %v8952_v61, %v9029_v41  ;;  %v6641_v8 = vpop.permute.xlu2 %2317 }
 0x3d6   : > { %v6627_v33 = vsub.f32 %v9118_v34, %v2219_v30  ;;  %v9120_v63 = vmin.f32 %v9117_v7, %v4770_v44  ;;  %v6638_v42 = vsub.f32 %v2127_v19, %v2239_v49  ;;  %v2224_v60 = vmax.f32 %v2167_v55, %v9051_v62  ;;  %v9124_v30 = vld [vmem:[#allocation51_spill] sm:$0xff]  ;;  %v9127_v34 = vld [vmem:[#allocation40_spill] sm:$0xff] }
 0x3d7   : > { %v6643_v14 = vsub.f32 %v2128_v22, %v2240_v4  ;;  %v9125_v51 = vmin.f32 %v9124_v30, %v5023_v12  ;;  %v2225_v61 = vmax.f32 %v2172_v47, %v9044_v16  ;;  %v2662_v41 = vmul.f32 %v2646_v18, %v2630_v23  ;;  %v9128_v7 = vld [vmem:[#allocation80_spill] sm:$0xff] }
 0x3d8   : > { %9119 = vst [vmem:[#allocation122_spill] sm:$0xff] %v6627_v33  ;;  %v6636_v6 = vsub.f32 %v9120_v63, %v2220_v37  ;;  %v2631_v37 = vsub.f32 %v9128_v7, %v9127_v34  ;;  %v9129_v19 = vmin.f32 %v9124_v30, %v4770_v44  ;;  %v2226_v55 = vmax.f32 %v2172_v47, %v9051_v62  ;;  %v9131_v22 = vld [vmem:[#allocation28_spill] sm:$0xff]  ;;  %v9137_v34 = vld [vmem:[#allocation149_spill] sm:$0xff] }
 0x3d9   : > { %9122 = vst [vmem:[#allocation65_spill] sm:$0xff] %v6638_v42  ;;  %v6648_v21 = vsub.f32 %v9125_v51, %v2223_v36  ;;  %2695 = vperm.xlu1 %4107, %v2661_v39   ;;  %v9132_v4 = vmin.f32 %v9131_v22, %v5023_v12  ;;  %v9134_v36 = vld [vmem:[#allocation148_spill] sm:$0xff]  ;;  %v2648_v23 = vsub.f32 %v8954_v13, %v9033_v15  ;;  %v9141_v15 = vld [vmem:[#allocation123_spill] sm:$0xff] }
 0x3da   : > { %9121 = vst [vmem:[#allocation106_spill] sm:$0xff] %v6636_v6  ;;  %v6656_v49 = vsub.f32 %v9129_v19, %v2224_v60  ;;  %v2663_v18 = vmul.f32 %v2647_v17, %v2631_v37  ;;  %v9135_v30 = vmin.f32 %v9131_v22, %v4770_v44  ;;  %v2182_v47 = vpop.permute.xlu1 %2181  ;;  %2700 = vperm.xlu0 %4109, %v2662_v41   ;;  %v9138_v19 = vld [vmem:[#allocation42_spill] sm:$0xff]  ;;  %v9140_v37 = vld [vmem:[#allocation87_spill] sm:$0xff]  ;;  %v9142_v39 = vld [vmem:[#allocation140_spill] sm:$0xff] }
 0x3db   : > { %9123 = vst [vmem:[#allocation9_spill] sm:$0xff] %v6643_v14  ;;  %v6662_v63 = vsub.f32 %v9132_v4, %v2225_v61  ;;  %v2229_v61 = vmax.f32 %v2182_v47, %v9044_v16  ;;  %v2230_v7 = vmax.f32 %v2182_v47, %v9051_v62  ;;  %v9139_v4 = vld [vmem:[#allocation83_spill] sm:$0xff]  ;;  %v2649_v13 = vsub.f32 %v9140_v37, %v9043_v28  ;;  %v9151_v14 = vld [vmem:[#allocation126_spill] sm:$0xff] }
 0x3dc   : > { %9126 = vst [vmem:[#allocation31_spill] sm:$0xff] %v6648_v21  ;;  %v6671_v60 = vsub.f32 %v9135_v30, %v2226_v55  ;;  %v2632_v17 = vsub.f32 %v9139_v4, %v9138_v19  ;;  %v2119_v22 = vmin.f32 %v9141_v15, %v5023_v12  ;;  %v2120_v55 = vmin.f32 %v9141_v15, %v4770_v44  ;;  %v2187_v30 = vpop.permute.xlu0 %2186  ;;  %v9150_v21 = vld [vmem:[#allocation61_spill] sm:$0xff] }
 0x3dd   : > { %9130 = vst [vmem:[#allocation64_spill] sm:$0xff] %v6656_v49  ;;  %2705 = vperm.xlu2 %4108, %v2663_v18   ;;  %v9143_v41 = vmin.f32 %v9142_v39, %v5023_v12  ;;  %v9145_v47 = vmin.f32 %v9142_v39, %v4770_v44  ;;  %v2231_v28 = vmax.f32 %v2187_v30, %v9044_v16  ;;  %v9149_v18 = vld [vmem:[#allocation90_spill] sm:$0xff] }
 0x3de   : > { %9133 = vst [vmem:[#allocation32_spill] sm:$0xff] %v6662_v63  ;;  %v2232_v4 = vmax.f32 %v2187_v30, %v9051_v62  ;;  %v2664_v37 = vmul.f32 %v2648_v23, %v2632_v17  ;;  %v9148_v63 = vld [vmem:[#allocation86_spill] sm:$0xff]  ;;  %v2650_v49 = vsub.f32 %v9149_v18, %v9046_v58  ;;  %v9157_v17 = vld [vmem:[#allocation23_spill] sm:$0xff] }
 0x3df   : > { %9136 = vst [vmem:[#allocation67_spill] sm:$0xff] %v6671_v60  ;;  %v6688_v51 = vsub.f32 %v9143_v41, %v2229_v61  ;;  %v6693_v19 = vsub.f32 %v9145_v47, %v2230_v7  ;;  %v9147_v60 = vld [vmem:[#allocation43_spill] sm:$0xff]  ;;  %v1168_v61 = vadd.f32 %v9151_v14, %v9150_v21  ;;  %v6703_v41 = vpop.permute.xlu2 %2332  ;;  %v9154_v47 = vld [vmem:[#allocation45_spill] sm:$0xff] }
 0x3e0   : > { %v2633_v15 = vsub.f32 %v9148_v63, %v9147_v60  ;;  %v6707_v39 = vsub.f32 %v2120_v55, %v2232_v4  ;;  %v9156_v21 = vld [vmem:[#allocation93_spill] sm:$0xff] }
 0x3e1   : > { %9144 = vst [vmem:[#allocation118_spill] sm:$0xff] %v6688_v51  ;;  %v6705_v51 = vsub.f32 %v2119_v22, %v2231_v28  ;;  %2710 = vperm.xlu1 %4107, %v2664_v37   ;;  %v2651_v60 = vsub.f32 %v9156_v21, %v9056_v25  ;;  %v6718_v22 = vsub.f32 %v1168_v61, %v9157_v17  ;;  %v9159_v37 = vld [vmem:[#allocation48_spill] sm:$0xff]  ;;  %v9162_v61 = vld [vmem:[#allocation157_spill] sm:$0xff] }
 0x3e2   : > { %9146 = vst [vmem:[#allocation109_spill] sm:$0xff] %v6693_v19  ;;  %v2665_v7 = vmul.f32 %v2649_v13, %v2633_v15  ;;  %v9155_v19 = vld [vmem:[#allocation89_spill] sm:$0xff]  ;;  %v2197_v55 = vpop.permute.xlu1 %2196  ;;  %v9158_v13 = vld [vmem:[#allocation7_spill] sm:$0xff]  ;;  %v9161_v25 = vld [vmem:[#allocation96_spill] sm:$0xff] }
 0x3e3   : > { %9152 = vst [vmem:[#allocation111_spill] sm:$0xff] %v6705_v51  ;;  %v2634_v30 = vsub.f32 %v9155_v19, %v9154_v47  ;;  %v2123_v28 = vmin.f32 %v9158_v13, %v5023_v12  ;;  %v2124_v19 = vmin.f32 %v9158_v13, %v4770_v44  ;;  %v2235_v4 = vmax.f32 %v2197_v55, %v9044_v16 }
 0x3e4   : > { %9153 = vst [vmem:[#allocation33_spill] sm:$0xff] %v6707_v39  ;;  %2715 = vperm.xlu0 %4109, %v2665_v7   ;;  %v2236_v15 = vmax.f32 %v2197_v55, %v9051_v62  ;;  %v2652_v47 = vsub.f32 %v9161_v25, %v9067_v11  ;;  %v2126_v7 = vmin.f32 %v9162_v61, %v4770_v44  ;;  %v2202_v21 = vpop.permute.xlu0 %2201  ;;  %v9166_v39 = vld [vmem:[#allocation95_spill] sm:$0xff]  ;;  %4170 = vrcp.f32 %v6718_v22 }
 0x3e5   : > { %v2666_v58 = vmul.f32 %v2650_v49, %v2634_v30  ;;  %v9160_v49 = vld [vmem:[#allocation92_spill] sm:$0xff]  ;;  %v2125_v30 = vmin.f32 %v9162_v61, %v5023_v12  ;;  %v6734_v63 = vsub.f32 %v2123_v28, %v2235_v4  ;;  %v2237_v55 = vmax.f32 %v2202_v21, %v9044_v16  ;;  %v9167_v25 = vld [vmem:[#allocation99_spill] sm:$0xff] }
 0x3e6   : > { %v2635_v18 = vsub.f32 %v9160_v49, %v9159_v37  ;;  %v6736_v13 = vsub.f32 %v2124_v19, %v2236_v15  ;;  %v2238_v23 = vmax.f32 %v2202_v21, %v9051_v62  ;;  %v9165_v49 = vld [vmem:[#allocation49_spill] sm:$0xff]  ;;  %v2653_v51 = vsub.f32 %v9167_v25, %v9070_v27  ;;  %v9172_v62 = vld [vmem:[#allocation52_spill] sm:$0xff]  ;;  %v9174_v21 = vld [vmem:[#allocation102_spill] sm:$0xff] }
 0x3e7   : > { %2720 = vperm.xlu2 %4108, %v2666_v58   ;;  %9163 = vst [vmem:[#allocation70_spill] sm:$0xff] %v6734_v63  ;;  %v2636_v11 = vsub.f32 %v9166_v39, %v9165_v49  ;;  %v6745_v44 = vpop.permute.xlu2 %2347  ;;  %v9169_v58 = vld [vmem:[#allocation114_spill] sm:$0xff]  ;;  %v6749_v19 = vsub.f32 %v2125_v30, %v2237_v55  ;;  %v2654_v49 = vsub.f32 %v9174_v21, %v9075_v53  ;;  %v9179_v53 = vld [vmem:[#allocation13_spill] sm:$0xff] }
 0x3e8   : > { %9164 = vst [vmem:[#allocation12_spill] sm:$0xff] %v6736_v13  ;;  %v2667_v37 = vmul.f32 %v2651_v60, %v2635_v18  ;;  %v1174_v28 = vadd.f32 %v9151_v14, %v9169_v58  ;;  %v6751_v4 = vsub.f32 %v2126_v7, %v2238_v23  ;;  %v9173_v60 = vld [vmem:[#allocation98_spill] sm:$0xff]  ;;  %v9177_v58 = vld [vmem:[#allocation101_spill] sm:$0xff] }
 0x3e9   : > { %9168 = vst [vmem:[#allocation68_spill] sm:$0xff] %v6745_v44  ;;  %v2668_v15 = vmul.f32 %v2652_v47, %v2636_v11  ;;  %v2637_v18 = vsub.f32 %v9173_v60, %v9172_v62  ;;  %v9175_v23 = vld [vmem:[#allocation30_spill] sm:$0xff]  ;;  %v9176_v11 = vld [vmem:[#allocation56_spill] sm:$0xff]  ;;  %v1732_v60 = vmul.f32 %v9179_v53, %v9179_v53 }
 0x3ea   : > { %9170 = vst [vmem:[#allocation46_spill] sm:$0xff] %v6749_v19  ;;  %2725 = vperm.xlu1 %4107, %v2667_v37   ;;  %v6761_v25 = vpop.permute.xlu1 %2307  ;;  %v6764_v30 = vsub.f32 %v1174_v28, %v9175_v23  ;;  %v4171_v55 = vpop.eup %4170  ;;  %v2638_v37 = vsub.f32 %v9177_v58, %v9176_v11  ;;  %v9180_v28 = vld [vmem:[#allocation142_spill] sm:$0xff]  ;;  %v9182_v58 = vld [vmem:[#allocation104_spill] sm:$0xff] }
 0x3eb   : > { %9171 = vst [vmem:[#allocation17_spill] sm:$0xff] %v6751_v4  ;;  %v2669_v61 = vmul.f32 %v2653_v51, %v2637_v18  ;;  %v9178_v51 = vld [vmem:[#allocation105_spill] sm:$0xff]  ;;  %vm1572_vm10 = vcmp.gt.f32.partialorder %v9180_v28, %v8978_v43  ;;  %vm1604_vm2 = vcmp.eq.f32.partialorder %v9180_v28, %v8978_v43  ;;  %v9183_v53 = vld [vmem:[#allocation108_spill] sm:$0xff]  ;;  %v1264_v39 = vmul.f32 %v4171_v55, %v6718_v22 }
 0x3ec   : > { %2730 = vperm.xlu0 %4109, %v2668_v15   ;;  %v2655_v62 = vsub.f32 %v9178_v51, %v9087_v45  ;;  %v6776_v15 = vpop.permute.xlu0 %2312  ;;  %v2670_v11 = vmul.f32 %v2654_v49, %v2638_v37  ;;  %v9181_v45 = vld [vmem:[#allocation57_spill] sm:$0xff]  ;;  %v2656_v27 = vsub.f32 %v9183_v53, %v9090_v57  ;;  %4172 = vrcp.f32 %v6764_v30  ;;  %v9184_v49 = vld [vmem:[#allocation60_spill] sm:$0xff]  ;;  %v9185_v37 = vld [vmem:[#allocation107_spill] sm:$0xff] }
 0x3ed   : > { %v2639_v51 = vsub.f32 %v9182_v58, %v9181_v45  ;;  %v2640_v21 = vsub.f32 %v9185_v37, %v9184_v49  ;;  %vm1700_vm11 = vmor %vm1572_vm10, %vm1604_vm2  ;;  %v9187_v58 = vld [vmem:[#allocation152_spill] sm:$0xff]  ;;  %v9188_v53 = vld [vmem:[#allocation154_spill] sm:$0xff]  ;;  %v1296_v28 = vsub.f32 2.0, %v1264_v39 }
 0x3ee   : > { %v6800_v45 = vsel %vm1700_vm11, %v1732_v60, 0.0  ;;  %v1825_v18 = vmax.f32 %v9188_v53, %v9187_v58  ;;  %v9189_v4 = vld [vmem:[#allocation156_spill] sm:$0xff]  ;;  %v9190_v49 = vld [vmem:[#allocation47_spill] sm:$0xff] }
 0x3ef   : > { %2735 = vperm.xlu2 %4108, %v2669_v61   ;;  %v6790_v61 = vpop.permute.xlu2 %2362  ;;  %v2671_v47 = vmul.f32 %v2655_v62, %v2639_v51  ;;  %9186 = vst [vmem:[#allocation71_spill] sm:$0xff] %v6800_v45  ;;  %v2672_v57 = vmul.f32 %v2656_v27, %v2640_v21  ;;  %v1826_v44 = vmax.f32 %v9189_v4, %v6800_v45  ;;  %v9191_v39 = vld [vmem:[#allocation143_spill] sm:$0xff]  ;;  %v9197_v45 = vld [vmem:[#allocation145_spill] sm:$0xff]  ;;  %v9198_v62 = vld [vmem:[#allocation146_spill] sm:$0xff] }
 0x3f0   : > { %vm1578_vm4 = vcmp.gt.f32.partialorder %v9191_v39, %v8978_v43  ;;  %v1827_v37 = vmax.f32 %v1825_v18, %v6212_v50  ;;  %vm1610_vm8 = vcmp.eq.f32.partialorder %v9191_v39, %v8978_v43  ;;  %v9192_v50 = vld [vmem:[#allocation110_spill] sm:$0xff] }
 0x3f1   : > { %v1828_v7 = vmax.f32 %v1826_v44, %v6216_v31  ;;  %vm1706_vm3 = vmor %vm1578_vm4, %vm1610_vm8  ;;  %v9196_v31 = vld [vmem:[#allocation117_spill] sm:$0xff] }
 0x3f2   : > { %2740 = vperm.xlu1 %4107, %v2670_v11   ;;  %v6806_v19 = vpop.permute.xlu1 %2322  ;;  %v4173_v27 = vpop.eup %4172  ;;  %v1829_v60 = vmax.f32 %v1827_v37, %v6218_v1  ;;  %v9195_v1 = vld [vmem:[#allocation81_spill] sm:$0xff] }
 0x3f3   : > { %v1830_v18 = vmax.f32 %v1828_v7, %v6236_v29 }
 0x3f4   : > { %2745 = vperm.xlu0 %4109, %v2671_v47   ;;  %v6812_v11 = vpop.permute.xlu0 %2327  ;;  %v1738_v47 = vmul.f32 %v9190_v49, %v9190_v49  ;;  %v1270_v49 = vmul.f32 %v4173_v27, %v6764_v30  ;;  %v1831_v7 = vmax.f32 %v1829_v60, %v9195_v1  ;;  %v9199_v60 = vld [vmem:[#allocation18_spill] sm:$0xff] }
 0x3f5   : > { %vm1584_vm6 = vcmp.gt.f32.partialorder %v9199_v60, %v8978_v43  ;;  %vm1616_vm12 = vcmp.eq.f32.partialorder %v9199_v60, %v8978_v43 }
 0x3f6   : > { %v6840_v39 = vsel %vm1706_vm3, %v1738_v47, 0.0  ;;  %v1302_v37 = vsub.f32 2.0, %v1270_v49  ;;  %vm1712_vm13 = vmor %vm1584_vm6, %vm1616_vm12 }
 0x3f7   : > { %2750 = vperm.xlu2 %4108, %v2672_v57   ;;  %v6824_v51 = vpop.permute.xlu2 %2377  ;;  %v1328_v57 = vmul.f32 %v4171_v55, %v1296_v28  ;;  %v9193_v55 = vld [vmem:[#allocation113_spill] sm:$0xff]  ;;  %9194 = vst [vmem:[#allocation137_spill] sm:$0xff] %v6840_v39 }
 0x3f8   : > { %v1334_v4 = vmul.f32 %v4173_v27, %v1302_v37  ;;  %v9203_v27 = vmin.f32 %v6776_v15, %v9137_v34 }
 0x3f9   : > { %v1360_v28 = vmul.f32 %v1328_v57, %v6718_v22  ;;  %v9201_v22 = vld [vmem:[#allocation136_spill] sm:$0xff] }
 0x3fa   : > { %3091 = vperm.xlu1 %4107, %v9192_v50   ;;  %v6836_v44 = vpop.permute.xlu1 %2337  ;;  %v1832_v50 = vmax.f32 %v1830_v18, %v6840_v39  ;;  %v1833_v18 = vmax.f32 %v1831_v7, %v6341_v52  ;;  %v9200_v39 = vld [vmem:[#allocation121_spill] sm:$0xff]  ;;  %v1744_v1 = vmul.f32 %v9201_v22, %v9201_v22  ;;  %v9204_v22 = vld [vmem:[#allocation124_spill] sm:$0xff] }
 0x3fb   : > { %v1392_v21 = vsub.f32 2.0, %v1360_v28  ;;  %v9202_v28 = vmin.f32 %v6776_v15, %v9134_v36  ;;  %v9230_v52 = vld [vmem:[#allocation85_spill] sm:$0xff] }
 0x3fc   : > { %3096 = vperm.xlu0 %4109, %v9193_v55   ;;  %v6848_v29 = vpop.permute.xlu0 %2342  ;;  %v1835_v7 = vmax.f32 %v1833_v18, %v6347_v3  ;;  %v6892_v18 = vsel %vm1712_vm13, %v1744_v1, 0.0  ;;  %v9208_v1 = vld [vmem:[#allocation130_spill] sm:$0xff] }
 0x3fd   : > { %v1424_v47 = vmul.f32 %v1392_v21, %v1328_v57  ;;  %9206 = vst [vmem:[#allocation75_spill] sm:$0xff] %v6892_v18  ;;  %v9209_v21 = vmin.f32 %v6812_v11, %v9134_v36 }
 0x3ff   : > { %3101 = vperm.xlu2 %4108, %v9196_v31   ;;  %v2425_v55 = vpop.permute.xlu2 %2424  ;;  %v1834_v31 = vmax.f32 %v1832_v50, %v6345_v10  ;;  %v1456_v60 = vmul.f32 %v1424_v47, %v9157_v17 }
 0x400   : > { %v2499_v58 = vmax.f32 %v2425_v55, %v9197_v45  ;;  %v2500_v49 = vmax.f32 %v2425_v55, %v9198_v62 }
 0x402   : > { %3106 = vperm.xlu1 %4107, %v9200_v39   ;;  %v6869_v55 = vsub.f32 %v9202_v28, %v2499_v58  ;;  %v6874_v37 = vsub.f32 %v9203_v27, %v2500_v49  ;;  %v1836_v39 = vmax.f32 %v1834_v31, %v6350_v48  ;;  %v6878_v50 = vpop.permute.xlu1 %2352  ;;  %v1366_v28 = vmul.f32 %v1334_v4, %v6764_v30  ;;  %v9205_v49 = vld [vmem:[#allocation127_spill] sm:$0xff] }
 0x403   : > { %v9207_v31 = vld [vmem:[#allocation55_spill] sm:$0xff] }
 0x404   : > { %3111 = vperm.xlu0 %4109, %v9204_v22   ;;  %v6889_v15 = vpop.permute.xlu0 %2357  ;;  %v1837_v27 = vmax.f32 %v1835_v7, %v9207_v31  ;;  %v1838_v30 = vmax.f32 %v1836_v39, %v6892_v18  ;;  %v9210_v7 = vmin.f32 %v6812_v11, %v9137_v34  ;;  %v9211_v39 = vld [vmem:[#allocation84_spill] sm:$0xff]  ;;  %v2563_v6 = vmax.f32 %v6869_v55, 0.0 }
 0x405   : > { %vm1590_vm14 = vcmp.gt.f32.partialorder %v9211_v39, %v8978_v43  ;;  %vm1622_vm5 = vcmp.eq.f32.partialorder %v9211_v39, %v8978_v43  ;;  %v9285_v55 = vmin.f32 %v6878_v50, %v9137_v34 }
 0x406   : > { %v1839_v17 = vmax.f32 %v1837_v27, %v6399_v2  ;;  %v1840_v47 = vmax.f32 %v1838_v30, %v6403_v35  ;;  %v9214_v27 = vld [vmem:[#allocation88_spill] sm:$0xff]  ;;  %v9215_v35 = vld [vmem:[#allocation34_spill] sm:$0xff]  ;;  %vm1718_vm15 = vmor %vm1590_vm14, %vm1622_vm5 }
 0x407   : > { %3116 = vperm.xlu2 %4108, %v9205_v49   ;;  %v2440_v22 = vpop.permute.xlu2 %2439  ;;  %v1398_v49 = vsub.f32 2.0, %v1366_v28 }
 0x408   : > { %v2505_v58 = vmax.f32 %v2440_v22, %v9197_v45  ;;  %v2506_v10 = vmax.f32 %v2440_v22, %v9198_v62  ;;  %v9212_v22 = vld [vmem:[#allocation26_spill] sm:$0xff]  ;;  %v1842_v2 = vmax.f32 %v1840_v47, %v9214_v27  ;;  %v9218_v27 = vld [vmem:[#allocation39_spill] sm:$0xff] }
 0x40a   : > { %3121 = vperm.xlu1 %4107, %v9208_v1   ;;  %v6907_v48 = vsub.f32 %v9209_v21, %v2505_v58  ;;  %v6912_v57 = vsub.f32 %v9210_v7, %v2506_v10  ;;  %v6918_v28 = vpop.permute.xlu1 %2367  ;;  %v1750_v1 = vmul.f32 %v1456_v60, %v1456_v60  ;;  %v1430_v58 = vmul.f32 %v1398_v49, %v1334_v4  ;;  %v9213_v21 = vld [vmem:[#allocation139_spill] sm:$0xff] }
 0x40b   : > { %v1841_v7 = vmax.f32 %v1839_v17, %v9213_v21 }
 0x40c   : > { %3126 = vperm.xlu0 %4109, %v9212_v22   ;;  %v6929_v30 = vpop.permute.xlu0 %2372  ;;  %v6939_v4 = vsel %vm1718_vm15, %v1750_v1, 0.0  ;;  %v1462_v47 = vmul.f32 %v1430_v58, %v9175_v23  ;;  %v9219_v22 = vmin.f32 %v6848_v29, %v9134_v36  ;;  %v9220_v1 = vmin.f32 %v6848_v29, %v9137_v34  ;;  %v9223_v58 = vld [vmem:[#allocation15_spill] sm:$0xff] }
 0x40d   : > { %9216 = vst [vmem:[#allocation35_spill] sm:$0xff] %v6939_v4  ;;  %v1844_v60 = vmax.f32 %v1842_v2, %v6939_v4  ;;  %v9224_v2 = vld [vmem:[#allocation153_spill] sm:$0xff] }
 0x40e   : > { %vm1596_vm7 = vcmp.gt.f32.partialorder %v9224_v2, %v8978_v43  ;;  %vm1628_vm0 = vcmp.eq.f32.partialorder %v9224_v2, %v8978_v43 }
 0x40f   : > { %3131 = vperm.xlu2 %4108, %v9215_v35   ;;  %v2455_v10 = vpop.permute.xlu2 %2454  ;;  %v9217_v35 = vld [vmem:[#allocation144_spill] sm:$0xff]  ;;  %vm1724_vm9 = vmor %vm1596_vm7, %vm1628_vm0 }
 0x410   : > { %v2511_v49 = vmax.f32 %v2455_v10, %v9197_v45  ;;  %v2512_v17 = vmax.f32 %v2455_v10, %v9198_v62  ;;  %v1843_v11 = vmax.f32 %v1841_v7, %v9217_v35  ;;  %v9221_v10 = vld [vmem:[#allocation151_spill] sm:$0xff] }
 0x411   : > { %v2209_v18 = vmax.f32 %v9221_v10, %v9044_v16  ;;  %v9226_v10 = vld [vmem:[#allocation138_spill] sm:$0xff]  ;;  %v9227_v35 = vld [vmem:[#allocation19_spill] sm:$0xff] }
 0x412   : > { %3136 = vperm.xlu1 %4107, %v9218_v27   ;;  %v6950_v39 = vsub.f32 %v9219_v22, %v2511_v49  ;;  %v6955_v21 = vsub.f32 %v9220_v1, %v2512_v17  ;;  %v6959_v23 = vpop.permute.xlu1 %2382  ;;  %v1756_v22 = vmul.f32 %v1462_v47, %v1462_v47  ;;  %v1845_v29 = vmax.f32 %v1843_v11, %v6479_v0  ;;  %v9225_v49 = vld [vmem:[#allocation10_spill] sm:$0xff]  ;;  %v9229_v27 = vld [vmem:[#allocation116_spill] sm:$0xff] }
 0x413   : > { %9222 = vst [vmem:[#allocation73_spill] sm:$0xff] %v6959_v23  ;;  %v1846_v17 = vmax.f32 %v1844_v60, %v9225_v49  ;;  %v9228_v7 = vmin.f32 %v9227_v35, %v5023_v12  ;;  %v2211_v11 = vmax.f32 %v9230_v52, %v9044_v16  ;;  %v9231_v60 = vmin.f32 %v6761_v25, %v9134_v36  ;;  %v9234_v52 = vld [vmem:[#allocation128_spill] sm:$0xff] }
 0x414   : > { %3141 = vperm.xlu0 %4109, %v9223_v58   ;;  %v2420_v1 = vpop.permute.xlu0 %2419  ;;  %v1847_v47 = vmax.f32 %v1845_v29, %v9229_v27  ;;  %v9232_v35 = vmin.f32 %v6761_v25, %v9137_v34  ;;  %v9236_v27 = vld [vmem:[#allocation59_spill] sm:$0xff] }
 0x415   : > { %v2497_v58 = vmax.f32 %v2420_v1, %v9197_v45  ;;  %v2498_v4 = vmax.f32 %v2420_v1, %v9198_v62  ;;  %v2241_v31 = vsub.f32 %v9228_v7, %v2209_v18  ;;  %v1848_v3 = vmax.f32 %v1846_v17, %v6495_v38  ;;  %v9235_v38 = vld [vmem:[#allocation8_spill] sm:$0xff] }
 0x416   : > { %v6993_v17 = vsel %vm1724_vm9, %v1756_v22, 0.0  ;;  %v2279_v2 = vmax.f32 %v9235_v38, 0.0  ;;  %v9240_v22 = vld [vmem:[#allocation54_spill] sm:$0xff] }
 0x417   : > { %3146 = vperm.xlu2 %4108, %v9226_v10   ;;  %v2470_v0 = vpop.permute.xlu2 %2469  ;;  %v2529_v1 = vsub.f32 %v9231_v60, %v2497_v58  ;;  %v2530_v18 = vsub.f32 %v9232_v35, %v2498_v4  ;;  %9233 = vst [vmem:[#allocation37_spill] sm:$0xff] %v6993_v17  ;;  %v2099_v10 = vmin.f32 %v9234_v52, %v5023_v12  ;;  %v2280_v60 = vmax.f32 %v9240_v22, 0.0  ;;  %v9241_v52 = vld [vmem:[#allocation147_spill] sm:$0xff] }
 0x418   : > { %v2517_v7 = vmax.f32 %v2470_v0, %v9197_v45  ;;  %v2518_v29 = vmax.f32 %v2470_v0, %v9198_v62  ;;  %v9237_v58 = vmin.f32 %v6889_v15, %v9134_v36  ;;  %v9238_v4 = vmin.f32 %v6889_v15, %v9137_v34 }
 0x419   : > { %v2561_v49 = vmax.f32 %v2529_v1, 0.0  ;;  %v2562_v53 = vmax.f32 %v2530_v18, 0.0  ;;  %v2273_v35 = vmax.f32 %v2241_v31, 0.0  ;;  %v2274_v43 = vmax.f32 %v9241_v52, 0.0  ;;  %v9242_v1 = vld [vmem:[#allocation25_spill] sm:$0xff]  ;;  %v9243_v18 = vld [vmem:[#allocation79_spill] sm:$0xff] }
 0x41a   : > { %3151 = vperm.xlu1 %4107, %v9236_v27   ;;  %v7002_v25 = vsub.f32 %v9237_v58, %v2517_v7  ;;  %v7007_v0 = vsub.f32 %v9238_v4, %v2518_v29  ;;  %v7011_v38 = vsub.f32 %v2099_v10, %v2211_v11  ;;  %v2430_v27 = vpop.permute.xlu1 %2429  ;;  %v1849_v23 = vmax.f32 %v1847_v47, %v9243_v18  ;;  %v9244_v11 = vld [vmem:[#allocation41_spill] sm:$0xff] }
 0x41b   : > { %v1850_v7 = vmax.f32 %v1848_v3, %v6993_v17  ;;  %v2501_v58 = vmax.f32 %v2430_v27, %v9197_v45  ;;  %v2502_v15 = vmax.f32 %v2430_v27, %v9198_v62  ;;  %v2213_v29 = vmax.f32 %v6465_v40, %v9044_v16 }
 0x41c   : > { %9239 = vst [vmem:[#allocation74_spill] sm:$0xff] %v7007_v0  ;;  %3156 = vperm.xlu0 %4109, %v9242_v1   ;;  %v2217_v31 = vmax.f32 %v6537_v24, %v9044_v16  ;;  %v2435_v4 = vpop.permute.xlu0 %2434  ;;  %v7023_v10 = vmul.f32 %v2561_v49, %v2273_v35  ;;  %v7025_v22 = vmul.f32 %v2562_v53, %v2274_v43  ;;  %v2285_v24 = vmax.f32 %v6500_v46, 0.0  ;;  %v9257_v43 = vld [vmem:[#allocation63_spill] sm:$0xff] }
 0x41d   : > { %v9246_v3 = vmin.f32 %v6641_v8, %v9134_v36  ;;  %v9247_v52 = vmin.f32 %v6641_v8, %v9137_v34  ;;  %v2503_v40 = vmax.f32 %v2435_v4, %v9197_v45  ;;  %v2504_v16 = vmax.f32 %v2435_v4, %v9198_v62  ;;  %v9256_v8 = vld [vmem:[#allocation141_spill] sm:$0xff] }
 0x41e   : > { %9245 = vst [vmem:[#allocation38_spill] sm:$0xff] %v7023_v10  ;;  %v2286_v49 = vmax.f32 %v6507_v9, 0.0  ;;  %v9248_v53 = vmin.f32 %v6489_v59, %v5023_v12  ;;  %v9251_v4 = vmin.f32 %v6806_v19, %v9134_v36  ;;  %v9252_v9 = vmin.f32 %v6806_v19, %v9137_v34 }
 0x41f   : > { %3161 = vperm.xlu2 %4108, %v9244_v11   ;;  %v7030_v47 = vsub.f32 %v9246_v3, %v2501_v58  ;;  %v7035_v27 = vsub.f32 %v9247_v52, %v2502_v15  ;;  %v2485_v1 = vpop.permute.xlu2 %2484  ;;  %v9249_v58 = vld [vmem:[#allocation11_spill] sm:$0xff]  ;;  %v9255_v59 = vmin.f32 %v9115_v5, %v5023_v12  ;;  %v9259_v12 = vmin.f32 %v6929_v30, %v9134_v36 }
 0x420   : > { %v7045_v35 = vsub.f32 %v9248_v53, %v2213_v29  ;;  %v7049_v15 = vmax.f32 %v1849_v23, %v9249_v58  ;;  %v2535_v11 = vsub.f32 %v9251_v4, %v2503_v40  ;;  %v2536_v46 = vsub.f32 %v9252_v9, %v2504_v16  ;;  %v9253_v3 = vld [vmem:[#allocation131_spill] sm:$0xff]  ;;  %v9274_v58 = vld [vmem:[#allocation118_spill] sm:$0xff] }
 0x421   : > { %v7058_v52 = vmax.f32 %v1850_v7, %v9253_v3  ;;  %v7063_v29 = vsub.f32 %v9255_v59, %v2217_v31  ;;  %v2523_v53 = vmax.f32 %v2485_v1, %v9197_v45  ;;  %v2524_v23 = vmax.f32 %v2485_v1, %v9198_v62  ;;  %v9258_v4 = vld [vmem:[#allocation103_spill] sm:$0xff] }
 0x422   : > { %9250 = vst [vmem:[#allocation77_spill] sm:$0xff] %v7049_v15  ;;  %3166 = vperm.xlu1 %4107, %v9256_v8   ;;  %v2567_v19 = vmax.f32 %v2535_v11, 0.0  ;;  %v2568_v16 = vmax.f32 %v2536_v46, 0.0  ;;  %v9261_v31 = vmin.f32 %v6929_v30, %v9137_v34  ;;  %v2445_v8 = vpop.permute.xlu1 %2444 }
 0x423   : > { %9254 = vst [vmem:[#allocation78_spill] sm:$0xff] %v7058_v52  ;;  %v7075_v5 = vsub.f32 %v9259_v12, %v2523_v53  ;;  %v2507_v59 = vmax.f32 %v2445_v8, %v9197_v45  ;;  %v2508_v11 = vmax.f32 %v2445_v8, %v9198_v62  ;;  %v9271_v8 = vld [vmem:[#allocation32_spill] sm:$0xff]  ;;  %v9272_v53 = vld [vmem:[#allocation67_spill] sm:$0xff]  ;;  %v9273_v12 = vld [vmem:[#allocation125_spill] sm:$0xff] }
 0x424   : > { %v7080_v1 = vsub.f32 %v9261_v31, %v2524_v23  ;;  %v7084_v46 = vmul.f32 %v2567_v19, %v2279_v2  ;;  %v7086_v7 = vmul.f32 %v2568_v16, %v2280_v60  ;;  %v2450_v30 = vpop.permute.xlu0 %2449  ;;  %v9264_v23 = vmin.f32 %v6703_v41, %v9134_v36 }
 0x425   : > { %9260 = vst [vmem:[#allocation132_spill] sm:$0xff] %v7075_v5  ;;  %v9265_v2 = vmin.f32 %v6703_v41, %v9137_v34  ;;  %v2509_v60 = vmax.f32 %v2450_v30, %v9197_v45  ;;  %v2510_v16 = vmax.f32 %v2450_v30, %v9198_v62  ;;  %v9269_v41 = vmin.f32 %v6836_v44, %v9134_v36  ;;  %v9299_v5 = vld [vmem:[#allocation73_spill] sm:$0xff] }
 0x426   : > { %9262 = vst [vmem:[#allocation29_spill] sm:$0xff] %v7080_v1  ;;  %v7095_v31 = vsub.f32 %v9264_v23, %v2507_v59  ;;  %v9270_v30 = vmin.f32 %v6836_v44, %v9137_v34 }
 0x427   : > { %9263 = vst [vmem:[#allocation51_spill] sm:$0xff] %v7084_v46  ;;  %v7100_v19 = vsub.f32 %v9265_v2, %v2508_v11  ;;  %v2676_v40 = vpop.permute.xlu2 %2675  ;;  %v2541_v11 = vsub.f32 %v9269_v41, %v2509_v60 }
 0x428   : > { %v2542_v2 = vsub.f32 %v9270_v30, %v2510_v16  ;;  %v2753_v15 = vadd.f32 %v2676_v40, %v9273_v12  ;;  %v2754_v9 = vadd.f32 %v2676_v40, %v9151_v14 }
 0x429   : > { %v2573_v3 = vmax.f32 %v2541_v11, 0.0 }
 0x42a   : > { %v2574_v42 = vmax.f32 %v2542_v2, 0.0  ;;  %v7125_v44 = vsub.f32 %v2753_v15, %v7023_v10  ;;  %v7128_v16 = vsub.f32 %v2754_v9, %v7025_v22  ;;  %v2460_v30 = vpop.permute.xlu1 %2459  ;;  %v9280_v9 = vld [vmem:[#allocation68_spill] sm:$0xff]  ;;  %v2564_v2 = vmax.f32 %v6874_v37, 0.0 }
 0x42b   : > { %v2513_v18 = vmax.f32 %v2460_v30, %v9197_v45  ;;  %v2514_v40 = vmax.f32 %v2460_v30, %v9198_v62  ;;  %v7132_v23 = vmul.f32 %v2573_v3, %v2285_v24  ;;  %v9281_v52 = vmin.f32 %v9280_v9, %v9134_v36 }
 0x42c   : > { %v7134_v17 = vmul.f32 %v2574_v42, %v2286_v49  ;;  %4174 = vrcp.f32 %v7125_v44  ;;  %v2465_v15 = vpop.permute.xlu0 %2464  ;;  %v9282_v42 = vmin.f32 %v9280_v9, %v9137_v34 }
 0x42d   : > { %9278 = vst [vmem:[#allocation40_spill] sm:$0xff] %v7132_v23  ;;  %4176 = vrcp.f32 %v7128_v16  ;;  %v7144_v10 = vsub.f32 %v9281_v52, %v2513_v18  ;;  %v2515_v49 = vmax.f32 %v2465_v15, %v9197_v45  ;;  %v2516_v11 = vmax.f32 %v2465_v15, %v9198_v62 }
 0x42e   : > { %v7149_v24 = vsub.f32 %v9282_v42, %v2514_v40  ;;  %v9284_v52 = vmin.f32 %v6878_v50, %v9134_v36 }
 0x42f   : > { %v2691_v60 = vpop.permute.xlu2 %2690  ;;  %v2548_v37 = vsub.f32 %v9285_v55, %v2516_v11 }
 0x430   : > { %v2547_v40 = vsub.f32 %v9284_v52, %v2515_v49  ;;  %v2759_v9 = vadd.f32 %v2691_v60, %v9273_v12  ;;  %v2760_v15 = vadd.f32 %v2691_v60, %v9151_v14 }
 0x431   : > { %v2580_v30 = vmax.f32 %v2548_v37, 0.0  ;;  %v9286_v37 = vmax.f32 %v9257_v43, 0.0 }
 0x432   : > { %v2579_v3 = vmax.f32 %v2547_v40, 0.0  ;;  %v7171_v63 = vsub.f32 %v2759_v9, %v7084_v46  ;;  %v4175_v49 = vpop.eup %4174  ;;  %v7176_v33 = vsub.f32 %v2760_v15, %v7086_v7  ;;  %v2475_v50 = vpop.permute.xlu1 %2474  ;;  %v9288_v15 = vmax.f32 %v9258_v4, 0.0 }
 0x433   : > { %v4177_v11 = vpop.eup %4176  ;;  %v2849_v60 = vmul.f32 %v4175_v49, %v7125_v44  ;;  %v2519_v40 = vmax.f32 %v2475_v50, %v9197_v45  ;;  %v2520_v9 = vmax.f32 %v2475_v50, %v9198_v62  ;;  %v9289_v46 = vmin.f32 %v6790_v61, %v9134_v36 }
 0x434   : > { %4178 = vrcp.f32 %v7171_v63  ;;  %v2850_v55 = vmul.f32 %v4177_v11, %v7128_v16  ;;  %v2480_v18 = vpop.permute.xlu0 %2479  ;;  %v7186_v13 = vmul.f32 %v2579_v3, %v9286_v37  ;;  %v7190_v52 = vmul.f32 %v2580_v30, %v9288_v15 }
 0x435   : > { %4180 = vrcp.f32 %v7176_v33  ;;  %v2881_v42 = vsub.f32 2.0, %v2849_v60  ;;  %v7195_v41 = vsub.f32 %v9289_v46, %v2519_v40  ;;  %v9290_v50 = vmin.f32 %v6790_v61, %v9137_v34 }
 0x436   : > { %9287 = vst [vmem:[#allocation80_spill] sm:$0xff] %v7186_v13  ;;  %v2521_v59 = vmax.f32 %v2480_v18, %v9197_v45  ;;  %v2882_v4 = vsub.f32 2.0, %v2850_v55  ;;  %v2522_v30 = vmax.f32 %v2480_v18, %v9198_v62  ;;  %v9292_v61 = vmin.f32 %v6918_v28, %v9134_v36 }
 0x437   : > { %v7200_v0 = vsub.f32 %v9290_v50, %v2520_v9  ;;  %v2706_v60 = vpop.permute.xlu2 %2705  ;;  %v7208_v40 = vmul.f32 %v4175_v49, %v2881_v42  ;;  %v9293_v50 = vmin.f32 %v6918_v28, %v9137_v34  ;;  %v9294_v49 = vmax.f32 %v7011_v38, 0.0 }
 0x438   : > { %v2553_v9 = vsub.f32 %v9292_v61, %v2521_v59  ;;  %v2914_v15 = vmul.f32 %v4177_v11, %v2882_v4  ;;  %v2765_v55 = vadd.f32 %v2706_v60, %v9273_v12  ;;  %v2766_v18 = vadd.f32 %v2706_v60, %v9151_v14 }
 0x439   : > { %9291 = vst [vmem:[#allocation28_spill] sm:$0xff] %v7208_v40  ;;  %v7216_v43 = vsub.f32 %v9293_v50, %v2522_v30  ;;  %v7224_v46 = vmul.f32 %v2563_v6, %v9294_v49  ;;  %v9295_v59 = vmax.f32 %v6509_v26, 0.0  ;;  %v7238_v38 = vmul.f32 %v7208_v40, %v7125_v44 }
 0x43a   : > { %v4179_v3 = vpop.eup %4178  ;;  %v2946_v4 = vmul.f32 %v2914_v15, %v7128_v16  ;;  %v7234_v61 = vsub.f32 %v2765_v55, %v7132_v23  ;;  %v2490_v50 = vpop.permute.xlu1 %2489  ;;  %v7242_v26 = vsub.f32 %v2766_v18, %v7134_v17  ;;  %v9296_v44 = vmin.f32 %v6824_v51, %v9134_v36 }
 0x43b   : > { %v7228_v11 = vmul.f32 %v2564_v2, %v9295_v59  ;;  %v4181_v28 = vpop.eup %4180  ;;  %v2855_v30 = vmul.f32 %v4179_v3, %v7171_v63  ;;  %v2525_v2 = vmax.f32 %v2490_v50, %v9197_v45  ;;  %v2526_v59 = vmax.f32 %v2490_v50, %v9198_v62 }
 0x43c   : > { %v2856_v6 = vmul.f32 %v4181_v28, %v7176_v33  ;;  %v2978_v16 = vsub.f32 2.0, %v2946_v4  ;;  %4182 = vrcp.f32 %v7234_v61  ;;  %v2495_v55 = vpop.permute.xlu0 %2494  ;;  %v9298_v4 = vmin.f32 %v6824_v51, %v9137_v34 }
 0x43d   : > { %v2887_v49 = vsub.f32 2.0, %v2855_v30  ;;  %4184 = vrcp.f32 %v7242_v26  ;;  %v7251_v37 = vsub.f32 %v9296_v44, %v2525_v2  ;;  %v2527_v18 = vmax.f32 %v2495_v55, %v9197_v45 }
 0x43e   : > { %v2888_v60 = vsub.f32 2.0, %v2856_v6  ;;  %v3010_v42 = vmul.f32 %v2978_v16, %v2914_v15  ;;  %v7259_v30 = vsub.f32 %v9298_v4, %v2526_v59  ;;  %v2528_v50 = vmax.f32 %v2495_v55, %v9198_v62 }
 0x43f   : > { %v7254_v23 = vmul.f32 %v4179_v3, %v2887_v49  ;;  %v9300_v2 = vmin.f32 %v9299_v5, %v9134_v36  ;;  %v2585_v15 = vmax.f32 %v2553_v9, 0.0  ;;  %v2586_v51 = vmax.f32 %v7216_v43, 0.0 }
 0x440   : > { %v2920_v40 = vmul.f32 %v4181_v28, %v2888_v60  ;;  %v9301_v16 = vmin.f32 %v9299_v5, %v9137_v34  ;;  %v7283_v55 = vmul.f32 %v3010_v42, %v7025_v22  ;;  %v9304_v5 = vmax.f32 %v6600_v32, 0.0 }
 0x441   : > { %9297 = vst [vmem:[#allocation148_spill] sm:$0xff] %v7254_v23  ;;  %v2721_v6 = vpop.permute.xlu2 %2720  ;;  %v7266_v44 = vsub.f32 %v9300_v2, %v2527_v18  ;;  %v7287_v43 = vmul.f32 %v7254_v23, %v7171_v63  ;;  %v9306_v18 = vmax.f32 %v7045_v35, 0.0  ;;  %v9307_v4 = vmax.f32 %v7030_v47, 0.0 }
 0x442   : > { %v2771_v45 = vadd.f32 %v2721_v6, %v9273_v12  ;;  %v7274_v62 = vsub.f32 %v9301_v16, %v2528_v50  ;;  %v2952_v28 = vmul.f32 %v2920_v40, %v7176_v33  ;;  %v2772_v36 = vadd.f32 %v2721_v6, %v9151_v14  ;;  %v4183_v59 = vpop.eup %4182  ;;  %9302 = vst [vmem:[#allocation149_spill] sm:$0xff] %v7283_v55  ;;  %v2681_v34 = vpop.permute.xlu1 %2680 }
 0x443   : > { %9303 = vst [vmem:[#allocation42_spill] sm:$0xff] %v7287_v43  ;;  %v9305_v33 = vmax.f32 %v7035_v27, 0.0  ;;  %v7299_v50 = vmul.f32 %v9307_v4, %v9306_v18  ;;  %v4185_v6 = vpop.eup %4184  ;;  %v2861_v22 = vmul.f32 %v4183_v59, %v7234_v61  ;;  %v2755_v27 = vadd.f32 %v2681_v34, %v9273_v12 }
 0x444   : > { %v7280_v49 = vsub.f32 %v2771_v45, %v7186_v13  ;;  %v7304_v63 = vsub.f32 %v2772_v36, %v7190_v52  ;;  %v2862_v32 = vmul.f32 %v4185_v6, %v7242_v26  ;;  %v2756_v35 = vadd.f32 %v2681_v34, %v9151_v14  ;;  %v2686_v2 = vpop.permute.xlu0 %2685 }
 0x445   : > { %v7293_v9 = vmul.f32 %v9305_v33, %v9304_v5  ;;  %v9308_v47 = vmax.f32 %v6602_v20, 0.0  ;;  %v2984_v16 = vsub.f32 2.0, %v2952_v28  ;;  %v2757_v36 = vadd.f32 %v2686_v2, %v9273_v12  ;;  %v9321_v5 = vld [vmem:[#allocation122_spill] sm:$0xff] }
 0x446   : > { %4186 = vrcp.f32 %v7280_v49  ;;  %v2894_v33 = vsub.f32 2.0, %v2862_v32  ;;  %v7318_v18 = vsub.f32 %v2755_v27, %v7224_v46  ;;  %v7321_v4 = vsub.f32 %v2756_v35, %v7228_v11 }
 0x447   : > { %v7312_v45 = vmul.f32 %v2585_v15, %v9308_v47  ;;  %4188 = vrcp.f32 %v7304_v63  ;;  %v2758_v34 = vadd.f32 %v2686_v2, %v9151_v14  ;;  %v2893_v15 = vsub.f32 2.0, %v2861_v22 }
 0x448   : > { %v7326_v28 = vsub.f32 %v2757_v36, %v7299_v50  ;;  %v9310_v47 = vmax.f32 %v6604_v56, 0.0  ;;  %v2926_v32 = vmul.f32 %v4185_v6, %v2894_v33  ;;  %4190 = vrcp.f32 %v7318_v18 }
 0x449   : > { %9309 = vst [vmem:[#allocation83_spill] sm:$0xff] %v7312_v45  ;;  %v2736_v3 = vpop.permute.xlu2 %2735  ;;  %v7334_v27 = vsub.f32 %v2758_v34, %v7293_v9  ;;  %v3016_v42 = vmul.f32 %v2984_v16, %v2920_v40  ;;  %4192 = vrcp.f32 %v7321_v4  ;;  %v9311_v36 = vmax.f32 %v7063_v29, 0.0 }
 0x44a   : > { %v7330_v60 = vmul.f32 %v2586_v51, %v9310_v47  ;;  %v2777_v35 = vadd.f32 %v2736_v3, %v9273_v12  ;;  %v2778_v22 = vadd.f32 %v2736_v3, %v9151_v14  ;;  %v9312_v56 = vmax.f32 %v6907_v48, 0.0 }
 0x44b   : > { %v2958_v6 = vmul.f32 %v2926_v32, %v7242_v26  ;;  %4194 = vrcp.f32 %v7326_v28  ;;  %v2696_v40 = vpop.permute.xlu1 %2695  ;;  %v7351_v47 = vmul.f32 %v4183_v59, %v2893_v15  ;;  %v9315_v48 = vmax.f32 %v6618_v54, 0.0 }
 0x44c   : > { %v4187_v2 = vpop.eup %4186  ;;  %v7343_v51 = vmul.f32 %v9312_v56, %v9311_v36  ;;  %v7349_v34 = vsub.f32 %v2777_v35, %v7312_v45  ;;  %4196 = vrcp.f32 %v7334_v27  ;;  %v7355_v29 = vsub.f32 %v2778_v22, %v7330_v60  ;;  %v9317_v22 = vld [vmem:[#allocation106_spill] sm:$0xff] }
 0x44d   : > { %v2867_v33 = vmul.f32 %v4187_v2, %v7280_v49  ;;  %v4189_v16 = vpop.eup %4188  ;;  %9314 = vst [vmem:[#allocation123_spill] sm:$0xff] %v7351_v47  ;;  %v9316_v26 = vmax.f32 %v6912_v57, 0.0  ;;  %v2990_v36 = vsub.f32 2.0, %v2958_v6  ;;  %v2761_v59 = vadd.f32 %v2696_v40, %v9273_v12 }
 0x44e   : > { %9313 = vst [vmem:[#allocation87_spill] sm:$0xff] %v7343_v51  ;;  %v2868_v56 = vmul.f32 %v4189_v16, %v7304_v63  ;;  %4198 = vrcp.f32 %v7349_v34  ;;  %v2762_v15 = vadd.f32 %v2696_v40, %v9151_v14  ;;  %v9318_v20 = vmax.f32 %v9317_v22, 0.0  ;;  %v4191_v57 = vpop.eup %4190 }
 0x44f   : > { %v7361_v3 = vmul.f32 %v9316_v26, %v9315_v48  ;;  %v2899_v35 = vsub.f32 2.0, %v2867_v33  ;;  %4200 = vrcp.f32 %v7355_v29  ;;  %v9319_v54 = vmax.f32 %v7100_v19, 0.0  ;;  %v2701_v26 = vpop.permute.xlu0 %2700  ;;  %v4193_v40 = vpop.eup %4192 }
 0x450   : > { %v7375_v6 = vmul.f32 %v3016_v42, %v7086_v7  ;;  %v2900_v48 = vsub.f32 2.0, %v2868_v56  ;;  %v9322_v45 = vmax.f32 %v9321_v5, 0.0  ;;  %v9323_v13 = vmax.f32 %v7095_v31, 0.0 }
 0x451   : > { %v7372_v1 = vmul.f32 %v9319_v54, %v9318_v20  ;;  %v7386_v19 = vmul.f32 %v7351_v47, %v7234_v61  ;;  %v2851_v20 = vmul.f32 %v4191_v57, %v7318_v18  ;;  %v7390_v7 = vsub.f32 %v2761_v59, %v7343_v51  ;;  %v4195_v56 = vpop.eup %4194 }
 0x452   : > { %9320 = vst [vmem:[#allocation140_spill] sm:$0xff] %v7375_v6  ;;  %v7382_v43 = vmul.f32 %v9323_v13, %v9322_v45  ;;  %v7393_v42 = vsub.f32 %v2762_v15, %v7361_v3  ;;  %v3022_v22 = vmul.f32 %v2990_v36, %v2926_v32  ;;  %v7395_v5 = vmul.f32 %v4187_v2, %v2899_v35  ;;  %v4197_v45 = vpop.eup %4196 }
 0x453   : > { %v2932_v31 = vmul.f32 %v4189_v16, %v2900_v48  ;;  %v2852_v13 = vmul.f32 %v4193_v40, %v7321_v4  ;;  %v2883_v54 = vsub.f32 2.0, %v2851_v20  ;;  %v2853_v61 = vmul.f32 %v4195_v56, %v7326_v28 }
 0x454   : > { %9324 = vst [vmem:[#allocation43_spill] sm:$0xff] %v7395_v5  ;;  %4202 = vrcp.f32 %v7390_v7  ;;  %v2763_v33 = vadd.f32 %v2701_v26, %v9273_v12  ;;  %v4199_v59 = vpop.eup %4198  ;;  %v2854_v51 = vmul.f32 %v4197_v45, %v7334_v27  ;;  %v2764_v32 = vadd.f32 %v2701_v26, %v9151_v14 }
 0x455   : > { %v2964_v47 = vmul.f32 %v2932_v31, %v7304_v63  ;;  %v2884_v15 = vsub.f32 2.0, %v2852_v13  ;;  %v4201_v2 = vpop.eup %4200  ;;  %v7404_v16 = vmul.f32 %v4191_v57, %v2883_v54  ;;  %v2885_v36 = vsub.f32 2.0, %v2853_v61 }
 0x456   : > { %v2873_v35 = vmul.f32 %v4199_v59, %v7349_v34  ;;  %4204 = vrcp.f32 %v7393_v42  ;;  %v2886_v6 = vsub.f32 2.0, %v2854_v51  ;;  %v2874_v23 = vmul.f32 %v4201_v2, %v7355_v29 }
 0x457   : > { %v2996_v48 = vsub.f32 2.0, %v2964_v47  ;;  %v2916_v20 = vmul.f32 %v4193_v40, %v2884_v15  ;;  %v7411_v63 = vmul.f32 %v7395_v5, %v7280_v49  ;;  %v7413_v13 = vmul.f32 %v4195_v56, %v2885_v36 }
 0x458   : > { %v2905_v26 = vsub.f32 2.0, %v2873_v35  ;;  %v7416_v57 = vsub.f32 %v2763_v33, %v7382_v43  ;;  %v7420_v54 = vmul.f32 %v7404_v16, %v7318_v18  ;;  %v2918_v40 = vmul.f32 %v4197_v45, %v2886_v6  ;;  %v9333_v45 = vld [vmem:[#allocation9_spill] sm:$0xff] }
 0x459   : > { %9325 = vst [vmem:[#allocation86_spill] sm:$0xff] %v7411_v63  ;;  %v2948_v47 = vmul.f32 %v2916_v20, %v7321_v4  ;;  %v2906_v51 = vsub.f32 2.0, %v2874_v23  ;;  %v3028_v55 = vmul.f32 %v2996_v48, %v2932_v31  ;;  %v7427_v56 = vsub.f32 %v2764_v32, %v7372_v1  ;;  %v2751_v32 = vpop.permute.xlu2 %2750 }
 0x45a   : > { %v4203_v61 = vpop.eup %4202  ;;  %v7424_v49 = vmul.f32 %v4199_v59, %v2905_v26  ;;  %v7431_v33 = vmul.f32 %v7413_v13, %v7326_v28  ;;  %v2950_v18 = vmul.f32 %v2918_v40, %v7334_v27  ;;  %v7435_v23 = vmul.f32 %v3022_v22, %v7134_v17  ;;  %v9328_v22 = vld [vmem:[#allocation65_spill] sm:$0xff] }
 0x45b   : > { %v2980_v36 = vsub.f32 2.0, %v2948_v47  ;;  %v2938_v35 = vmul.f32 %v4201_v2, %v2906_v51  ;;  %v2857_v31 = vmul.f32 %v4203_v61, %v7390_v7  ;;  %4206 = vrcp.f32 %v7416_v57 }
 0x45c   : > { %9326 = vst [vmem:[#allocation90_spill] sm:$0xff] %v7424_v49  ;;  %v4205_v4 = vpop.eup %4204  ;;  %v7443_v59 = vmul.f32 %v7424_v49, %v7349_v34  ;;  %4208 = vrcp.f32 %v7427_v56  ;;  %v9329_v48 = vmax.f32 %v9328_v22, 0.0  ;;  %v9330_v26 = vmax.f32 %v7266_v44, 0.0  ;;  %v2711_v22 = vpop.permute.xlu1 %2710 }
 0x45d   : > { %v2970_v28 = vmul.f32 %v2938_v35, %v7355_v29  ;;  %v2858_v27 = vmul.f32 %v4205_v4, %v7393_v42  ;;  %v3012_v2 = vmul.f32 %v2980_v36, %v2916_v20  ;;  %v2889_v17 = vsub.f32 2.0, %v2857_v31 }
 0x45e   : > { %9327 = vst [vmem:[#allocation61_spill] sm:$0xff] %v7443_v59  ;;  %v7452_v47 = vmul.f32 %v9330_v26, %v9329_v48  ;;  %v7455_v51 = vmul.f32 %v3028_v55, %v7190_v52  ;;  %v2981_v34 = vsub.f32 2.0, %v7431_v33  ;;  %v2982_v6 = vsub.f32 2.0, %v2950_v18  ;;  %v9336_v33 = vld [vmem:[#allocation31_spill] sm:$0xff]  ;;  %v9339_v26 = vld [vmem:[#allocation64_spill] sm:$0xff]  ;;  %v9354_v59 = vld [vmem:[#allocation74_spill] sm:$0xff] }
 0x45f   : > { %v2890_v29 = vsub.f32 2.0, %v2858_v27  ;;  %v3002_v15 = vsub.f32 2.0, %v2970_v28  ;;  %v9334_v49 = vmax.f32 %v9333_v45, 0.0  ;;  %v9335_v20 = vmax.f32 %v7274_v62, 0.0 }
 0x460   : > { %9331 = vst [vmem:[#allocation126_spill] sm:$0xff] %v7452_v47  ;;  %v2783_v31 = vadd.f32 %v2751_v32, %v9273_v12  ;;  %v2784_v44 = vadd.f32 %v2751_v32, %v9151_v14  ;;  %v7467_v52 = vmul.f32 %v4203_v61, %v2889_v17  ;;  %v9337_v18 = vmax.f32 %v9336_v33, 0.0 }
 0x461   : > { %9332 = vst [vmem:[#allocation45_spill] sm:$0xff] %v7455_v51  ;;  %v7462_v36 = vmul.f32 %v9335_v20, %v9334_v49  ;;  %v2922_v55 = vmul.f32 %v4205_v4, %v2890_v29  ;;  %v9338_v28 = vmax.f32 %v6950_v39, 0.0  ;;  %v4207_v45 = vpop.eup %4206  ;;  %v7476_v62 = vmul.f32 %v3012_v2, %v7228_v11  ;;  %v2716_v2 = vpop.permute.xlu0 %2715  ;;  %v9357_v51 = vld [vmem:[#allocation53_spill] sm:$0xff] }
 0x462   : > { %v7479_v49 = vsub.f32 %v2783_v31, %v7452_v47  ;;  %v9340_v61 = vmax.f32 %v9339_v26, 0.0  ;;  %v9341_v4 = vmax.f32 %v6955_v21, 0.0  ;;  %v3014_v29 = vmul.f32 %v2982_v6, %v2918_v40  ;;  %v4209_v33 = vpop.eup %4208  ;;  %v9352_v47 = vld [vmem:[#allocation109_spill] sm:$0xff] }
 0x463   : > { %v7473_v27 = vmul.f32 %v9338_v28, %v9337_v18  ;;  %v7482_v32 = vsub.f32 %v2784_v44, %v7462_v36  ;;  %v2954_v39 = vmul.f32 %v2922_v55, %v7393_v42  ;;  %v2859_v20 = vmul.f32 %v4207_v45, %v7416_v57 }
 0x464   : > { %v7488_v17 = vmul.f32 %v9341_v4, %v9340_v61  ;;  %v2767_v11 = vadd.f32 %v2711_v22, %v9273_v12  ;;  %v3034_v31 = vmul.f32 %v3002_v15, %v2938_v35  ;;  %4210 = vrcp.f32 %v7479_v49 }
 0x465   : > { %v2768_v44 = vadd.f32 %v2711_v22, %v9151_v14  ;;  %v9342_v18 = vmax.f32 %v9272_v53, 0.0  ;;  %v9343_v21 = vmax.f32 %v7149_v24, 0.0  ;;  %v7503_v42 = vmul.f32 %v7467_v52, %v7390_v7 }
 0x466   : > { %v2860_v40 = vmul.f32 %v4209_v33, %v7427_v56  ;;  %v2891_v6 = vsub.f32 2.0, %v2859_v20  ;;  %4212 = vrcp.f32 %v7482_v32  ;;  %v7508_v15 = vsub.f32 %v2767_v11, %v7473_v27 }
 0x467   : > { %v7499_v28 = vmul.f32 %v9343_v21, %v9342_v18  ;;  %v7511_v35 = vsub.f32 %v2768_v44, %v7488_v17  ;;  %v9344_v53 = vmax.f32 %v9271_v8, 0.0  ;;  %v9345_v24 = vmax.f32 %v7144_v10, 0.0  ;;  %v9346_v44 = vld [vmem:[#allocation21_spill] sm:$0xff]  ;;  %v9347_v8 = vld [vmem:[#allocation50_spill] sm:$0xff] }
 0x468   : > { %v2769_v7 = vadd.f32 %v2716_v2, %v9273_v12  ;;  %v2986_v26 = vsub.f32 2.0, %v2954_v39  ;;  %v2892_v61 = vsub.f32 2.0, %v2860_v40  ;;  %v7520_v4 = vmul.f32 %v4207_v45, %v2891_v6  ;;  %v3102_v6 = vpop.permute.xlu2 %3101 }
 0x469   : > { %v7517_v22 = vmul.f32 %v9345_v24, %v9344_v53  ;;  %v2770_v20 = vadd.f32 %v2716_v2, %v9151_v14  ;;  %4214 = vrcp.f32 %v7508_v15  ;;  %v7528_v18 = vadd.s32 128, %v9346_v44  ;;  %v9349_v44 = vld [vmem:[#allocation16_spill] sm:$0xff] }
 0x46a   : > { %v3075_v10 = vadd.s32 128, %v9347_v8  ;;  %v3046_v21 = vmul.f32 %v3014_v29, %v7293_v9  ;;  %v2924_v53 = vmul.f32 %v4209_v33, %v2892_v61  ;;  %v7534_v39 = vmul.f32 %v7520_v4, %v7416_v57  ;;  %v4211_v45 = vpop.eup %4210 }
 0x46b   : > { %v7525_v11 = vsub.f32 %v2769_v7, %v7517_v22  ;;  %4216 = vrcp.f32 %v7511_v35  ;;  %v7538_v2 = vmul.f32 %v3034_v31, %v7330_v60  ;;  %v7541_v40 = vsub.f32 %v2770_v20, %v7499_v28  ;;  %v2726_v31 = vpop.permute.xlu1 %2725 }
 0x46c   : > { %v3013_v24 = vmul.f32 %v2981_v34, %v7413_v13  ;;  %v4213_v9 = vpop.eup %4212  ;;  %v3018_v33 = vmul.f32 %v2986_v26, %v2922_v55  ;;  %v2956_v57 = vmul.f32 %v2924_v53, %v7427_v56  ;;  %v2879_v7 = vmul.f32 %v4211_v45, %v7479_v49 }
 0x46d   : > { %9348 = vst [vmem:[#allocation89_spill] sm:$0xff] %v7538_v2  ;;  %4218 = vrcp.f32 %v7525_v11  ;;  %v2880_v61 = vmul.f32 %v4213_v9, %v7482_v32  ;;  %vm3238_vm1 = vcmp.lt.s32.totalorder %v3075_v10, %v7528_v18  ;;  %v2987_v20 = vsub.f32 2.0, %v7534_v39  ;;  %v9361_v10 = vld [vmem:[#allocation33_spill] sm:$0xff] }
 0x46e   : > { %4220 = vrcp.f32 %v7541_v40  ;;  %v3045_v60 = vmul.f32 %v3013_v24, %v7299_v50  ;;  %v2988_v13 = vsub.f32 2.0, %v2956_v57  ;;  %v2911_v34 = vsub.f32 2.0, %v2879_v7 }
 0x46f   : > { %vm3173_vm10 = vcmp.gt.f32.partialorder %v3102_v6, %v9349_v44  ;;  %v4215_v55 = vpop.eup %4214  ;;  %v2912_v26 = vsub.f32 2.0, %v2880_v61  ;;  %v9350_v8 = vmax.f32 %v9274_v58, 0.0  ;;  %v9351_v48 = vmax.f32 %v7002_v25, 0.0 }
 0x470   : > { %v3333_v56 = vmul.f32 %v3045_v60, %v3045_v60  ;;  %v9353_v2 = vmax.f32 %v9352_v47, 0.0  ;;  %v9355_v50 = vmax.f32 %v9354_v59, 0.0  ;;  %v7566_v57 = vmul.f32 %v4211_v45, %v2911_v34 }
 0x471   : > { %v7558_v29 = vmul.f32 %v9351_v48, %v9350_v8  ;;  %v4217_v39 = vpop.eup %4216  ;;  %v2863_v7 = vmul.f32 %v4215_v55, %v7508_v15  ;;  %vm3174_vm2 = vcmp.gt.f32.partialorder %v3102_v6, %v9357_v51  ;;  %v2773_v61 = vadd.f32 %v2726_v31, %v9273_v12 }
 0x472   : > { %v7564_v24 = vmul.f32 %v9355_v50, %v9353_v2  ;;  %9356 = vst [vmem:[#allocation93_spill] sm:$0xff] %v7566_v57  ;;  %v2944_v60 = vmul.f32 %v4213_v9, %v2912_v26  ;;  %v2864_v25 = vmul.f32 %v4217_v39, %v7511_v35  ;;  %vm3206_vm11 = vcmp.eq.f32.partialorder %v3102_v6, %v9357_v51 }
 0x473   : > { %v4219_v58 = vpop.eup %4218  ;;  %v7573_v47 = vsel %vm3173_vm10, %v3333_v56, 0.0  ;;  %v3020_v59 = vmul.f32 %v2988_v13, %v2924_v53  ;;  %v2895_v48 = vsub.f32 2.0, %v2863_v7  ;;  %v3334_v45 = vmul.f32 %v3046_v21, %v3046_v21  ;;  %vm7592_vm4 = vmand %vm3206_vm11, %vm3238_vm1  ;;  %v2741_v6 = vpop.permute.xlu1 %2740 }
 0x474   : > { %v2865_v2 = vmul.f32 %v4219_v58, %v7525_v11  ;;  %v4221_v34 = vpop.eup %4220  ;;  %v2976_v8 = vmul.f32 %v2944_v60, %v7482_v32  ;;  %v2896_v50 = vsub.f32 2.0, %v2864_v25  ;;  %v2774_v63 = vadd.f32 %v2726_v31, %v9151_v14  ;;  %vm3302_vm8 = vmor %vm3174_vm2, %vm7592_vm4 }
 0x475   : > { %v7579_v5 = vsub.f32 %v2773_v61, %v7558_v29  ;;  %v7583_v9 = vmul.f32 %v7566_v57, %v7479_v49  ;;  %v7585_v26 = vmul.f32 %v4215_v55, %v2895_v48  ;;  %v2866_v53 = vmul.f32 %v4221_v34, %v7541_v40  ;;  %v2731_v49 = vpop.permute.xlu0 %2730 }
 0x476   : > { %v2897_v13 = vsub.f32 2.0, %v2865_v2  ;;  %v3008_v56 = vsub.f32 2.0, %v2976_v8  ;;  %v2928_v21 = vmul.f32 %v4217_v39, %v2896_v50  ;;  %v7597_v31 = vsub.f32 %v2774_v63, %v7564_v24  ;;  %v9364_v8 = vld [vmem:[#allocation111_spill] sm:$0xff] }
 0x477   : > { %9358 = vst [vmem:[#allocation23_spill] sm:$0xff] %v7583_v9  ;;  %4222 = vrcp.f32 %v7579_v5  ;;  %v7602_v55 = vmul.f32 %v7585_v26, %v7508_v15  ;;  %v2898_v7 = vsub.f32 2.0, %v2866_v53  ;;  %v9362_v61 = vmax.f32 %v9361_v10, 0.0 }
 0x478   : > { %v7604_v39 = vmul.f32 %v4219_v58, %v2897_v13  ;;  %v9363_v25 = vmax.f32 %v7200_v0, 0.0  ;;  %v3040_v2 = vmul.f32 %v3008_v56, %v2944_v60  ;;  %v2960_v63 = vmul.f32 %v2928_v21, %v7511_v35 }
 0x479   : > { %4224 = vrcp.f32 %v7597_v31  ;;  %v9365_v50 = vmax.f32 %v9364_v8, 0.0  ;;  %v9366_v57 = vmax.f32 %v7195_v41, 0.0  ;;  %v7621_v58 = vmul.f32 %v3018_v33, %v7361_v3  ;;  %v9369_v8 = vld [vmem:[#allocation70_spill] sm:$0xff] }
 0x47a   : > { %v7610_v48 = vmul.f32 %v9363_v25, %v9362_v61  ;;  %v2930_v53 = vmul.f32 %v4221_v34, %v2898_v7  ;;  %v7625_v0 = vmul.f32 %v7604_v39, %v7525_v11  ;;  %v2775_v35 = vadd.f32 %v2731_v49, %v9273_v12 }
 0x47b   : > { %v7618_v15 = vmul.f32 %v9366_v57, %v9365_v50  ;;  %v2992_v60 = vsub.f32 2.0, %v2960_v63  ;;  %v7632_v13 = vsel %vm3302_vm8, %v3334_v45, 0.0  ;;  %v2776_v41 = vadd.f32 %v2731_v49, %v9151_v14  ;;  %v9367_v57 = vld [vmem:[#allocation58_spill] sm:$0xff] }
 0x47c   : > { %v3078_v3 = vadd.s32 128, %v9367_v57  ;;  %v3052_v33 = vmul.f32 %v3020_v59, %v7372_v1  ;;  %v2962_v34 = vmul.f32 %v2930_v53, %v7541_v40  ;;  %v3019_v56 = vmul.f32 %v2987_v20, %v7520_v4  ;;  %v3117_v1 = vpop.permute.xlu2 %3116 }
 0x47d   : > { %v7639_v11 = vsub.f32 %v2775_v35, %v7618_v15  ;;  %v4223_v32 = vpop.eup %4222  ;;  %v7644_v45 = vmul.f32 %v3040_v2, %v7462_v36  ;;  %v7648_v10 = vsub.f32 %v2776_v41, %v7610_v48  ;;  %v2993_v40 = vsub.f32 2.0, %v7625_v0  ;;  %v9371_v0 = vld [vmem:[#allocation132_spill] sm:$0xff]  ;;  %v9375_v41 = vld [vmem:[#allocation29_spill] sm:$0xff] }
 0x47e   : > { %v2869_v59 = vmul.f32 %v4223_v32, %v7579_v5  ;;  %v3051_v4 = vmul.f32 %v3019_v56, %v7382_v43  ;;  %v3024_v61 = vmul.f32 %v2992_v60, %v2928_v21  ;;  %v2994_v25 = vsub.f32 2.0, %v2962_v34  ;;  %v9373_v21 = vld [vmem:[#allocation12_spill] sm:$0xff] }
 0x47f   : > { %9368 = vst [vmem:[#allocation7_spill] sm:$0xff] %v7644_v45  ;;  %4226 = vrcp.f32 %v7639_v11  ;;  %v4225_v20 = vpop.eup %4224  ;;  %vm3244_vm3 = vcmp.lt.s32.totalorder %v3078_v3, %v7528_v18  ;;  %vm3179_vm6 = vcmp.gt.f32.partialorder %v3117_v1, %v9349_v44  ;;  %vm3180_vm12 = vcmp.gt.f32.partialorder %v3117_v1, %v9357_v51 }
 0x480   : > { %4228 = vrcp.f32 %v7648_v10  ;;  %v2870_v36 = vmul.f32 %v4225_v20, %v7597_v31  ;;  %v2901_v2 = vsub.f32 2.0, %v2869_v59  ;;  %v3339_v63 = vmul.f32 %v3051_v4, %v3051_v4  ;;  %v2746_v59 = vpop.permute.xlu0 %2745 }
 0x481   : > { %v9370_v50 = vmax.f32 %v9369_v8, 0.0  ;;  %v9372_v35 = vmax.f32 %v9371_v0, 0.0  ;;  %v9374_v60 = vmax.f32 %v9373_v21, 0.0  ;;  %v9376_v57 = vmax.f32 %v9375_v41, 0.0 }
 0x482   : > { %v2779_v56 = vadd.f32 %v2741_v6, %v9273_v12  ;;  %v2902_v7 = vsub.f32 2.0, %v2870_v36  ;;  %v7672_v49 = vmul.f32 %v4223_v32, %v2901_v2  ;;  %vm3212_vm13 = vcmp.eq.f32.partialorder %v3117_v1, %v9357_v51  ;;  %v9380_v2 = vld [vmem:[#allocation46_spill] sm:$0xff] }
 0x483   : > { %v7663_v43 = vmul.f32 %v9372_v35, %v9370_v50  ;;  %v7669_v34 = vmul.f32 %v9376_v57, %v9374_v60  ;;  %v7675_v4 = vsel %vm3179_vm6, %v3339_v63, 0.0  ;;  %v3026_v8 = vmul.f32 %v2994_v25, %v2930_v53  ;;  %v9377_v35 = vld [vmem:[#allocation17_spill] sm:$0xff]  ;;  %vm7710_vm14 = vmand %vm3212_vm13, %vm3244_vm3 }
 0x484   : > { %v2780_v50 = vadd.f32 %v2741_v6, %v9151_v14  ;;  %v9378_v21 = vmax.f32 %v9377_v35, 0.0  ;;  %v9379_v60 = vmax.f32 %v7259_v30, 0.0  ;;  %v2934_v36 = vmul.f32 %v4225_v20, %v2902_v7  ;;  %v3132_v35 = vpop.permute.xlu2 %3131  ;;  %vm3308_vm5 = vmor %vm3180_vm12, %vm7710_vm14 }
 0x485   : > { %v7679_v0 = vsub.f32 %v2779_v56, %v7663_v43  ;;  %v4227_v57 = vpop.eup %4226  ;;  %v3340_v32 = vmul.f32 %v3052_v33, %v3052_v33  ;;  %v9381_v45 = vmax.f32 %v9380_v2, 0.0  ;;  %v9382_v63 = vmax.f32 %v7251_v37, 0.0 }
 0x486   : > { %v7685_v41 = vmul.f32 %v9379_v60, %v9378_v21  ;;  %v2781_v53 = vadd.f32 %v2746_v59, %v9273_v12  ;;  %v4229_v6 = vpop.eup %4228  ;;  %v2871_v25 = vmul.f32 %v4227_v57, %v7639_v11  ;;  %v7696_v56 = vsub.f32 %v2780_v50, %v7669_v34 }
 0x487   : > { %v7691_v9 = vmul.f32 %v9382_v63, %v9381_v45  ;;  %4230 = vrcp.f32 %v7679_v0  ;;  %v2782_v30 = vadd.f32 %v2746_v59, %v9151_v14  ;;  %v7702_v33 = vmul.f32 %v7672_v49, %v7579_v5  ;;  %v7717_v14 = vpop.permute.xlu1 %3091 }
 0x488   : > { %v2966_v37 = vmul.f32 %v2934_v36, %v7597_v31  ;;  %v2872_v7 = vmul.f32 %v4229_v6, %v7648_v10  ;;  %v2903_v20 = vsub.f32 2.0, %v2871_v25  ;;  %4232 = vrcp.f32 %v7696_v56  ;;  %v9385_v31 = vld [vmem:[#allocation150_spill] sm:$0xff] }
 0x489   : > { %v7715_v45 = vsub.f32 %v2781_v53, %v7691_v9  ;;  %v7721_v5 = vsub.f32 %v2782_v30, %v7685_v41  ;;  %v3081_v59 = vadd.s32 128, %v9385_v31  ;;  %v3025_v21 = vmul.f32 %v2993_v40, %v7604_v39 }
 0x48a   : > { %v2998_v3 = vsub.f32 2.0, %v2966_v37  ;;  %v2904_v50 = vsub.f32 2.0, %v2872_v7  ;;  %v7727_v60 = vmul.f32 %v3024_v61, %v7488_v17  ;;  %v3058_v2 = vmul.f32 %v3026_v8, %v7499_v28  ;;  %v9386_v28 = vld [vmem:[#allocation115_spill] sm:$0xff]  ;;  %v9387_v37 = vld [vmem:[#allocation28_spill] sm:$0xff] }
 0x48b   : > { %4234 = vrcp.f32 %v7715_v45  ;;  %v7730_v63 = vmul.f32 %v4227_v57, %v2903_v20  ;;  %v7737_v30 = vsel %vm3308_vm5, %v3340_v32, 0.0  ;;  %v3057_v39 = vmul.f32 %v3025_v21, %v7517_v22 }
 0x48c   : > { %4236 = vrcp.f32 %v7721_v5  ;;  %v3030_v53 = vmul.f32 %v2998_v3, %v2934_v36  ;;  %v2936_v25 = vmul.f32 %v4229_v6, %v2904_v50  ;;  %v2997_v17 = vsub.f32 2.0, %v7702_v33  ;;  %v7747_v36 = vpop.permute.xlu0 %3096 }
 0x48d   : > { %v4231_v40 = vpop.eup %4230  ;;  %vm3250_vm15 = vcmp.lt.s32.totalorder %v3081_v59, %v7528_v18  ;;  %vm3218_vm7 = vcmp.eq.f32.partialorder %v3132_v35, %v9357_v51  ;;  %v3073_v61 = vadd.s32 128, %v9386_v28  ;;  %vm3185_vm0 = vcmp.gt.f32.partialorder %v3132_v35, %v9349_v44 }
 0x48e   : > { %v2968_v1 = vmul.f32 %v2936_v25, %v7648_v10  ;;  %v2875_v8 = vmul.f32 %v4231_v40, %v7679_v0  ;;  %v3345_v57 = vmul.f32 %v3057_v39, %v3057_v39  ;;  %v4233_v32 = vpop.eup %4232  ;;  %v2967_v22 = vmul.f32 %v7730_v63, %v7639_v11  ;;  %vm3282_vm1 = vmand %vm3218_vm7, %vm3250_vm15 }
 0x48f   : > { %vm3186_vm9 = vcmp.gt.f32.partialorder %v3132_v35, %v9357_v51  ;;  %v3346_v6 = vmul.f32 %v3058_v2, %v3058_v2  ;;  %v9388_v7 = vsub.f32 2.0, %v7238_v38  ;;  %v7756_v10 = vmul.f32 %v3030_v53, %v7564_v24  ;;  %v9389_v38 = vld [vmem:[#allocation38_spill] sm:$0xff]  ;;  %v7773_v28 = vpop.permute.xlu1 %3106 }
 0x490   : > { %v2876_v31 = vmul.f32 %v4233_v32, %v7696_v56  ;;  %v2907_v3 = vsub.f32 2.0, %v2875_v8  ;;  %v7763_v11 = vsel %vm3185_vm0, %v3345_v57, 0.0  ;;  %vm3234_vm10 = vcmp.lt.s32.totalorder %v3073_v61, %v7528_v18  ;;  %vm3314_vm11 = vmor %vm3186_vm9, %vm3282_vm1 }
 0x491   : > { %v3009_v12 = vmul.f32 %v9388_v7, %v9387_v37  ;;  %v4235_v20 = vpop.eup %4234  ;;  %vm3169_vm2 = vcmp.gt.f32.partialorder %v7717_v14, %v9349_v44  ;;  %v3000_v24 = vsub.f32 2.0, %v2968_v1  ;;  %v2999_v8 = vsub.f32 2.0, %v2967_v22  ;;  %v9390_v1 = vld [vmem:[#allocation134_spill] sm:$0xff] }
 0x492   : > { %v4237_v50 = vpop.eup %4236  ;;  %v2877_v21 = vmul.f32 %v4235_v20, %v7715_v45  ;;  %v2908_v53 = vsub.f32 2.0, %v2876_v31  ;;  %v7770_v39 = vmul.f32 %v4231_v40, %v2907_v3  ;;  %vm3202_vm4 = vcmp.eq.f32.partialorder %v7717_v14, %v9357_v51 }
 0x493   : > { %v3041_v2 = vmul.f32 %v3009_v12, %v9389_v38  ;;  %v2878_v59 = vmul.f32 %v4237_v50, %v7721_v5  ;;  %v7779_v38 = vsel %vm3314_vm11, %v3346_v6, 0.0  ;;  %vm3170_vm8 = vcmp.gt.f32.partialorder %v7717_v14, %v9357_v51  ;;  %vm3266_vm3 = vmand %vm3202_vm4, %vm3234_vm10 }
 0x494   : > { %v2909_v57 = vsub.f32 2.0, %v2877_v21  ;;  %v2940_v7 = vmul.f32 %v4233_v32, %v2908_v53  ;;  %v3074_v22 = vadd.s32 128, %v9390_v1  ;;  %v9391_v32 = vsub.f32 2.0, %v7420_v54  ;;  %vm7813_vm13 = vmor %vm3170_vm8, %vm3266_vm3 }
 0x495   : > { %v3329_v37 = vmul.f32 %v3041_v2, %v3041_v2  ;;  %v2910_v12 = vsub.f32 2.0, %v2878_v59  ;;  %v3032_v31 = vmul.f32 %v3000_v24, %v2936_v25  ;;  %v7798_v3 = vmul.f32 %v7770_v39, %v7679_v0  ;;  %v9395_v25 = vld [vmem:[#allocation112_spill] sm:$0xff]  ;;  %v3147_v24 = vpop.permute.xlu2 %3146 }
 0x496   : > { %v7783_v40 = vmul.f32 %v4235_v20, %v2909_v57  ;;  %v3011_v6 = vmul.f32 %v9391_v32, %v7404_v16  ;;  %v2972_v20 = vmul.f32 %v2940_v7, %v7696_v56  ;;  %vm3236_vm6 = vcmp.lt.s32.totalorder %v3074_v22, %v7528_v18  ;;  %v9394_v56 = vld [vmem:[#allocation149_spill] sm:$0xff] }
 0x497   : > { %v7790_v35 = vsel %vm3169_vm2, %v3329_v37, 0.0  ;;  %v2942_v61 = vmul.f32 %v4237_v50, %v2910_v12  ;;  %vm3171_vm12 = vcmp.gt.f32.partialorder %v7747_v36, %v9349_v44  ;;  %vm3172_vm14 = vcmp.gt.f32.partialorder %v7747_v36, %v9357_v51 }
 0x498   : > { %v7803_v21 = vmul.f32 %v7783_v40, %v7715_v45  ;;  %v3043_v2 = vmul.f32 %v3011_v6, %v7224_v46  ;;  %v3004_v16 = vsub.f32 2.0, %v2972_v20  ;;  %vm3204_vm5 = vcmp.eq.f32.partialorder %v7747_v36, %v9357_v51  ;;  %v7821_v46 = vpop.permute.xlu0 %3111  ;;  %v9396_v36 = vld [vmem:[#allocation66_spill] sm:$0xff] }
 0x499   : > { %v2974_v54 = vmul.f32 %v2942_v61, %v7721_v5  ;;  %v3330_v45 = vmul.f32 %v9394_v56, %v9394_v56  ;;  %vm3268_vm15 = vmand %vm3204_vm5, %vm3236_vm6  ;;  %v3332_v14 = vmul.f32 %v7476_v62, %v7476_v62  ;;  %v3084_v50 = vadd.s32 128, %v9395_v25  ;;  %v9402_v56 = vld [vmem:[#allocation51_spill] sm:$0xff] }
 0x49a   : > { %v3331_v5 = vmul.f32 %v3043_v2, %v3043_v2  ;;  %v3064_v53 = vmul.f32 %v3032_v31, %v7610_v48  ;;  %v3003_v59 = vsub.f32 2.0, %v7798_v3  ;;  %vm3300_vm7 = vmor %vm3172_vm14, %vm3268_vm15  ;;  %v3031_v37 = vmul.f32 %v2999_v8, %v7730_v63  ;;  %v7845_v63 = vpop.permute.xlu1 %3121 }
 0x49b   : > { %v3006_v57 = vsub.f32 2.0, %v2974_v54  ;;  %v3005_v12 = vsub.f32 2.0, %v7803_v21  ;;  %v7834_v1 = vsel %vm7813_vm13, %v3330_v45, 0.0  ;;  %v7841_v22 = vsel %vm3300_vm7, %v3332_v14, 0.0 }
 0x49c   : > { %v7839_v62 = vsel %vm3171_vm12, %v3331_v5, 0.0  ;;  %v3036_v48 = vmul.f32 %v3004_v16, %v2940_v7  ;;  %vm3256_vm0 = vcmp.lt.s32.totalorder %v3084_v50, %v7528_v18  ;;  %vm3191_vm9 = vcmp.gt.f32.partialorder %v3147_v24, %v9349_v44  ;;  %v9397_v7 = vld [vmem:[#allocation148_spill] sm:$0xff] }
 0x49d   : > { %v3038_v32 = vmul.f32 %v3006_v57, %v2942_v61  ;;  %v3426_v8 = vmax.f32 %v7834_v1, %v7841_v22  ;;  %v3063_v6 = vmul.f32 %v3031_v37, %v7618_v15  ;;  %vm3224_vm1 = vcmp.eq.f32.partialorder %v3147_v24, %v9357_v51  ;;  %v9398_v61 = vld [vmem:[#allocation42_spill] sm:$0xff]  ;;  %v9403_v5 = vld [vmem:[#allocation140_spill] sm:$0xff] }
 0x49e   : > { %v3076_v31 = vadd.s32 128, %v9396_v36  ;;  %v3425_v20 = vmax.f32 %v7790_v35, %v7839_v62  ;;  %vm3192_vm10 = vcmp.gt.f32.partialorder %v3147_v24, %v9357_v51  ;;  %v9399_v21 = vsub.f32 2.0, %v9398_v61  ;;  %vm7860_vm11 = vmand %vm3224_vm1, %vm3256_vm0 }
 0x49f   : > { %vm3176_vm2 = vcmp.gt.f32.partialorder %v7773_v28, %v9357_v51  ;;  %v3351_v15 = vmul.f32 %v3063_v6, %v3063_v6  ;;  %v3352_v54 = vmul.f32 %v3064_v53, %v3064_v53  ;;  %vm3208_vm8 = vcmp.eq.f32.partialorder %v7773_v28, %v9357_v51  ;;  %v9404_v53 = vld [vmem:[#allocation129_spill] sm:$0xff]  ;;  %vm3320_vm5 = vmor %vm3192_vm10, %vm7860_vm11 }
 0x4a0   : > { %v3015_v2 = vmul.f32 %v9399_v21, %v9397_v7  ;;  %vm3240_vm4 = vcmp.lt.s32.totalorder %v3076_v31, %v7528_v18  ;;  %v3070_v0 = vmul.f32 %v3038_v32, %v7685_v41  ;;  %vm3175_vm3 = vcmp.gt.f32.partialorder %v7773_v28, %v9349_v44  ;;  %v7888_v36 = vpop.permute.xlu0 %3126  ;;  %v7898_v7 = vpop.permute.xlu2 %3161 }
 0x4a1   : > { %vm3272_vm6 = vmand %vm3208_vm8, %vm3240_vm4  ;;  %v3336_v14 = vmul.f32 %v9403_v5, %v9403_v5  ;;  %v7875_v25 = vsel %vm3191_vm9, %v3351_v15, 0.0  ;;  %v3428_v50 = vmax.f32 %v3426_v8, %v7632_v13  ;;  %v3077_v57 = vadd.s32 128, %v9404_v53 }
 0x4a2   : > { %v3047_v45 = vmul.f32 %v3015_v2, %v9402_v56  ;;  %vm3304_vm12 = vmor %vm3176_vm2, %vm3272_vm6  ;;  %v9405_v41 = vsub.f32 2.0, %v7503_v42  ;;  %vm3178_vm13 = vcmp.gt.f32.partialorder %v7821_v46, %v9357_v51  ;;  %vm3210_vm14 = vcmp.eq.f32.partialorder %v7821_v46, %v9357_v51  ;;  %v9406_v42 = vld [vmem:[#allocation87_spill] sm:$0xff]  ;;  %v9407_v56 = vld [vmem:[#allocation14_spill] sm:$0xff] }
 0x4a3   : > { %v7882_v6 = vsel %vm3304_vm12, %v3336_v14, 0.0  ;;  %v3427_v8 = vmax.f32 %v3425_v20, %v7573_v47  ;;  %vm3242_vm15 = vcmp.lt.s32.totalorder %v3077_v57, %v7528_v18  ;;  %vm3177_vm7 = vcmp.gt.f32.partialorder %v7821_v46, %v9349_v44 }
 0x4a4   : > { %v3017_v37 = vmul.f32 %v9405_v41, %v7467_v52  ;;  %v3335_v32 = vmul.f32 %v3047_v45, %v3047_v45  ;;  %v3430_v52 = vmax.f32 %v3428_v50, %v7882_v6  ;;  %vm3274_vm0 = vmand %vm3210_vm14, %vm3242_vm15  ;;  %v3338_v24 = vmul.f32 %v7621_v58, %v7621_v58 }
 0x4a5   : > { %v3037_v20 = vmul.f32 %v3005_v12, %v7783_v40  ;;  %v7911_v21 = vmul.f32 %v3036_v48, %v7669_v34  ;;  %v7913_v2 = vsel %vm3320_vm5, %v3352_v54, 0.0  ;;  %vm3306_vm9 = vmor %vm3178_vm13, %vm3274_vm0  ;;  %v7922_v45 = vadd.s32 128, %v9407_v56  ;;  %v7927_v34 = vpop.permute.xlu1 %3136  ;;  %v9408_v48 = vld [vmem:[#allocation76_spill] sm:$0xff]  ;;  %v9409_v54 = vld [vmem:[#allocation123_spill] sm:$0xff] }
 0x4a6   : > { %v3049_v31 = vmul.f32 %v3017_v37, %v9406_v42  ;;  %v7903_v61 = vsel %vm3175_vm3, %v3335_v32, 0.0  ;;  %v7919_v15 = vsel %vm3306_vm9, %v3338_v24, 0.0  ;;  %vm3197_vm1 = vcmp.gt.f32.partialorder %v7898_v7, %v9349_v44 }
 0x4a7   : > { %v3429_v16 = vmax.f32 %v3427_v8, %v7903_v61  ;;  %v3069_v58 = vmul.f32 %v3037_v20, %v7691_v9  ;;  %v3432_v12 = vmax.f32 %v3430_v52, %v7919_v15  ;;  %v3079_v46 = vadd.s32 128, %v9408_v48  ;;  %v9411_v9 = vld [vmem:[#allocation40_spill] sm:$0xff]  ;;  %v9413_v52 = vld [vmem:[#allocation6_spill] sm:$0xff]  ;;  %v9416_v48 = vld [vmem:[#allocation43_spill] sm:$0xff] }
 0x4a8   : > { %v3337_v28 = vmul.f32 %v3049_v31, %v3049_v31  ;;  %v9410_v5 = vsub.f32 2.0, %v7386_v19  ;;  %v7937_v57 = vmul.f32 %v3070_v0, %v3070_v0  ;;  %vm3182_vm10 = vcmp.gt.f32.partialorder %v7845_v63, %v9357_v51 }
 0x4a9   : > { %v3357_v53 = vmul.f32 %v3069_v58, %v3069_v58  ;;  %vm3246_vm2 = vcmp.lt.s32.totalorder %v3079_v46, %v7528_v18  ;;  %vm3181_vm11 = vcmp.gt.f32.partialorder %v7845_v63, %v9349_v44  ;;  %vm3214_vm4 = vcmp.eq.f32.partialorder %v7845_v63, %v9357_v51  ;;  %v9415_v58 = vld [vmem:[#allocation24_spill] sm:$0xff]  ;;  %v9417_v46 = vld [vmem:[#allocation86_spill] sm:$0xff] }
 0x4aa   : > { %v7929_v40 = vsel %vm3177_vm7, %v3337_v28, 0.0  ;;  %v3021_v14 = vmul.f32 %v9410_v5, %v9409_v54  ;;  %vm3278_vm8 = vmand %vm3214_vm4, %vm3246_vm2  ;;  %v3342_v0 = vmul.f32 %v7435_v23, %v7435_v23  ;;  %v3434_v32 = vmax.f32 %v3432_v12, %v7737_v30 }
 0x4ab   : > { %v3431_v50 = vmax.f32 %v3429_v16, %v7929_v40  ;;  %v7947_v19 = vsel %vm3197_vm1, %v3357_v53, 0.0  ;;  %vm3310_vm3 = vmor %vm3182_vm10, %vm3278_vm8  ;;  %v3080_v42 = vadd.s32 128, %v9413_v52  ;;  %v9414_v31 = vsub.f32 2.0, %v7602_v55  ;;  %v3142_v16 = vpop.permute.xlu0 %3141 }
 0x4ac   : > { %v3053_v41 = vmul.f32 %v3021_v14, %v9411_v9  ;;  %9412 = vst [vmem:[#allocation48_spill] sm:$0xff] %v7947_v19  ;;  %vm3183_vm6 = vcmp.gt.f32.partialorder %v7888_v36, %v9349_v44  ;;  %v7959_v20 = vsel %vm3310_vm3, %v3342_v0, 0.0  ;;  %vm3184_vm12 = vcmp.gt.f32.partialorder %v7888_v36, %v9357_v51  ;;  %v9421_v9 = vld [vmem:[#allocation155_spill] sm:$0xff] }
 0x4ad   : > { %v3433_v37 = vmax.f32 %v3431_v50, %v7675_v4  ;;  %v3023_v24 = vmul.f32 %v9414_v31, %v7585_v26  ;;  %vm3216_vm13 = vcmp.eq.f32.partialorder %v7888_v36, %v9357_v51  ;;  %v3344_v23 = vmul.f32 %v7727_v60, %v7727_v60  ;;  %v9420_v50 = vld [vmem:[#allocation80_spill] sm:$0xff]  ;;  %v3152_v0 = vpop.permute.xlu1 %3151 }
 0x4ae   : > { %v3341_v8 = vmul.f32 %v3053_v41, %v3053_v41  ;;  %v3436_v26 = vmax.f32 %v3434_v32, %v7959_v20  ;;  %vm3248_vm14 = vcmp.lt.s32.totalorder %v3080_v42, %v7528_v18  ;;  %v3082_v12 = vadd.s32 128, %v9415_v58  ;;  %v9424_v58 = vld [vmem:[#allocation61_spill] sm:$0xff] }
 0x4af   : > { %v3055_v28 = vmul.f32 %v3023_v24, %v7473_v27  ;;  %vm3280_vm5 = vmand %vm3216_vm13, %vm3248_vm14  ;;  %v9418_v60 = vsub.f32 2.0, %v9417_v46  ;;  %vm3187_vm15 = vcmp.gt.f32.partialorder %v7927_v34, %v9349_v44  ;;  %vm3188_vm0 = vcmp.gt.f32.partialorder %v7927_v34, %v9357_v51  ;;  %v9419_v27 = vld [vmem:[#allocation45_spill] sm:$0xff] }
 0x4b0   : > { %v7970_v55 = vsel %vm3181_vm11, %v3341_v8, 0.0  ;;  %vm3312_vm7 = vmor %vm3184_vm12, %vm3280_vm5  ;;  %vm3220_vm9 = vcmp.eq.f32.partialorder %v7927_v34, %v9357_v51  ;;  %v3348_v5 = vmul.f32 %v9419_v27, %v9419_v27  ;;  %vm3262_vm1 = vcmp.lt.s32.totalorder %v7922_v45, %v7528_v18 }
 0x4b1   : > { %v3435_v56 = vmax.f32 %v3433_v37, %v7970_v55  ;;  %v3027_v54 = vmul.f32 %v9418_v60, %v9416_v48  ;;  %v3343_v63 = vmul.f32 %v3055_v28, %v3055_v28  ;;  %vm3230_vm10 = vcmp.eq.f32.partialorder %v7898_v7, %v9357_v51 }
 0x4b2   : > { %v7992_v14 = vsel %vm3312_vm7, %v3344_v23, 0.0  ;;  %vm3252_vm2 = vcmp.lt.s32.totalorder %v3082_v12, %v7528_v18  ;;  %v3083_v41 = vadd.s32 128, %v9421_v9  ;;  %v3029_v8 = vmul.f32 %v2997_v17, %v7672_v49  ;;  %v9422_v23 = vld [vmem:[#allocation91_spill] sm:$0xff] }
 0x4b3   : > { %v3059_v53 = vmul.f32 %v3027_v54, %v9420_v50  ;;  %v8000_v37 = vsel %vm3183_vm6, %v3343_v63, 0.0  ;;  %v3438_v32 = vmax.f32 %v3436_v26, %v7992_v14  ;;  %vm3284_vm11 = vmand %vm3220_vm9, %vm3252_vm2  ;;  %vm3189_vm4 = vcmp.gt.f32.partialorder %v3142_v16, %v9349_v44  ;;  %v9426_v63 = vld [vmem:[#allocation83_spill] sm:$0xff]  ;;  %v9427_v50 = vld [vmem:[#allocation89_spill] sm:$0xff] }
 0x4b4   : > { %v3437_v52 = vmax.f32 %v3435_v56, %v8000_v37  ;;  %vm3316_vm8 = vmor %vm3188_vm0, %vm3284_vm11  ;;  %vm3254_vm3 = vcmp.lt.s32.totalorder %v3083_v41, %v7528_v18  ;;  %vm3190_vm6 = vcmp.gt.f32.partialorder %v3142_v16, %v9357_v51  ;;  %vm3198_vm12 = vcmp.gt.f32.partialorder %v7898_v7, %v9357_v51  ;;  %v9428_v9 = vld [vmem:[#allocation27_spill] sm:$0xff] }
 0x4b5   : > { %v3347_v42 = vmul.f32 %v3059_v53, %v3059_v53  ;;  %v8015_v36 = vsel %vm3316_vm8, %v3348_v5, 0.0  ;;  %v3440_v49 = vmax.f32 %v3438_v32, %v7779_v38  ;;  %v3061_v33 = vmul.f32 %v3029_v8, %v7558_v29  ;;  %v9423_v29 = vld [vmem:[#allocation90_spill] sm:$0xff] }
 0x4b6   : > { %vm3222_vm13 = vcmp.eq.f32.partialorder %v3142_v16, %v9357_v51  ;;  %v3439_v31 = vmax.f32 %v3437_v52, %v7763_v11  ;;  %v3350_v24 = vmul.f32 %v7756_v10, %v7756_v10  ;;  %v3085_v26 = vadd.s32 128, %v9422_v23  ;;  %v3157_v10 = vpop.permute.xlu0 %3156 }
 0x4b7   : > { %v8023_v17 = vsel %vm3187_vm15, %v3347_v42, 0.0  ;;  %vm3286_vm14 = vmand %vm3222_vm13, %vm3254_vm3  ;;  %v3442_v28 = vmax.f32 %v3440_v49, %v8015_v36  ;;  %v3349_v56 = vmul.f32 %v3061_v33, %v3061_v33  ;;  %v9425_v12 = vsub.f32 2.0, %v9424_v58  ;;  %v3167_v33 = vpop.permute.xlu1 %3166  ;;  %v9436_v58 = vld [vmem:[#allocation77_spill] sm:$0xff] }
 0x4b8   : > { %vm3318_vm5 = vmor %vm3190_vm6, %vm3286_vm14  ;;  %vm3193_vm7 = vcmp.gt.f32.partialorder %v3152_v0, %v9349_v44  ;;  %v3441_v34 = vmax.f32 %v3439_v31, %v8023_v17  ;;  %vm3258_vm15 = vcmp.lt.s32.totalorder %v3085_v26, %v7528_v18  ;;  %vm3194_vm0 = vcmp.gt.f32.partialorder %v3152_v0, %v9357_v51  ;;  %v9432_v26 = vld [vmem:[#allocation93_spill] sm:$0xff] }
 0x4b9   : > { %v3033_v48 = vmul.f32 %v9425_v12, %v9423_v29  ;;  %v8035_v46 = vsel %vm3318_vm5, %v3350_v24, 0.0  ;;  %v8041_v60 = vsel %vm3189_vm4, %v3349_v56, 0.0  ;;  %vm3226_vm9 = vcmp.eq.f32.partialorder %v3152_v0, %v9357_v51  ;;  %vm8067_vm6 = vmand %vm3230_vm10, %vm3262_vm1  ;;  %v9431_v24 = vld [vmem:[#allocation97_spill] sm:$0xff]  ;;  %v9435_v0 = vld [vmem:[#allocation22_spill] sm:$0xff] }
 0x4ba   : > { %v3444_v54 = vmax.f32 %v3442_v28, %v8035_v46  ;;  %v3443_v5 = vmax.f32 %v3441_v34, %v8041_v60  ;;  %vm3290_vm2 = vmand %vm3226_vm9, %vm3258_vm15  ;;  %v3354_v53 = vmul.f32 %v9427_v50, %v9427_v50  ;;  %v3086_v41 = vadd.s32 128, %v9428_v9  ;;  %v9433_v28 = vld [vmem:[#allocation23_spill] sm:$0xff]  ;;  %v9438_v34 = vld [vmem:[#allocation78_spill] sm:$0xff] }
 0x4bb   : > { %v3065_v27 = vmul.f32 %v3033_v48, %v9426_v63  ;;  %v3035_v16 = vmul.f32 %v3003_v59, %v7770_v39  ;;  %vm3322_vm11 = vmor %vm3194_vm0, %vm3290_vm2  ;;  %vm3195_vm4 = vcmp.gt.f32.partialorder %v3157_v10, %v9349_v44  ;;  %vm3196_vm8 = vcmp.gt.f32.partialorder %v3157_v10, %v9357_v51  ;;  %v9437_v48 = vld [vmem:[#allocation100_spill] sm:$0xff]  ;;  %v9442_v9 = vld [vmem:[#allocation7_spill] sm:$0xff] }
 0x4bc   : > { %v3446_v8 = vmax.f32 %v3444_v54, %v7913_v2  ;;  %v8056_v52 = vsel %vm3322_vm11, %v3354_v53, 0.0  ;;  %v3445_v42 = vmax.f32 %v3443_v5, %v7875_v25  ;;  %vm3260_vm3 = vcmp.lt.s32.totalorder %v3086_v41, %v7528_v18 }
 0x4bd   : > { %v3353_v32 = vmul.f32 %v3065_v27, %v3065_v27  ;;  %v3067_v49 = vmul.f32 %v3035_v16, %v7663_v43  ;;  %vm3228_vm13 = vcmp.eq.f32.partialorder %v3157_v10, %v9357_v51  ;;  %v3356_v43 = vmul.f32 %v7911_v21, %v7911_v21  ;;  %v9441_v27 = vld [vmem:[#allocation126_spill] sm:$0xff] }
 0x4be   : > { %v3448_v59 = vmax.f32 %v3446_v8, %v8056_v52  ;;  %vm3292_vm14 = vmand %vm3228_vm13, %vm3260_vm3  ;;  %v3088_v23 = vadd.s32 128, %v9431_v24  ;;  %v9434_v56 = vsub.f32 2.0, %v9433_v28  ;;  %v1853_v12 = vmax.f32 %v9436_v58, %v9435_v0 }
 0x4bf   : > { %v8073_v3 = vsel %vm3193_vm7, %v3353_v32, 0.0  ;;  %v3355_v31 = vmul.f32 %v3067_v49, %v3067_v49  ;;  %v1854_v54 = vmax.f32 %v9438_v34, %v9437_v48  ;;  %vm3324_vm1 = vmor %vm3196_vm8, %vm3292_vm14  ;;  %vm3200_vm10 = vcmp.gt.f32.partialorder %v3167_v33, %v9357_v51 }
 0x4c0   : > { %v3447_v45 = vmax.f32 %v3445_v42, %v8073_v3  ;;  %v3039_v29 = vmul.f32 %v9434_v56, %v9432_v26  ;;  %vm3232_vm5 = vcmp.eq.f32.partialorder %v3167_v33, %v9357_v51  ;;  %vm3326_vm7 = vmor %vm3198_vm12, %vm8067_vm6  ;;  %v8101_v63 = vsel %vm3324_vm1, %v3356_v43, 0.0 }
 0x4c1   : > { %v8099_v21 = vsel %vm3195_vm4, %v3355_v31, 0.0  ;;  %9440 = vst [vmem:[#allocation96_spill] sm:$0xff] %v8101_v63  ;;  %vm3264_vm15 = vcmp.lt.s32.totalorder %v3088_v23, %v7528_v18  ;;  %v3450_v53 = vmax.f32 %v3448_v59, %v8101_v63  ;;  %vm3199_vm0 = vcmp.gt.f32.partialorder %v3167_v33, %v9349_v44 }
 0x4c2   : > { %9439 = vst [vmem:[#allocation92_spill] sm:$0xff] %v8099_v21  ;;  %v3071_v5 = vmul.f32 %v3039_v29, %v9441_v27  ;;  %v3449_v50 = vmax.f32 %v3447_v45, %v8099_v21  ;;  %vm3296_vm9 = vmand %vm3232_vm5, %vm3264_vm15  ;;  %v3360_v51 = vmul.f32 %v9442_v9, %v9442_v9  ;;  %v8111_v7 = vsel %vm3326_vm7, %v7937_v57, 0.0 }
 0x4c3   : > { %9443 = vst [vmem:[#allocation157_spill] sm:$0xff] %v8111_v7  ;;  %vm3328_vm12 = vmor %vm3200_vm10, %vm3296_vm9  ;;  %v3452_v16 = vmax.f32 %v3450_v53, %v8111_v7  ;;  %v1855_v8 = vmax.f32 %v1853_v12, 0.0  ;;  %v1856_v42 = vmax.f32 %v1854_v54, 0.0  ;;  %v9452_v7 = vld [vmem:[#allocation44_spill] sm:$0xff]  ;;  %vm3942_vm2 = vcmask 1040384  }
 0x4c4   : > { %v3359_v10 = vmul.f32 %v3071_v5, %v3071_v5  ;;  %v8113_v41 = vsel %vm3328_vm12, %v3360_v51, 0.0  ;;  %v3451_v18 = vmax.f32 %v3449_v50, %v7947_v19  ;;  %v9453_v19 = vld [vmem:[#allocation72_spill] sm:$0xff] }
 0x4c5   : > { %9444 = vst [vmem:[#allocation49_spill] sm:$0xff] %v8113_v41  ;;  %v3454_v49 = vmax.f32 %v3452_v16, %v8113_v41 }
 0x4c6   : > { %v8117_v32 = vsel %vm3199_vm0, %v3359_v10, 0.0 }
 0x4c7   : > { %9445 = vst [vmem:[#allocation95_spill] sm:$0xff] %v8117_v32  ;;  %v3453_v44 = vmax.f32 %v3451_v18, %v8117_v32  ;;  %v3456_v39 = vmax.f32 %v1856_v42, %v3454_v49 }
 0x4c9   : > { %v3455_v33 = vmax.f32 %v1855_v8, %v3453_v44  ;;  %v3463_v59 = vrot.slane %v3456_v39, 4 }
 0x4cb   : > { %v3457_v57 = vrot.slane %v3455_v33, 4  ;;  %v3464_v45 = vmax.f32 %v3456_v39, %v3463_v59 }
 0x4cd   : > { %v3458_v43 = vmax.f32 %v3455_v33, %v3457_v57  ;;  %v3465_v24 = vrot.slane %v3464_v45, 2 }
 0x4cf   : > { %v3459_v31 = vrot.slane %v3458_v43, 2  ;;  %v3466_v26 = vmax.f32 %v3464_v45, %v3465_v24 }
 0x4d1   : > { %v3460_v23 = vmax.f32 %v3458_v43, %v3459_v31  ;;  %v3467_v56 = vrot.slane %v3466_v26, 1 }
 0x4d3   : > { %v3461_v28 = vrot.slane %v3460_v23, 1  ;;  %v3468_v58 = vmax.f32 %v3466_v26, %v3467_v56 }
 0x4d5   : > { %v3462_v29 = vmax.f32 %v3460_v23, %v3461_v28  ;;  %3675 = vxpose.xlu1.b32.start.end [1/1] (short) %v3468_v58, 128 }
 0x4d7   : > { %3469 = vxpose.xlu0.b32.start.end [1/1] (short) %v3462_v29, 128 }
 0x579   : > { %v3691_v34 = vpop.trf.xlu1 }
 0x57b   : > { %v3485_v12 = vpop.trf.xlu0 }
 0x57c   : > { %3535 = vperm.xlu2 %4108, %v3485_v12  }
 0x581   : > { %v3692_v27 = vpop.trf.xlu1 }
 0x583   : > { %v3486_v54 = vpop.trf.xlu0 }
 0x589   : > { %v3693_v50 = vpop.trf.xlu1 }
 0x58b   : > { %v3487_v5 = vpop.trf.xlu0 }
 0x58c   : > { %3545 = vperm.xlu2 %4108, %v3487_v5  }
 0x591   : > { %v3694_v9 = vpop.trf.xlu1 }
 0x593   : > { %v3488_v53 = vpop.trf.xlu0 }
 0x599   : > { %v3695_v18 = vpop.trf.xlu1 }
 0x59b   : > { %v3489_v51 = vpop.trf.xlu0 }
 0x59c   : > { %3555 = vperm.xlu2 %4108, %v3489_v51  }
 0x5a1   : > { %v3696_v8 = vpop.trf.xlu1 }
 0x5a3   : > { %v3490_v10 = vpop.trf.xlu0 }
 0x5a7   : > { %3540 = vperm.xlu1 %4107, %v3486_v54  }
 0x5a9   : > { %v3697_v44 = vpop.trf.xlu1 }
 0x5ab   : > { %v3491_v16 = vpop.trf.xlu0 }
 0x5ac   : > { %3565 = vperm.xlu2 %4108, %v3491_v16  }
 0x5af   : > { %3550 = vperm.xlu1 %4107, %v3488_v53  }
 0x5b1   : > { %v3698_v33 = vpop.trf.xlu1 }
 0x5b3   : > { %v3492_v42 = vpop.trf.xlu0 }
 0x5b7   : > { %3560 = vperm.xlu1 %4107, %v3490_v10   ;;  %v9446_v10 = vld [vmem:[#allocation154_spill] sm:$0xff] }
 0x5b9   : > { %v3699_v59 = vpop.trf.xlu1 }
 0x5bb   : > { %v3493_v49 = vpop.trf.xlu0 }
 0x5bd   : > { %3575 = vperm.xlu0 %4109, %v3493_v49  }
 0x5bf   : > { %3570 = vperm.xlu1 %4107, %v3492_v42   ;;  %v9447_v42 = vld [vmem:[#allocation156_spill] sm:$0xff] }
 0x5c1   : > { %v8121_v45 = vpop.trf.xlu1 }
 0x5c3   : > { %v3494_v39 = vpop.trf.xlu0 }
 0x5c4   : > { %3580 = vperm.xlu2 %4108, %v3494_v39  }
 0x5c9   : > { %v8123_v24 = vpop.trf.xlu1 }
 0x5cb   : > { %v3495_v57 = vpop.trf.xlu0 }
 0x5cc   : > { %3585 = vperm.xlu1 %4107, %v3495_v57  }
 0x5d1   : > { %v8125_v26 = vpop.trf.xlu1 }
 0x5d3   : > { %v3496_v43 = vpop.trf.xlu0 }
 0x5d4   : > { %3590 = vperm.xlu2 %4108, %v3496_v43   ;;  %v9450_v43 = vld [vmem:[#allocation69_spill] sm:$0xff] }
 0x5d6   : > { %v3536_v5 = vpop.permute.xlu2 %3535 }
 0x5d7   : > { %v3613_v16 = vsub.f32 %v3536_v5, %v9446_v10  ;;  %v3614_v49 = vsub.f32 %v3536_v5, %v9447_v42 }
 0x5d9   : > { %v8127_v29 = vpop.trf.xlu1 }
 0x5db   : > { %v3497_v31 = vpop.trf.xlu0 }
 0x5dc   : > { %3595 = vperm.xlu1 %4107, %v3497_v31   ;;  %v9451_v31 = vld [vmem:[#allocation62_spill] sm:$0xff] }
 0x5e1   : > { %v8129_v58 = vpop.trf.xlu1 }
 0x5e3   : > { %v3498_v23 = vpop.trf.xlu0 }
 0x5e4   : > { %3600 = vperm.xlu2 %4108, %v3498_v23  }
 0x5e6   : > { %v3546_v53 = vpop.permute.xlu2 %3545 }
 0x5e7   : > { %v3618_v23 = vsub.f32 %v3546_v53, %v9451_v31 }
 0x5e9   : > { %v8131_v12 = vpop.trf.xlu1 }
 0x5eb   : > { %v3499_v28 = vpop.trf.xlu0 }
 0x5ec   : > { %3605 = vperm.xlu1 %4107, %v3499_v28  }
 0x5f1   : > { %v8133_v54 = vpop.trf.xlu1 }
 0x5f3   : > { %v3500_v56 = vpop.trf.xlu0 }
 0x5f4   : > { %3771 = vperm.xlu1 %4107, %v3697_v44   ;;  %3610 = vperm.xlu2 %4108, %v3500_v56   ;;  %v9448_v44 = vld [vmem:[#allocation152_spill] sm:$0xff] }
 0x5fc   : > { %3741 = vperm.xlu2 %4108, %v3691_v34   ;;  %v9449_v34 = vld [vmem:[#allocation71_spill] sm:$0xff] }
 0x604   : > { %3746 = vperm.xlu2 %4108, %v3692_v27   ;;  %v3617_v27 = vsub.f32 %v3546_v53, %v9450_v43 }
 0x60c   : > { %3751 = vperm.xlu2 %4108, %v3693_v50  }
 0x614   : > { %3756 = vperm.xlu2 %4108, %v3694_v9   ;;  %v3556_v9 = vpop.permute.xlu2 %3555 }
 0x619   : > { %v3541_v51 = vpop.permute.xlu1 %3540 }
 0x61a   : > { %v3615_v39 = vsub.f32 %v3541_v51, %v9448_v44  ;;  %v3616_v57 = vsub.f32 %v3541_v51, %v9449_v34  ;;  %v9455_v44 = vld [vmem:[#allocation137_spill] sm:$0xff] }
 0x61b   : > { %v3622_v63 = vsub.f32 %v3556_v9, %v9455_v44  ;;  %v9463_v44 = vld [vmem:[#allocation119_spill] sm:$0xff] }
 0x61c   : > { %3761 = vperm.xlu2 %4108, %v3695_v18   ;;  %v3645_v50 = vmin.f32 %v3613_v16, %v3615_v39  ;;  %v3646_v28 = vmin.f32 %v3614_v49, %v3616_v57  ;;  %v9454_v18 = vld [vmem:[#allocation81_spill] sm:$0xff]  ;;  %v3566_v53 = vpop.permute.xlu2 %3565  ;;  %v9456_v49 = vld [vmem:[#allocation135_spill] sm:$0xff]  ;;  %v9457_v57 = vld [vmem:[#allocation36_spill] sm:$0xff] }
 0x61d   : > { %v3621_v42 = vsub.f32 %v3556_v9, %v9454_v18  ;;  %v9462_v18 = vld [vmem:[#allocation20_spill] sm:$0xff] }
 0x61e   : > { %v3647_v56 = vmin.f32 %v3645_v50, %v3617_v27  ;;  %v3648_v41 = vmin.f32 %v3646_v28, %v3618_v23 }
 0x621   : > { %v3551_v32 = vpop.permute.xlu1 %3550 }
 0x622   : > { %v3619_v10 = vsub.f32 %v3551_v32, %v9452_v7  ;;  %v3620_v5 = vsub.f32 %v3551_v32, %v9453_v19  ;;  %v9459_v7 = vld [vmem:[#allocation133_spill] sm:$0xff] }
 0x623   : > { %v3626_v23 = vsub.f32 %v3566_v53, %v9459_v7  ;;  %v9466_v7 = vld [vmem:[#allocation144_spill] sm:$0xff] }
 0x624   : > { %3766 = vperm.xlu2 %4108, %v3696_v8   ;;  %v3649_v51 = vmin.f32 %v3647_v56, %v3619_v10  ;;  %v3650_v34 = vmin.f32 %v3648_v41, %v3620_v5  ;;  %v9458_v8 = vld [vmem:[#allocation82_spill] sm:$0xff]  ;;  %v9460_v41 = vld [vmem:[#allocation55_spill] sm:$0xff] }
 0x625   : > { %v3625_v31 = vsub.f32 %v3566_v53, %v9458_v8  ;;  %v9461_v10 = vld [vmem:[#allocation75_spill] sm:$0xff] }
 0x626   : > { %v3651_v43 = vmin.f32 %v3649_v51, %v3621_v42  ;;  %v3652_v21 = vmin.f32 %v3650_v34, %v3622_v63 }
 0x629   : > { %v3561_v16 = vpop.permute.xlu1 %3560 }
 0x62a   : > { %v3623_v39 = vsub.f32 %v3561_v16, %v9456_v49  ;;  %v3624_v27 = vsub.f32 %v3561_v16, %v9457_v57  ;;  %v9464_v49 = vld [vmem:[#allocation139_spill] sm:$0xff] }
 0x62c   : > { %3776 = vperm.xlu2 %4108, %v3698_v33   ;;  %v3653_v19 = vmin.f32 %v3651_v43, %v3623_v39  ;;  %v3654_v32 = vmin.f32 %v3652_v21, %v3624_v27  ;;  %v3581_v33 = vpop.permute.xlu2 %3580  ;;  %v9465_v43 = vld [vmem:[#allocation88_spill] sm:$0xff] }
 0x62d   : > { %v3631_v53 = vsub.f32 %v3581_v33, %v9464_v49  ;;  %v3632_v21 = vsub.f32 %v3581_v33, %v9465_v43 }
 0x62e   : > { %v3655_v50 = vmin.f32 %v3653_v19, %v3625_v31  ;;  %v3656_v28 = vmin.f32 %v3654_v32, %v3626_v23  ;;  %v9467_v19 = vld [vmem:[#allocation35_spill] sm:$0xff] }
 0x62f   : > { %v3576_v9 = vpop.permute.xlu0 %3575 }
 0x630   : > { %v3629_v42 = vsub.f32 %v3576_v9, %v9462_v18  ;;  %v3630_v51 = vsub.f32 %v3576_v9, %v9463_v44 }
 0x631   : > { %v3571_v56 = vpop.permute.xlu1 %3570 }
 0x632   : > { %v3627_v63 = vsub.f32 %v3571_v56, %v9460_v41  ;;  %v3628_v5 = vsub.f32 %v3571_v56, %v9461_v10  ;;  %v9468_v56 = vld [vmem:[#allocation94_spill] sm:$0xff] }
 0x634   : > { %3781 = vperm.xlu2 %4108, %v3699_v59   ;;  %v3657_v34 = vmin.f32 %v3655_v50, %v3627_v63  ;;  %v3658_v16 = vmin.f32 %v3656_v28, %v3628_v5  ;;  %v3591_v59 = vpop.permute.xlu2 %3590  ;;  %v9469_v50 = vld [vmem:[#allocation10_spill] sm:$0xff] }
 0x635   : > { %v3635_v9 = vsub.f32 %v3591_v59, %v9468_v56  ;;  %v3636_v28 = vsub.f32 %v3591_v59, %v9469_v50 }
 0x636   : > { %v3659_v39 = vmin.f32 %v3657_v34, %v3629_v42  ;;  %v3660_v57 = vmin.f32 %v3658_v16, %v3630_v51  ;;  %v9470_v42 = vld [vmem:[#allocation116_spill] sm:$0xff]  ;;  %v9472_v16 = vld [vmem:[#allocation79_spill] sm:$0xff] }
 0x637   : > { %v9471_v51 = vld [vmem:[#allocation120_spill] sm:$0xff] }
 0x638   : > { %v3661_v27 = vmin.f32 %v3659_v39, %v3631_v53  ;;  %v3662_v8 = vmin.f32 %v3660_v57, %v3632_v21  ;;  %v9473_v53 = vld [vmem:[#allocation37_spill] sm:$0xff] }
 0x63c   : > { %3786 = vperm.xlu2 %4108, %v8121_v45  }
 0x63e   : > { %v3586_v31 = vpop.permute.xlu1 %3585  ;;  %v3601_v33 = vpop.permute.xlu2 %3600 }
 0x63f   : > { %v3633_v23 = vsub.f32 %v3586_v31, %v9466_v7  ;;  %v3634_v32 = vsub.f32 %v3586_v31, %v9467_v19  ;;  %v3639_v49 = vsub.f32 %v3601_v33, %v9472_v16  ;;  %v3640_v43 = vsub.f32 %v3601_v33, %v9473_v53  ;;  %v9474_v7 = vld [vmem:[#allocation11_spill] sm:$0xff] }
 0x640   : > { %v9475_v19 = vld [vmem:[#allocation131_spill] sm:$0xff] }
 0x641   : > { %v3663_v41 = vmin.f32 %v3661_v27, %v3633_v23  ;;  %v3664_v63 = vmin.f32 %v3662_v8, %v3634_v32 }
 0x643   : > { %v3665_v10 = vmin.f32 %v3663_v41, %v3635_v9  ;;  %v3666_v5 = vmin.f32 %v3664_v63, %v3636_v28 }
 0x644   : > { %3791 = vperm.xlu2 %4108, %v8123_v24  }
 0x64c   : > { %3796 = vperm.xlu2 %4108, %v8125_v26  }
 0x64e   : > { %v3596_v45 = vpop.permute.xlu1 %3595  ;;  %v3611_v18 = vpop.permute.xlu2 %3610 }
 0x64f   : > { %v3637_v44 = vsub.f32 %v3596_v45, %v9470_v42  ;;  %v3638_v34 = vsub.f32 %v3596_v45, %v9471_v51  ;;  %v3643_v50 = vsub.f32 %v3611_v18, %v9435_v0 }
 0x651   : > { %v3667_v21 = vmin.f32 %v3665_v10, %v3637_v44  ;;  %v3668_v39 = vmin.f32 %v3666_v5, %v3638_v34 }
 0x653   : > { %v3669_v57 = vmin.f32 %v3667_v21, %v3639_v49  ;;  %v3670_v27 = vmin.f32 %v3668_v39, %v3640_v43 }
 0x654   : > { %3801 = vperm.xlu2 %4108, %v8127_v29   ;;  %v3644_v29 = vsub.f32 %v3611_v18, %v9437_v48 }
 0x656   : > { %v3742_v24 = vpop.permute.xlu2 %3741 }
 0x657   : > { %v3819_v26 = vsub.f32 %v3742_v24, %v7790_v35  ;;  %v3820_v8 = vsub.f32 %v3742_v24, %v7834_v1 }
 0x65c   : > { %3806 = vperm.xlu2 %4108, %v8129_v58  }
 0x65e   : > { %v3606_v59 = vpop.permute.xlu1 %3605  ;;  %v3747_v31 = vpop.permute.xlu2 %3746 }
 0x65f   : > { %v3641_v23 = vsub.f32 %v3606_v59, %v9474_v7  ;;  %v3642_v32 = vsub.f32 %v3606_v59, %v9475_v19  ;;  %v3821_v56 = vsub.f32 %v3747_v31, %v7839_v62  ;;  %v3822_v9 = vsub.f32 %v3747_v31, %v7841_v22 }
 0x661   : > { %v3671_v28 = vmin.f32 %v3669_v57, %v3641_v23  ;;  %v3672_v58 = vmin.f32 %v3670_v27, %v3642_v32  ;;  %v3851_v41 = vmin.f32 %v3819_v26, %v3821_v56  ;;  %v3852_v35 = vmin.f32 %v3820_v8, %v3822_v9 }
 0x663   : > { %v8176_v63 = vmin.f32 %v3671_v28, %v3643_v50  ;;  %v8178_v1 = vmin.f32 %v3672_v58, %v3644_v29 }
 0x664   : > { %3811 = vperm.xlu2 %4108, %v8131_v12  }
 0x666   : > { %v3752_v10 = vpop.permute.xlu2 %3751  ;;  %v3772_v39 = vpop.permute.xlu1 %3771 }
 0x667   : > { %v3823_v5 = vsub.f32 %v3752_v10, %v7573_v47  ;;  %v3824_v62 = vsub.f32 %v3752_v10, %v7632_v13  ;;  %v3831_v24 = vsub.f32 %v3772_v39, %v7970_v55  ;;  %v3832_v26 = vsub.f32 %v3772_v39, %v7959_v20 }
 0x669   : > { %v3853_v22 = vmin.f32 %v3851_v41, %v3823_v5  ;;  %v3854_v33 = vmin.f32 %v3852_v35, %v3824_v62  ;;  %v9476_v35 = vld [vmem:[#allocation92_spill] sm:$0xff] }
 0x66c   : > { %3816 = vperm.xlu2 %4108, %v8133_v54  }
 0x66e   : > { %v3757_v0 = vpop.permute.xlu2 %3756 }
 0x66f   : > { %v3825_v48 = vsub.f32 %v3757_v0, %v7903_v61  ;;  %v3826_v45 = vsub.f32 %v3757_v0, %v7882_v6 }
 0x671   : > { %v3855_v18 = vmin.f32 %v3853_v22, %v3825_v48  ;;  %v3856_v42 = vmin.f32 %v3854_v33, %v3826_v45  ;;  %v9478_v22 = vld [vmem:[#allocation48_spill] sm:$0xff] }
 0x676   : > { %v3762_v44 = vpop.permute.xlu2 %3761 }
 0x677   : > { %v3827_v13 = vsub.f32 %v3762_v44, %v7929_v40  ;;  %v3828_v53 = vsub.f32 %v3762_v44, %v7919_v15 }
 0x679   : > { %v3857_v21 = vmin.f32 %v3855_v18, %v3827_v13  ;;  %v3858_v6 = vmin.f32 %v3856_v42, %v3828_v53 }
 0x67e   : > { %v3767_v51 = vpop.permute.xlu2 %3766 }
 0x67f   : > { %v3829_v54 = vsub.f32 %v3767_v51, %v7675_v4  ;;  %v3830_v61 = vsub.f32 %v3767_v51, %v7737_v30 }
 0x681   : > { %v3859_v57 = vmin.f32 %v3857_v21, %v3829_v54  ;;  %v3860_v27 = vmin.f32 %v3858_v6, %v3830_v61 }
 0x683   : > { %v3861_v15 = vmin.f32 %v3859_v57, %v3831_v24  ;;  %v3862_v31 = vmin.f32 %v3860_v27, %v3832_v26 }
 0x686   : > { %v3777_v34 = vpop.permute.xlu2 %3776 }
 0x687   : > { %v3833_v8 = vsub.f32 %v3777_v34, %v8000_v37  ;;  %v3834_v40 = vsub.f32 %v3777_v34, %v7992_v14 }
 0x689   : > { %v3863_v7 = vmin.f32 %v3861_v15, %v3833_v8  ;;  %v3864_v23 = vmin.f32 %v3862_v31, %v3834_v40 }
 0x68e   : > { %v3782_v12 = vpop.permute.xlu2 %3781 }
 0x68f   : > { %v3835_v4 = vsub.f32 %v3782_v12, %v7763_v11  ;;  %v3836_v30 = vsub.f32 %v3782_v12, %v7779_v38 }
 0x691   : > { %v3865_v55 = vmin.f32 %v3863_v7, %v3835_v4  ;;  %v3866_v56 = vmin.f32 %v3864_v23, %v3836_v30  ;;  %v3895_v7 = vld [vmem:[%s196_s8] sm:$0x77] }
 0x696   : > { %v3787_v16 = vpop.permute.xlu2 %3786 }
 0x697   : > { %v3837_v19 = vsub.f32 %v3787_v16, %v8023_v17  ;;  %v3838_v32 = vsub.f32 %v3787_v16, %v8015_v36 }
 0x699   : > { %v3867_v14 = vmin.f32 %v3865_v55, %v3837_v19  ;;  %v3868_v9 = vmin.f32 %v3866_v56, %v3838_v32  ;;  %v3903_v32 = vperm.slane %v3895_v7, 0  ;;  %v3904_v55 = vperm.slane %v3895_v7, 4 }
 0x69a   : > { %v3917_v56 = vperm.slane %v3895_v7, 1 }
 0x69e   : > { %v3792_v49 = vpop.permute.xlu2 %3791 }
 0x69f   : > { %v3839_v20 = vsub.f32 %v3792_v49, %v8041_v60  ;;  %v3840_v37 = vsub.f32 %v3792_v49, %v8035_v46  ;;  %v9477_v60 = vld [vmem:[#allocation96_spill] sm:$0xff] }
 0x6a1   : > { %v3869_v38 = vmin.f32 %v3867_v14, %v3839_v20  ;;  %v3870_v28 = vmin.f32 %v3868_v9, %v3840_v37  ;;  %v3918_v37 = vperm.slane %v3895_v7, 5 }
 0x6a6   : > { %v3797_v47 = vpop.permute.xlu2 %3796 }
 0x6a7   : > { %v3841_v50 = vsub.f32 %v3797_v47, %v7875_v25  ;;  %v3842_v11 = vsub.f32 %v3797_v47, %v7913_v2  ;;  %v9479_v25 = vld [vmem:[#allocation157_spill] sm:$0xff] }
 0x6a9   : > { %v3871_v36 = vmin.f32 %v3869_v38, %v3841_v50  ;;  %v3872_v41 = vmin.f32 %v3870_v28, %v3842_v11  ;;  %v3931_v50 = vperm.slane %v3895_v7, 2  ;;  %v3932_v38 = vperm.slane %v3895_v7, 6 }
 0x6ae   : > { %v3802_v43 = vpop.permute.xlu2 %3801 }
 0x6af   : > { %v3843_v58 = vsub.f32 %v3802_v43, %v8073_v3  ;;  %v3844_v17 = vsub.f32 %v3802_v43, %v8056_v52  ;;  %v9480_v3 = vld [vmem:[#allocation95_spill] sm:$0xff]  ;;  %v9481_v52 = vld [vmem:[#allocation49_spill] sm:$0xff] }
 0x6b1   : > { %v3873_v46 = vmin.f32 %v3871_v36, %v3843_v58  ;;  %v3874_v62 = vmin.f32 %v3872_v41, %v3844_v17 }
 0x6b6   : > { %v3807_v59 = vpop.permute.xlu2 %3806 }
 0x6b7   : > { %v3845_v10 = vsub.f32 %v3807_v59, %v9476_v35  ;;  %v3846_v5 = vsub.f32 %v3807_v59, %v9477_v60 }
 0x6b9   : > { %v3875_v2 = vmin.f32 %v3873_v46, %v3845_v10  ;;  %v3876_v48 = vmin.f32 %v3874_v62, %v3846_v5 }
 0x6be   : > { %v3812_v29 = vpop.permute.xlu2 %3811 }
 0x6bf   : > { %v3847_v33 = vsub.f32 %v3812_v29, %v9478_v22  ;;  %v3848_v0 = vsub.f32 %v3812_v29, %v9479_v25 }
 0x6c1   : > { %v3877_v18 = vmin.f32 %v3875_v2, %v3847_v33  ;;  %v3878_v42 = vmin.f32 %v3876_v48, %v3848_v0  ;;  %v9482_v33 = vlaneseq }
 0x6c3   : > { %vm3947_vm11 = vcmp.lt.s32.totalorder %v9482_v33, 256 }
 0x6c6   : > { %v3817_v45 = vpop.permute.xlu2 %3816 }
 0x6c7   : > { %v3849_v44 = vsub.f32 %v3817_v45, %v9480_v3  ;;  %v3850_v51 = vsub.f32 %v3817_v45, %v9481_v52 }
 0x6c9   : > { %v3879_v34 = vmin.f32 %v3877_v18, %v3849_v44  ;;  %v3880_v12 = vmin.f32 %v3878_v42, %v3850_v51 }
 0x6cb   : > { %v3881_v16 = vmin.f32 %v8176_v63, %v3879_v34  ;;  %v3882_v49 = vmin.f32 %v8178_v1, %v3880_v12 }
 0x6cd   : > { %v3883_v47 = vrot.slane %v3881_v16, 4  ;;  %v3889_v13 = vrot.slane %v3882_v49, 4 }
 0x6cf   : > { %v3884_v53 = vmin.f32 %v3881_v16, %v3883_v47  ;;  %v3890_v43 = vmin.f32 %v3882_v49, %v3889_v13 }
 0x6d1   : > { %v3885_v54 = vrot.slane %v3884_v53, 2  ;;  %v3891_v61 = vrot.slane %v3890_v43, 2 }
 0x6d3   : > { %v3886_v21 = vmin.f32 %v3884_v53, %v3885_v54  ;;  %v3892_v6 = vmin.f32 %v3890_v43, %v3891_v61 }
 0x6d5   : > { %v3887_v39 = vrot.slane %v3886_v21, 1  ;;  %v3893_v57 = vrot.slane %v3892_v6, 1 }
 0x6d7   : > { %v3888_v27 = vmin.f32 %v3886_v21, %v3887_v39  ;;  %v3894_v24 = vmin.f32 %v3892_v6, %v3893_v57 }
 0x6d9   : > { %v3896_v26 = vmul.f32 10.0, %v3888_v27  ;;  %v3897_v8 = vmul.f32 10.0, %v3894_v24  ;;  %v3911_v40 = vmul.f32 5.0, %v3888_v27  ;;  %v3912_v59 = vmul.f32 5.0, %v3894_v24 }
 0x6da   : > { %v3925_v63 = vmul.f32 2.5, %v3888_v27  ;;  %v3926_v1 = vmul.f32 2.5, %v3894_v24 }
 0x6db   : > { %v3898_v15 = vmul.f32 1.442695, %v3896_v26  ;;  %v3900_v31 = vmul.f32 1.442695, %v3897_v8  ;;  %v3913_v4 = vmul.f32 1.442695, %v3911_v40 }
 0x6dc   : > { %v3915_v30 = vmul.f32 1.442695, %v3912_v59  ;;  %v3927_v23 = vmul.f32 1.442695, %v3925_v63  ;;  %v3929_v19 = vmul.f32 1.442695, %v3926_v1 }
 0x6dd   : > { %4238 = vpow2.f32 %v3898_v15 }
 0x6de   : > { %4240 = vpow2.f32 %v3900_v31 }
 0x6df   : > { %4242 = vpow2.f32 %v3913_v4 }
 0x6e0   : > { %4244 = vpow2.f32 %v3915_v30 }
 0x6e1   : > { %4246 = vpow2.f32 %v3927_v23 }
 0x6e2   : > { %4248 = vpow2.f32 %v3929_v19 }
 0x6e3   : > { %v4239_v20 = vpop.eup %4238 }
 0x6e4   : > { %v4241_v14 = vpop.eup %4240  ;;  %v3907_v9 = vmul.f32 %v4239_v20, %v3903_v32 }
 0x6e5   : > { %v4243_v11 = vpop.eup %4242  ;;  %v3908_v29 = vmul.f32 %v4241_v14, %v3904_v55 }
 0x6e6   : > { %v4245_v28 = vpop.eup %4244  ;;  %v3921_v58 = vmul.f32 %v4243_v11, %v3917_v56 }
 0x6e7   : > { %v4247_v17 = vpop.eup %4246  ;;  %v3922_v36 = vmul.f32 %v4245_v28, %v3918_v37 }
 0x6e8   : > { %v4249_v41 = vpop.eup %4248  ;;  %v3923_v35 = vadd.f32 %v3921_v58, %v3907_v9  ;;  %v3935_v10 = vmul.f32 %v4247_v17, %v3931_v50 }
 0x6e9   : > { %v3924_v60 = vadd.f32 %v3922_v36, %v3908_v29  ;;  %v3936_v5 = vmul.f32 %v4249_v41, %v3932_v38 }
 0x6ea   : > { %v3937_v46 = vadd.f32 %v3935_v10, %v3923_v35 }
 0x6eb   : > { %v3938_v62 = vadd.f32 %v3936_v5, %v3924_v60 }
 0x6ed   : > { %v3941_v22 = vrot.slane %v3938_v62, 7 }
 0x6ef   : > { %v3943_v25 = vsel %vm3942_vm2, %v3937_v46, %v3941_v22 }
 0x6f0   : > { %3949 = vst.msk [vmem:[%s191_s24] sm:$0x3] %vm3947_vm11, %v3943_v25 }
 0x6f1   : > { %4278 = shalt.err (!%p4275_p3)
}
 0x6f2   : > { %4066 = dma.vmem_to_hbm [thread:$0]  (%p4374_p5), %s3964_s25, 32, %s3966_s16, %s3951_s26  }
 0x6f3 PF: > { %p4072_p4 = scmp.ge.s32.totalorder %s4313_s15, 2  ;;  %s3977_s7 = sand.u32 1, %s4301_s12  }
 0x6f4   : > { %s3978_s8 = scalar_lea.sflag [#allocation4], %s3977_s7 }
 0x6f5   : > { %p4069_p7 = pnand %p4072_p4, %p4378_p6 }
 0x6f7   : > { %p4070_p8 = pneg %p4069_p7 }
 0x6f9   : > { %4296 = dma.done.wait (%p4070_p8), %s3978_s8, 32  }
 0x6fa   : > { %4298 = vsyncadd (%p4070_p8), %s3978_s8, 4294967264  ;;  %p13_p9 = scmp.ge.s32.totalorder %s4361_s18, 4   ;;  %s9483_s12 = smov %s4305_s13 }
 0x6fb   : > { %s9484_s13 = smov %s4309_s14  ;;  %s9485_s14 = smov %s4372_s21 }
 0x6fc   : > { %s9486_s15 = smov %s4361_s18  ;;  %15 = sbr.rel (!%p13_p9) target bundleno = 3 (0x3), region = 73 }
 0x701   :  { %3984 = vsyncpa [#allocation4], 1 }
 0x702   :  { %3986 = vsyncpa [#allocation4 + $0x1], 1 }

</bundles_post_ra>
